<compile_context>
chip_gen: v7x
topology: tpu7x:2x2x1
jax: 0.10.0
libtpu: 0.0.40
codegen_flags: <defaults>
</compile_context>

<pallas_src>
import jax
import jax.numpy as jnp
from jax import lax
from jax.experimental import pallas as pl
from jax.experimental.pallas import tpu as pltpu

BN_EPS = 1e-5
HIDDEN = 2048
OUT = 512
HIDDEN_TILE = 1024  # must divide HIDDEN and be a multiple of 128


def _ae_kernel(x_ref, w1_ref, g1_ref, be1_ref, w2_ref, g2_ref, be2_ref,
               o_ref, z_acc):
    """One (branch, hidden-tile) grid step of a fused MLP branch."""
    k = pl.program_id(1)

    @pl.when(k == 0)
    def _init():
        z_acc[...] = jnp.zeros_like(z_acc)

    # ---- Linear(in, hidden-tile) ----  (bias omitted: cancelled by BN below)
    x = x_ref[0]                                     # (B, F)   f32
    w1 = w1_ref[0].astype(jnp.float32)               # (F, TH)  bf16 -> f32
    h = jnp.dot(x, w1, preferred_element_type=jnp.float32)      # (B, TH)

    # ---- BatchNorm1d (training mode: batch stats, biased var) + ReLU ----
    mu1 = jnp.mean(h, axis=0, keepdims=True)
    var1 = jnp.mean((h - mu1) ** 2, axis=0, keepdims=True)
    scale1 = g1_ref[0] * lax.rsqrt(var1 + BN_EPS)    # fold gamma into rsqrt
    shift1 = be1_ref[0] - mu1 * scale1
    h = jnp.maximum(h * scale1 + shift1, 0.0)

    # ---- Linear(2048, 512): accumulate partial products over hidden tiles ----
    w2 = w2_ref[0].astype(jnp.float32)               # (TH, O)
    z_acc[...] += jnp.dot(h, w2, preferred_element_type=jnp.float32)

    # ---- last hidden tile: BatchNorm1d(512) + Tanh, write output ----
    @pl.when(k == pl.num_programs(1) - 1)
    def _finalize():
        z = z_acc[...]
        mu2 = jnp.mean(z, axis=0, keepdims=True)
        var2 = jnp.mean((z - mu2) ** 2, axis=0, keepdims=True)
        scale2 = g2_ref[0] * lax.rsqrt(var2 + BN_EPS)
        shift2 = be2_ref[0] - mu2 * scale2
        o_ref[0] = jnp.tanh(z * scale2 + shift2).astype(o_ref.dtype)


def _ae_pallas(X, W1, G1, BE1, W2, G2, BE2):
    nb, B, F = X.shape                 # (2, batch, padded_in_features)
    H = W1.shape[2]
    O = W2.shape[2]
    TH = HIDDEN_TILE
    assert H % TH == 0 and TH % 128 == 0

    grid = (nb, H // TH)
    in_specs = [
        pl.BlockSpec((1, B, F), lambda i, k: (i, 0, 0)),    # X (whole branch input)
        pl.BlockSpec((1, F, TH), lambda i, k: (i, 0, k)),   # W1 column tile
        pl.BlockSpec((1, 1, TH), lambda i, k: (i, 0, k)),   # gamma1 tile
        pl.BlockSpec((1, 1, TH), lambda i, k: (i, 0, k)),   # beta1 tile
        pl.BlockSpec((1, TH, O), lambda i, k: (i, k, 0)),   # W2 row tile
        pl.BlockSpec((1, 1, O), lambda i, k: (i, 0, 0)),    # gamma2
        pl.BlockSpec((1, 1, O), lambda i, k: (i, 0, 0)),    # beta2
    ]
    out_specs = pl.BlockSpec((1, B, O), lambda i, k: (i, 0, 0))

    return pl.pallas_call(
        _ae_kernel,
        out_shape=jax.ShapeDtypeStruct((nb, B, O), jnp.float32),
        grid_spec=pltpu.PrefetchScalarGridSpec(
            num_scalar_prefetch=0,
            grid=grid,
            in_specs=in_specs,
            out_specs=out_specs,
            scratch_shapes=[pltpu.VMEM((B, O), jnp.float32)],
        ),
        compiler_params=pltpu.CompilerParams(
            # branch axis parallel (megacore shards it on v7x), hidden-tile
            # axis is a reduction for the second matmul -> arbitrary.
            dimension_semantics=("parallel", "arbitrary"),
            vmem_limit_bytes=32 << 20,   # fits v7x's 64 MiB physical VMEM
        ),
    )(X, W1, G1, BE1, W2, G2, BE2)


def _round_up(v, m):
    return ((v + m - 1) // m) * m


def pack_autoencoder_params(enc_params, dec_params):
    """Stack encoder/decoder params for the fused 2-branch kernel.

    - First-layer weights are zero-padded along the input dim to a shared,
      lane-aligned width; the inputs are padded with zeros too, so the matmul
      result is unchanged.
    - Weights are cast to bfloat16 (halves the dominant HBM traffic);
      BN gamma/beta stay f32.
    - Linear biases are NOT packed: they are cancelled exactly by the
      mean-subtraction of the following training-mode BatchNorm.
    """
    f1 = enc_params[0].shape[0]
    f2 = dec_params[0].shape[0]
    F = _round_up(max(f1, f2), 128)

    def prep(p):
        w1, _b1, g1, be1, w2, _b2, g2, be2 = p
        w1 = jnp.pad(w1, ((0, F - w1.shape[0]), (0, 0)))
        return w1, g1, be1, w2, g2, be2

    parts = [prep(enc_params), prep(dec_params)]
    W1, G1, BE1, W2, G2, BE2 = (jnp.stack(t) for t in zip(*parts))
    return (W1.astype(jnp.bfloat16), G1, BE1,
            W2.astype(jnp.bfloat16), G2, BE2)


def autoencoder_forward(x, y, packed):
    """Returns (encoded, decoded), each (B, 512) float32."""
    W1, G1, BE1, W2, G2, BE2 = packed
    F = W1.shape[1]
    xp = jnp.pad(x, ((0, 0), (0, F - x.shape[1])))
    yp = jnp.pad(y, ((0, 0), (0, F - y.shape[1])))
    X = jnp.stack([xp, yp])                         # (2, B, F)
    out = _ae_pallas(X, W1, G1, BE1, W2, G2, BE2)   # (2, B, 512)
    return out[0], out[1]


def init_branch_params(key, in_features, hidden=HIDDEN, out_features=OUT):
    """Deterministic synthetic parameters matching PyTorch layer shapes.

    PyTorch Linear weight is (out, in); stored here transposed as (in, out).
    BatchNorm gamma init = 1, beta init = 0 (PyTorch defaults).
    """
    k1, k2, k3, k4 = jax.random.split(key, 4)
    s1 = 1.0 / jnp.sqrt(in_features)
    s2 = 1.0 / jnp.sqrt(hidden)
    w1 = jax.random.normal(k1, (in_features, hidden), jnp.float32) * s1
    b1 = jax.random.normal(k2, (1, hidden), jnp.float32) * s1
    w2 = jax.random.normal(k3, (hidden, out_features), jnp.float32) * s2
    b2 = jax.random.normal(k4, (1, out_features), jnp.float32) * s2
    g1 = jnp.ones((1, hidden), jnp.float32)
    be1 = jnp.zeros((1, hidden), jnp.float32)
    g2 = jnp.ones((1, out_features), jnp.float32)
    be2 = jnp.zeros((1, out_features), jnp.float32)
    return (w1, b1, g1, be1, w2, b2, g2, be2)


def _reference_branch(x, params):
    """Pure-JAX reference of the PyTorch forward (training-mode BN, biases
    included). Uses the same bf16 weight storage as the kernel so the only
    remaining differences are FP rounding."""
    w1, b1, g1, be1, w2, b2, g2, be2 = params
    w1 = w1.astype(jnp.bfloat16).astype(jnp.float32)
    w2 = w2.astype(jnp.bfloat16).astype(jnp.float32)
    h = x @ w1 + b1
    mu = h.mean(0, keepdims=True)
    var = ((h - mu) ** 2).mean(0, keepdims=True)
    h = (h - mu) / jnp.sqrt(var + BN_EPS) * g1 + be1
    h = jnp.maximum(h, 0.0)
    z = h @ w2 + b2
    mu2 = z.mean(0, keepdims=True)
    var2 = ((z - mu2) ** 2).mean(0, keepdims=True)
    z = (z - mu2) / jnp.sqrt(var2 + BN_EPS) * g2 + be2
    return jnp.tanh(z)


if __name__ == "__main__":
    # Small shapes consistent with the module: x:(B, input_size), y:(B, input_size2)
    B = 8
    input_size = 256
    input_size2 = 384
    hidden_size = 32  # present in the PyTorch __init__ signature but unused by forward

    key = jax.random.PRNGKey(0)
    kx, ky, kenc, kdec = jax.random.split(key, 4)
    x = jax.random.normal(kx, (B, input_size), jnp.float32)
    y = jax.random.normal(ky, (B, input_size2), jnp.float32)

    enc_params = init_branch_params(kenc, input_size)
    dec_params = init_branch_params(kdec, input_size2)
    packed = pack_autoencoder_params(enc_params, dec_params)

    fwd = jax.jit(autoencoder_forward)
    encoded, decoded = fwd(x, y, packed)
    jax.block_until_ready((encoded, decoded))

    # Sanity check against the pure-JAX reference (PyTorch semantics with
    # biases; differences are FP rounding only).
    ref_enc = _reference_branch(x, enc_params)
    ref_dec = _reference_branch(y, dec_params)
    assert encoded.shape == (B, OUT) and decoded.shape == (B, OUT)
    assert jnp.allclose(encoded, ref_enc, atol=1e-3, rtol=1e-3), \
        float(jnp.max(jnp.abs(encoded - ref_enc)))
    assert jnp.allclose(decoded, ref_dec, atol=1e-3, rtol=1e-3), \
        float(jnp.max(jnp.abs(decoded - ref_dec)))

    print("KERNEL_OK")
</pallas_src>

<mosaic_0001>
module attributes {stable_mosaic.version = 11 : i64} {
  func.func @_ae_kernel(%arg0: i32, %arg1: i32, %arg2: memref<1x8x384xf32, #tpu.memory_space<vmem>>, %arg3: memref<1x384x1024xbf16, #tpu.memory_space<vmem>>, %arg4: memref<1x1x1024xf32, #tpu.memory_space<vmem>>, %arg5: memref<1x1x1024xf32, #tpu.memory_space<vmem>>, %arg6: memref<1x1024x512xbf16, #tpu.memory_space<vmem>>, %arg7: memref<1x1x512xf32, #tpu.memory_space<vmem>>, %arg8: memref<1x1x512xf32, #tpu.memory_space<vmem>>, %arg9: memref<1x8x512xf32, #tpu.memory_space<vmem>>, %arg10: memref<8x512xf32, #tpu.memory_space<vmem>>) attributes {dimension_semantics = [#tpu.dimension_semantics<parallel>, #tpu.dimension_semantics<arbitrary>], iteration_bounds = array<i64: 2, 2>, scalar_prefetch = 0 : i64, scratch_operands = 1 : i64, tpu.core_type = #tpu.core_type<tc>, window_params = [{transform_indices = @transform_0, window_bounds = array<i64: 1, 8, 384>}, {transform_indices = @transform_1, window_bounds = array<i64: 1, 384, 1024>}, {transform_indices = @transform_2, window_bounds = array<i64: 1, 1, 1024>}, {transform_indices = @transform_3, window_bounds = array<i64: 1, 1, 1024>}, {transform_indices = @transform_4, window_bounds = array<i64: 1, 1024, 512>}, {transform_indices = @transform_5, window_bounds = array<i64: 1, 1, 512>}, {transform_indices = @transform_6, window_bounds = array<i64: 1, 1, 512>}, {transform_indices = @transform_7, window_bounds = array<i64: 1, 8, 512>}]} {
    %c0_i32 = arith.constant 0 : i32
    %0 = arith.cmpi eq, %arg1, %c0_i32 : i32
    %1 = arith.extui %0 : i1 to i32
    %c0_i32_0 = arith.constant 0 : i32
    %2 = arith.cmpi ne, %1, %c0_i32_0 : i32
    scf.if %2 {
      %cst_27 = arith.constant 0.000000e+00 : f32
      %46 = vector.broadcast %cst_27 : f32 to vector<8x512xf32>
      %c0_28 = arith.constant 0 : index
      %c0_29 = arith.constant 0 : index
      %47 = vector.load %arg10[%c0_28, %c0_29] : memref<8x512xf32, #tpu.memory_space<vmem>>, vector<8x512xf32>
      tpu.vector_store %arg10[%c0_28, %c0_29], %46 {strides = array<i32>} : memref<8x512xf32, #tpu.memory_space<vmem>>, vector<8x512xf32>,
    } else {
    }
    %c0 = arith.constant 0 : index
    %c0_1 = arith.constant 0 : index
    %c0_2 = arith.constant 0 : index
    %3 = vector.load %arg2[%c0, %c0_1, %c0_2] : memref<1x8x384xf32, #tpu.memory_space<vmem>>, vector<1x8x384xf32>
    %4 = vector.shape_cast %3 : vector<1x8x384xf32> to vector<8x384xf32>
    %c0_3 = arith.constant 0 : index
    %c0_4 = arith.constant 0 : index
    %c0_5 = arith.constant 0 : index
    %5 = vector.load %arg3[%c0_3, %c0_4, %c0_5] : memref<1x384x1024xbf16, #tpu.memory_space<vmem>>, vector<1x384x1024xbf16>
    %6 = vector.shape_cast %5 : vector<1x384x1024xbf16> to vector<384x1024xbf16>
    %7 = arith.extf %6 : vector<384x1024xbf16> to vector<384x1024xf32>
    %cst = arith.constant dense<0.000000e+00> : vector<8x1024xf32>
    %8 = tpu.matmul %4, %7, %cst {dimension_numbers = #tpu.dot_dimension_numbers<[1], [0], [0], [1], [0, 0, 1, 1], [], []>} : vector<8x384xf32>, vector<384x1024xf32>, vector<8x1024xf32> -> vector<8x1024xf32>
    %cst_6 = arith.constant dense<0.000000e+00> : vector<1024xf32>
    %9 = vector.multi_reduction <add>, %8, %cst_6 [0] : vector<8x1024xf32> to vector<1024xf32>
    %10 = vector.shape_cast %9 : vector<1024xf32> to vector<1x1024xf32>
    %cst_7 = arith.constant 8.000000e+00 : f32
    %11 = vector.broadcast %cst_7 : f32 to vector<1x1024xf32>
    %12 = arith.divf %10, %11 : vector<1x1024xf32>
    %13 = vector.broadcast %12 : vector<1x1024xf32> to vector<8x1024xf32>
    %14 = arith.subf %8, %13 : vector<8x1024xf32>
    %15 = arith.mulf %14, %14 : vector<8x1024xf32>
    %cst_8 = arith.constant dense<0.000000e+00> : vector<1024xf32>
    %16 = vector.multi_reduction <add>, %15, %cst_8 [0] : vector<8x1024xf32> to vector<1024xf32>
    %17 = vector.shape_cast %16 : vector<1024xf32> to vector<1x1024xf32>
    %cst_9 = arith.constant 8.000000e+00 : f32
    %18 = vector.broadcast %cst_9 : f32 to vector<1x1024xf32>
    %19 = arith.divf %17, %18 : vector<1x1024xf32>
    %c0_10 = arith.constant 0 : index
    %c0_11 = arith.constant 0 : index
    %c0_12 = arith.constant 0 : index
    %20 = vector.load %arg4[%c0_10, %c0_11, %c0_12] : memref<1x1x1024xf32, #tpu.memory_space<vmem>>, vector<1x1x1024xf32>
    %21 = vector.shape_cast %20 : vector<1x1x1024xf32> to vector<1x1024xf32>
    %cst_13 = arith.constant 9.99999974E-6 : f32
    %22 = vector.broadcast %cst_13 : f32 to vector<1x1024xf32>
    %23 = arith.addf %19, %22 : vector<1x1024xf32>
    %24 = math.rsqrt %23 : vector<1x1024xf32>
    %25 = arith.mulf %21, %24 : vector<1x1024xf32>
    %c0_14 = arith.constant 0 : index
    %c0_15 = arith.constant 0 : index
    %c0_16 = arith.constant 0 : index
    %26 = vector.load %arg5[%c0_14, %c0_15, %c0_16] : memref<1x1x1024xf32, #tpu.memory_space<vmem>>, vector<1x1x1024xf32>
    %27 = vector.shape_cast %26 : vector<1x1x1024xf32> to vector<1x1024xf32>
    %28 = arith.mulf %12, %25 : vector<1x1024xf32>
    %29 = arith.subf %27, %28 : vector<1x1024xf32>
    %30 = vector.broadcast %25 : vector<1x1024xf32> to vector<8x1024xf32>
    %31 = arith.mulf %8, %30 : vector<8x1024xf32>
    %32 = vector.broadcast %29 : vector<1x1024xf32> to vector<8x1024xf32>
    %33 = arith.addf %31, %32 : vector<8x1024xf32>
    %cst_17 = arith.constant 0.000000e+00 : f32
    %34 = vector.broadcast %cst_17 : f32 to vector<8x1024xf32>
    %35 = arith.maximumf %33, %34 : vector<8x1024xf32>
    %c0_18 = arith.constant 0 : index
    %c0_19 = arith.constant 0 : index
    %c0_20 = arith.constant 0 : index
    %36 = vector.load %arg6[%c0_18, %c0_19, %c0_20] : memref<1x1024x512xbf16, #tpu.memory_space<vmem>>, vector<1x1024x512xbf16>
    %37 = vector.shape_cast %36 : vector<1x1024x512xbf16> to vector<1024x512xbf16>
    %38 = arith.extf %37 : vector<1024x512xbf16> to vector<1024x512xf32>
    %c0_21 = arith.constant 0 : index
    %c0_22 = arith.constant 0 : index
    %39 = vector.load %arg10[%c0_21, %c0_22] : memref<8x512xf32, #tpu.memory_space<vmem>>, vector<8x512xf32>
    %cst_23 = arith.constant dense<0.000000e+00> : vector<8x512xf32>
    %40 = tpu.matmul %35, %38, %cst_23 {dimension_numbers = #tpu.dot_dimension_numbers<[1], [0], [0], [1], [0, 0, 1, 1], [], []>} : vector<8x1024xf32>, vector<1024x512xf32>, vector<8x512xf32> -> vector<8x512xf32>
    %41 = arith.addf %39, %40 : vector<8x512xf32>
    %c0_24 = arith.constant 0 : index
    %c0_25 = arith.constant 0 : index
    %42 = vector.load %arg10[%c0_24, %c0_25] : memref<8x512xf32, #tpu.memory_space<vmem>>, vector<8x512xf32>
    tpu.vector_store %arg10[%c0_24, %c0_25], %41 {strides = array<i32>} : memref<8x512xf32, #tpu.memory_space<vmem>>, vector<8x512xf32>,
    %c1_i32 = arith.constant 1 : i32
    %43 = arith.cmpi eq, %arg1, %c1_i32 : i32
    %44 = arith.extui %43 : i1 to i32
    %c0_i32_26 = arith.constant 0 : i32
    %45 = arith.cmpi ne, %44, %c0_i32_26 : i32
    scf.if %45 {
      %c0_27 = arith.constant 0 : index
      %c0_28 = arith.constant 0 : index
      %46 = vector.load %arg10[%c0_27, %c0_28] : memref<8x512xf32, #tpu.memory_space<vmem>>, vector<8x512xf32>
      %cst_29 = arith.constant dense<0.000000e+00> : vector<512xf32>
      %47 = vector.multi_reduction <add>, %46, %cst_29 [0] : vector<8x512xf32> to vector<512xf32>
      %48 = vector.shape_cast %47 : vector<512xf32> to vector<1x512xf32>
      %cst_30 = arith.constant 8.000000e+00 : f32
      %49 = vector.broadcast %cst_30 : f32 to vector<1x512xf32>
      %50 = arith.divf %48, %49 : vector<1x512xf32>
      %51 = vector.broadcast %50 : vector<1x512xf32> to vector<8x512xf32>
      %52 = arith.subf %46, %51 : vector<8x512xf32>
      %53 = arith.mulf %52, %52 : vector<8x512xf32>
      %cst_31 = arith.constant dense<0.000000e+00> : vector<512xf32>
      %54 = vector.multi_reduction <add>, %53, %cst_31 [0] : vector<8x512xf32> to vector<512xf32>
      %55 = vector.shape_cast %54 : vector<512xf32> to vector<1x512xf32>
      %cst_32 = arith.constant 8.000000e+00 : f32
      %56 = vector.broadcast %cst_32 : f32 to vector<1x512xf32>
      %57 = arith.divf %55, %56 : vector<1x512xf32>
      %c0_33 = arith.constant 0 : index
      %c0_34 = arith.constant 0 : index
      %c0_35 = arith.constant 0 : index
      %58 = vector.load %arg7[%c0_33, %c0_34, %c0_35] : memref<1x1x512xf32, #tpu.memory_space<vmem>>, vector<1x1x512xf32>
      %59 = vector.shape_cast %58 : vector<1x1x512xf32> to vector<1x512xf32>
      %cst_36 = arith.constant 9.99999974E-6 : f32
      %60 = vector.broadcast %cst_36 : f32 to vector<1x512xf32>
      %61 = arith.addf %57, %60 : vector<1x512xf32>
      %62 = math.rsqrt %61 : vector<1x512xf32>
      %63 = arith.mulf %59, %62 : vector<1x512xf32>
      %c0_37 = arith.constant 0 : index
      %c0_38 = arith.constant 0 : index
      %c0_39 = arith.constant 0 : index
      %64 = vector.load %arg8[%c0_37, %c0_38, %c0_39] : memref<1x1x512xf32, #tpu.memory_space<vmem>>, vector<1x1x512xf32>
      %65 = vector.shape_cast %64 : vector<1x1x512xf32> to vector<1x512xf32>
      %66 = arith.mulf %50, %63 : vector<1x512xf32>
      %67 = arith.subf %65, %66 : vector<1x512xf32>
      %68 = vector.broadcast %63 : vector<1x512xf32> to vector<8x512xf32>
      %69 = arith.mulf %46, %68 : vector<8x512xf32>
      %70 = vector.broadcast %67 : vector<1x512xf32> to vector<8x512xf32>
      %71 = arith.addf %69, %70 : vector<8x512xf32>
      %72 = math.tanh %71 : vector<8x512xf32>
      %c0_40 = arith.constant 0 : index
      %c0_41 = arith.constant 0 : index
      %c0_42 = arith.constant 0 : index
      %73 = vector.load %arg9[%c0_40, %c0_41, %c0_42] : memref<1x8x512xf32, #tpu.memory_space<vmem>>, vector<1x8x512xf32>
      %74 = vector.shape_cast %73 : vector<1x8x512xf32> to vector<8x512xf32>
      %75 = vector.shape_cast %72 : vector<8x512xf32> to vector<1x8x512xf32>
      tpu.vector_store %arg9[%c0_40, %c0_41, %c0_42], %75 {strides = array<i32>} : memref<1x8x512xf32, #tpu.memory_space<vmem>>, vector<1x8x512xf32>,
    } else {
    }
    return
  }
  func.func @transform_0(%arg0: i32, %arg1: i32) -> (i32, i32, i32) {
    %c0_i32 = arith.constant 0 : i32
    %c0_i32_0 = arith.constant 0 : i32
    %c0_i32_1 = arith.constant 0 : i32
    return %arg0, %c0_i32, %c0_i32_0 : i32, i32, i32
  }
  func.func @transform_1(%arg0: i32, %arg1: i32) -> (i32, i32, i32) {
    %c0_i32 = arith.constant 0 : i32
    %c0_i32_0 = arith.constant 0 : i32
    return %arg0, %c0_i32, %arg1 : i32, i32, i32
  }
  func.func @transform_2(%arg0: i32, %arg1: i32) -> (i32, i32, i32) {
    %c0_i32 = arith.constant 0 : i32
    %c0_i32_0 = arith.constant 0 : i32
    return %arg0, %c0_i32, %arg1 : i32, i32, i32
  }
  func.func @transform_3(%arg0: i32, %arg1: i32) -> (i32, i32, i32) {
    %c0_i32 = arith.constant 0 : i32
    %c0_i32_0 = arith.constant 0 : i32
    return %arg0, %c0_i32, %arg1 : i32, i32, i32
  }
  func.func @transform_4(%arg0: i32, %arg1: i32) -> (i32, i32, i32) {
    %c0_i32 = arith.constant 0 : i32
    %c0_i32_0 = arith.constant 0 : i32
    return %arg0, %arg1, %c0_i32 : i32, i32, i32
  }
  func.func @transform_5(%arg0: i32, %arg1: i32) -> (i32, i32, i32) {
    %c0_i32 = arith.constant 0 : i32
    %c0_i32_0 = arith.constant 0 : i32
    %c0_i32_1 = arith.constant 0 : i32
    return %arg0, %c0_i32, %c0_i32_0 : i32, i32, i32
  }
  func.func @transform_6(%arg0: i32, %arg1: i32) -> (i32, i32, i32) {
    %c0_i32 = arith.constant 0 : i32
    %c0_i32_0 = arith.constant 0 : i32
    %c0_i32_1 = arith.constant 0 : i32
    return %arg0, %c0_i32, %c0_i32_0 : i32, i32, i32
  }
  func.func @transform_7(%arg0: i32, %arg1: i32) -> (i32, i32, i32) {
    %c0_i32 = arith.constant 0 : i32
    %c0_i32_0 = arith.constant 0 : i32
    %c0_i32_1 = arith.constant 0 : i32
    return %arg0, %c0_i32, %c0_i32_0 : i32, i32, i32
  }
}

</mosaic_0001>

<bundles_post_ra>
// kernel: autoencoder_forward.1
= control target key start
LH: loop header
LB: loop body
LE: loop exit
PB: predicated region body
PF: predicated region fallthrough
CT: control target
= control target key end

     0   :  { %s7248_s0 = inlined_call_operand.vmem [shape: f32[2,8,384], index: 0, kind: input, shape index: {}]   ;;  %s7249_s1 = inlined_call_operand.hbm [shape: bf16[2,384,2048], index: 1, kind: input, shape index: {}]   ;;  %s7250_s2 = inlined_call_operand.hbm [shape: f32[2,1,2048], index: 2, kind: input, shape index: {}]   ;;  %s7251_s3 = inlined_call_operand.hbm [shape: f32[2,1,2048], index: 3, kind: input, shape index: {}]   ;;  %s7252_s4 = inlined_call_operand.hbm [shape: bf16[2,2048,512], index: 4, kind: input, shape index: {}]   ;;  %s7253_s5 = inlined_call_operand.hbm [shape: f32[2,1,512], index: 5, kind: input, shape index: {}]   ;;  %s7254_s6 = inlined_call_operand.hbm [shape: f32[2,1,512], index: 6, kind: input, shape index: {}]   ;;  %s7255_s7 = inlined_call_operand.vmem [shape: f32[2,8,512], index: 7, kind: output, shape index: {}]  }
   0x1   :  { %7273 = sst [smem:[#allocation28_spill]] %s7248_s0 }
   0x2   :  { %7274 = sst [smem:[#allocation29_spill]] %s7250_s2 }
   0x3   :  { %7275 = sst [smem:[#allocation30_spill]] %s7252_s4 }
   0x4   :  { %7276 = sst [smem:[#allocation31_spill]] %s7254_s6 }
   0x5   :  { %7277 = sst [smem:[#allocation32_spill]] %s7255_s7 }
   0x6   :  { %12 = vsyncpa [#allocation4], 0 }
   0x7   :  { %14 = vsyncpa [#allocation4 + $0x1], 0 }
   0x8   :  { %15 = vsyncpa [#allocation6], 0 }
   0x9   :  { %17 = vsyncpa [#allocation6 + $0x1], 0 }
   0xa   :  { %18 = vsyncpa [#allocation9], 0 }
   0xb   :  { %20 = vsyncpa [#allocation9 + $0x1], 0 }
   0xc   :  { %21 = vsyncpa [#allocation12], 0 }
   0xd   :  { %23 = vsyncpa [#allocation12 + $0x1], 0  ;;  %s6132_s24 = smov 0   ;;  %s6134_s25 = smov 0  }
   0xe   :  { %s6136_s26 = smov 0   ;;  %s6138_s27 = smov 0  }
   0xf   :  { %s6140_s28 = smov 0   ;;  %s6142_s29 = smov 0  }
  0x10   :  { %s6144_s30 = smov 0   ;;  %s6146_s8 = smov 0  }
  0x11   :  { %s6148_s9 = smov 0   ;;  %s6150_s10 = smov 0  }
  0x12   :  { %s6152_s11 = smov 0  }
  0x13 LB: > { %7278 = sst [smem:[#allocation18_spill]] %s6052_s28  ;;  %s7256_s12 = sadd.s32 4294967295, %s6076_s11   ;;  %s6076_s11 = sphi %s6152_s11, %s29_s11   ;;  %s6072_s10 = sphi %s6150_s10, %s7328_s10   ;;  %s6068_s9 = sphi %s6148_s9, %s7322_s9   ;;  %s6064_s8 = sphi %s6146_s8, %s7327_s8   ;;  %s6060_s30 = sphi %s6144_s30, %s7321_s30   ;;  %s6056_s29 = sphi %s6142_s29, %s7320_s29   ;;  %s6052_s28 = sphi %s6140_s28, %s7319_s28   ;;  %s6048_s27 = sphi %s6138_s27, %s7318_s27   ;;  %s6044_s26 = sphi %s6136_s26, %s7326_s26   ;;  %s6040_s25 = sphi %s6134_s25, %s7325_s25   ;;  %s6036_s24 = sphi %s6132_s24, %s7324_s24  }
  0x14   : > { %7279 = sst [smem:[#allocation19_spill]] %s6056_s29  ;;  %s38_s13 = sadd.s32 1, %s6068_s9 }
  0x15   : > { %7280 = sst [smem:[#allocation20_spill]] %s6060_s30  ;;  %p39_p0 = scmp.ge.s32.totalorder %s38_s13, 2 }
  0x16   : > { %7281 = sst [smem:[#allocation21_spill]] %s6064_s8  ;;  %s41_s14 = sadd.s32 1, %s6072_s10 }
  0x17   : > { %7282 = sst [smem:[#allocation22_spill]] %s6068_s9  ;;  %s76_s15 = sadd.s32 1, %s6056_s29 }
  0x18   : > { %p83_p1 = scmp.ne.s32.totalorder %s6056_s29, %s6052_s28  ;;  %s7330_s13 = smov (%p39_p0, %s38_s13), 0 }
  0x19   : > { %7283 = sst [smem:[#allocation23_spill]] %s7330_s13  ;;  %s7332_s14 = smov (!%p39_p0, %s41_s14), %s6072_s10 }
  0x1a   : > { %s72_s16 = ssub.s32 %s6068_s9, %s7330_s13  ;;  %p7265_p2 = scmp.eq.s32.totalorder %s6076_s11, 0 }
  0x1b   : > { %p43_p3 = scmp.ge.s32.totalorder %s7332_s14, 2  ;;  %p89_p4 = scmp.ne.s32.totalorder %s6052_s28, %s6048_s27 }
  0x1c   : > { %p6200_p5 = por %p7265_p2, %p83_p1  ;;  %p6206_p6 = scmp.eq.s32.totalorder %s7256_s12, 0 }
  0x1d   : > { %s7334_s14 = smov (%p43_p3, %s7332_s14), 0  ;;  %p7264_p8 = scmp.lt.s32.totalorder %s6076_s11, 4 }
  0x1e   : > { %s7285_s18 = scalar_select %p6206_p6, 1, 0 }
  0x1f   : > { %7286 = sst [smem:[#allocation24_spill]] %s7334_s14  ;;  %p6214_p7 = por %p6206_p6, %p89_p4 }
  0x20   : > { %s6220_s20 = ssub.s32 %s6072_s10, %s7334_s14  ;;  %s6226_s22 = sand.u32 1, %s6056_s29  }
  0x21   : > { %s7287_s19 = scalar_select %p6214_p7, 1, 0 }
  0x22   : > { %s73_s21 = sor.u32 %s72_s16, %s6220_s20  ;;  %s3839_s23 = sshll.u32 %s6068_s9, 3 }
  0x23   : > { %7288 = sst [smem:[#allocation25_spill]] %s7287_s19  ;;  %p74_p10 = scmp.eq.s32.totalorder %s73_s21, 0 }
  0x24   : > { %s5242_s27 = smul.u32 768, %s6072_s10  ;;  %p6237_p11 = pnand %p7264_p8, %p6200_p5 }
  0x25   : > { %s6231_s12 = scalar_select %p74_p10, %s6056_s29, %s76_s15  }
  0x26   : > { %s293_s13 = sadd.s32 %s5242_s27, %s3839_s23  ;;  %s7263_s8 = sshll.u32 %s6226_s22, 3 }
  0x27   : > { %7289 = sst [smem:[#allocation26_spill]] %s6231_s12  ;;  %s3840_s16 = sshll.u32 %s293_s13, 6 }
  0x28   : > { %s6245_s7 = scalar_lea.hbm %s7249_s1, %s3840_s16  ;;  %s3843_s19 = sshll.u32 %s6072_s10, 4 }
  0x29   : > { %s6249_s28 = sadd.s32 %s3843_s19, %s3839_s23  ;;  %s310_s15 = scalar_lea.vmem [#allocation5], %s7263_s8 }
  0x2a   : > { %s320_s17 = sshll.u32 %s310_s15, 4  ;;  %s3844_s27 = sshll.u32 %s6249_s28, 4  ;;  %s6254_s17 = int_to_ptr.vmem [resolvable:$true] %s320_s17 }
  0x2b   : > { %s7291_s2 = sld [smem:[#allocation29_spill]]  ;;  %s7292_s0 = sand.u32 1, %s6076_s11  }
  0x2c   : > { %s6265_s19 = scalar_lea.sflag [#allocation6], %s7292_s0  ;;  %p6271_p13 = pneg %p6237_p11 }
  0x31   : > { %s6261_s12 = scalar_lea.hbm %s7291_s2, %s3844_s27  ;;  %s5795_s15 = scalar_lea.hbm %s7291_s2, 512 }
  0x32   : > { %s5790_s23 = scalar_lea.hbm %s6261_s12, 128  ;;  %p5796_p3 = scmp.lt.u32.totalorder %s6261_s12, %s7291_s2 }
  0x33   : > { %p5791_p12 = scmp.ne.s32.totalorder %s6261_s12, %s5790_s23  ;;  %p5797_p4 = scmp.lt.u32.totalorder %s5795_s15, %s5790_s23 }
  0x34   : > { %p5799_p10 = scmp.lt.u32.totalorder %s5790_s23, %s6261_s12 }
  0x35   : > { %p5793_p0 = pnand %p6271_p13, %p5791_p12  ;;  %p5798_p5 = por %p5797_p4, %p5796_p3 }
  0x37   : > { %p5794_p1 = pneg %p5793_p0  ;;  %p5800_p8 = por %p5799_p10, %p5798_p5 }
  0x39   : > { %p5801_p2 = pnand %p5800_p8, %p5794_p1 }
  0x3b   : > { %5804 = shalt.err (!%p5801_p2)
}
  0x3c   : > { %s5805_s0 = scalar_lea.vmem %s6254_s17, 128  ;;  %s6078_s30 = smov [#allocation5]  }
  0x3d   : > { %p5806_p12 = scmp.ne.s32.totalorder %s6254_s17, %s5805_s0  ;;  %s5810_s21 = sshll.u32 %s6078_s30, 4  ;;  %s5811_s21 = int_to_ptr.vmem [resolvable:$false] %s5810_s21 }
  0x3e   : > { %s5812_s8 = scalar_lea.vmem %s5811_s21, 256  ;;  %p5813_p7 = scmp.lt.s32.totalorder %s6254_s17, %s5811_s21 }
  0x3f   : > { %p5808_p0 = pnand %p5806_p12, %p6271_p13  ;;  %p5814_p6 = scmp.lt.s32.totalorder %s5812_s8, %s5805_s0 }
  0x41   : > { %p5809_p9 = pneg %p5808_p0  ;;  %p5815_p3 = por %p5814_p6, %p5813_p7 }
  0x43   : > { %p5816_p4 = pnand %p5815_p3, %p5809_p9 }
  0x45   : > { %5819 = shalt.err (!%p5816_p4)
}
  0x46   : > { %5263 = dma.hbm_to_vmem [thread:$0]  (!%p6237_p11), %s6261_s12, 128, %s6254_s17, %s6265_s19  }
  0x47   : > { %s6300_s13 = scalar_lea.hbm %s7251_s3, %s3844_s27  ;;  %p3860_p2 = scmp.ge.s32.totalorder %s6076_s11, 1 }
  0x48   : > { %p408_p6 = scmp.lt.s32.totalorder %s6076_s11, 5  ;;  %s3849_s0 = sshll.u32 %s6226_s22, 11 }
  0x49   : > { %s3873_s30 = sshll.u32 %s6068_s9, 9  ;;  %s3852_s8 = sshll.u32 %s6072_s10, 10 }
  0x4a   : > { %p6306_p7 = pnand %p3860_p2, %p408_p6  ;;  %s352_s2 = scalar_lea.vmem [#allocation8], %s3849_s0 }
  0x4b   : > { %s362_s29 = sshll.u32 %s352_s2, 4  ;;  %s359_s6 = sadd.s32 %s3873_s30, %s3852_s8  ;;  %s6311_s29 = int_to_ptr.vmem [resolvable:$true] %s362_s29 }
  0x4c   : > { %s7294_s21 = scalar_select %p6306_p7, 1, 0 }
  0x4d   : > { %s3853_s28 = sshll.u32 %s359_s6, 6  ;;  %s7296_s4 = sld [smem:[#allocation30_spill]] }
  0x4e   : > { %7295 = sst [smem:[#allocation27_spill]] %s7294_s21  ;;  %s7297_s23 = sand.u32 1, %s6076_s11  }
  0x4f   : > { %s6320_s15 = scalar_lea.sflag [#allocation9], %s7297_s23 }
  0x53   : > { %s6316_s27 = scalar_lea.hbm %s7296_s4, %s3853_s28  ;;  %s5825_s6 = scalar_lea.hbm %s7296_s4, 131072 }
  0x54   : > { %s5820_s9 = scalar_lea.hbm %s6316_s27, 32768  ;;  %p5826_p5 = scmp.lt.u32.totalorder %s6316_s27, %s7296_s4 }
  0x55   : > { %p5821_p8 = scmp.ne.s32.totalorder %s6316_s27, %s5820_s9  ;;  %p5827_p10 = scmp.lt.u32.totalorder %s5825_s6, %s5820_s9 }
  0x56   : > { %p5829_p0 = scmp.lt.u32.totalorder %s5820_s9, %s6316_s27 }
  0x57   : > { %p5823_p9 = pnand %p5821_p8, %p6271_p13  ;;  %p5828_p12 = por %p5827_p10, %p5826_p5 }
  0x59   : > { %p5824_p1 = pneg %p5823_p9  ;;  %p5830_p3 = por %p5829_p0, %p5828_p12 }
  0x5b   : > { %p5831_p4 = pnand %p5830_p3, %p5824_p1 }
  0x5d   : > { %5834 = shalt.err (!%p5831_p4)
}
  0x5e   : > { %s5835_s28 = scalar_lea.vmem %s6311_s29, 32768  ;;  %s6079_s12 = smov [#allocation8]  }
  0x5f   : > { %p5836_p2 = scmp.ne.s32.totalorder %s6311_s29, %s5835_s28  ;;  %s5840_s17 = sshll.u32 %s6079_s12, 4  ;;  %s5841_s17 = int_to_ptr.vmem [resolvable:$false] %s5840_s17 }
  0x60   : > { %s5842_s23 = scalar_lea.vmem %s5841_s17, 65536  ;;  %p5843_p9 = scmp.lt.s32.totalorder %s6311_s29, %s5841_s17 }
  0x61   : > { %p5838_p6 = pnand %p5836_p2, %p6271_p13  ;;  %p5844_p7 = scmp.lt.s32.totalorder %s5842_s23, %s5835_s28 }
  0x63   : > { %p5839_p8 = pneg %p5838_p6  ;;  %p5845_p5 = por %p5844_p7, %p5843_p9 }
  0x65   : > { %p5846_p10 = pnand %p5845_p5, %p5839_p8 }
  0x67   : > { %5849 = shalt.err (!%p5846_p10)
}
  0x68   : > { %s6080_s9 = smov 256   ;;  %s6081_s2 = smov 16  }
  0x69   : > { %5269 = dma.hbm_to_vmem [thread:$0]  (!%p6237_p11), %s6316_s27, 32768, %s6311_s29, %s6320_s15, %s6080_s9, %s6080_s9, %s6081_s2  }
  0x6a   : > { %s5241_s0 = smul.u32 1536, %s6226_s22  ;;  %s7298_s8 = sshll.u32 %s6226_s22, 3 }
  0x6b   : > { %s331_s28 = scalar_lea.vmem [#allocation7], %s7298_s8  ;;  %s284_s17 = scalar_lea.sflag [#allocation4], %s6226_s22 }
  0x6c   : > { %s287_s6 = scalar_lea.vmem [#allocation3], %s5241_s0  ;;  %s341_s12 = sshll.u32 %s331_s28, 4  ;;  %s6349_s12 = int_to_ptr.vmem [resolvable:$true] %s341_s12 }
  0x6d   : > { %s296_s30 = sshll.u32 %s287_s6, 4  ;;  %s5850_s23 = scalar_lea.hbm %s6245_s7, 24576  ;;  %s6347_s30 = int_to_ptr.vmem [resolvable:$true] %s296_s30 }
  0x6e   : > { %p5851_p7 = scmp.ne.s32.totalorder %s6245_s7, %s5850_s23  ;;  %s5855_s29 = scalar_lea.hbm %s7249_s1, 98304 }
  0x6f   : > { %p5856_p0 = scmp.lt.u32.totalorder %s6245_s7, %s7249_s1  ;;  %p5857_p3 = scmp.lt.u32.totalorder %s5855_s29, %s5850_s23 }
  0x70   : > { %p5853_p1 = pnand %p5851_p7, %p6271_p13  ;;  %p5859_p2 = scmp.lt.u32.totalorder %s5850_s23, %s6245_s7 }
  0x71   : > { %p5858_p4 = por %p5857_p3, %p5856_p0 }
  0x72   : > { %p5854_p12 = pneg %p5853_p1 }
  0x73   : > { %p5860_p6 = por %p5859_p2, %p5858_p4 }
  0x75   : > { %p5861_p8 = pnand %p5860_p6, %p5854_p12 }
  0x77   : > { %5864 = shalt.err (!%p5861_p8)
}
  0x78   : > { %s5865_s2 = scalar_lea.vmem %s6347_s30, 24576  ;;  %s6082_s4 = smov [#allocation3]  }
  0x79   : > { %p5866_p9 = scmp.ne.s32.totalorder %s6347_s30, %s5865_s2  ;;  %s5870_s21 = sshll.u32 %s6082_s4, 4  ;;  %s5871_s21 = int_to_ptr.vmem [resolvable:$false] %s5870_s21 }
  0x7a   : > { %s5872_s0 = scalar_lea.vmem %s5871_s21, 49152  ;;  %p5873_p7 = scmp.lt.s32.totalorder %s6347_s30, %s5871_s21 }
  0x7b   : > { %p5868_p5 = pnand %p5866_p9, %p6271_p13  ;;  %p5874_p1 = scmp.lt.s32.totalorder %s5872_s0, %s5865_s2 }
  0x7d   : > { %p5869_p10 = pneg %p5868_p5  ;;  %p5875_p0 = por %p5874_p1, %p5873_p7 }
  0x7f   : > { %p5876_p3 = pnand %p5875_p0, %p5869_p10 }
  0x81   : > { %5879 = shalt.err (!%p5876_p3)
}
  0x82   : > { %s6083_s6 = smov 1024   ;;  %s6084_s8 = smov 512  }
  0x83   : > { %s6085_s28 = smov 32   ;;  %s5880_s23 = scalar_lea.hbm %s6300_s13, 128 }
  0x84   : > { %5260 = dma.hbm_to_vmem [thread:$0]  (!%p6237_p11), %s6245_s7, 24576, %s6347_s30, %s284_s17, %s6083_s6, %s6084_s8, %s6085_s28  }
  0x85   : > { %p5881_p12 = scmp.ne.s32.totalorder %s6300_s13, %s5880_s23  ;;  %s5885_s9 = scalar_lea.hbm %s7251_s3, 512 }
  0x86   : > { %p5886_p6 = scmp.lt.u32.totalorder %s6300_s13, %s7251_s3  ;;  %p5887_p8 = scmp.lt.u32.totalorder %s5885_s9, %s5880_s23 }
  0x87   : > { %p5883_p4 = pnand %p5881_p12, %p6271_p13  ;;  %p5889_p5 = scmp.lt.u32.totalorder %s5880_s23, %s6300_s13 }
  0x88   : > { %p5888_p9 = por %p5887_p8, %p5886_p6 }
  0x89   : > { %p5884_p2 = pneg %p5883_p4 }
  0x8a   : > { %p5890_p10 = por %p5889_p5, %p5888_p9 }
  0x8c   : > { %p5891_p7 = pnand %p5890_p10, %p5884_p2 }
  0x8e   : > { %5894 = shalt.err (!%p5891_p7)
}
  0x8f   : > { %s5895_s7 = scalar_lea.vmem %s6349_s12, 128  ;;  %s6086_s22 = smov [#allocation7]  }
  0x90   : > { %p5896_p1 = scmp.ne.s32.totalorder %s6349_s12, %s5895_s7  ;;  %s5900_s30 = sshll.u32 %s6086_s22, 4  ;;  %s5901_s30 = int_to_ptr.vmem [resolvable:$false] %s5900_s30 }
  0x91   : > { %s5902_s17 = scalar_lea.vmem %s5901_s30, 256  ;;  %p5903_p12 = scmp.lt.s32.totalorder %s6349_s12, %s5901_s30 }
  0x92   : > { %p5898_p0 = pnand %p5896_p1, %p6271_p13  ;;  %p5904_p4 = scmp.lt.s32.totalorder %s5902_s17, %s5895_s7 }
  0x94   : > { %p5899_p3 = pneg %p5898_p0  ;;  %p5905_p6 = por %p5904_p4, %p5903_p12 }
  0x96   : > { %p5906_p8 = pnand %p5905_p6, %p5899_p3 }
  0x98   : > { %5909 = shalt.err (!%p5906_p8)
}
  0x99   : > { %5266 = dma.hbm_to_vmem [thread:$0]  (!%p6237_p11), %s6300_s13, 128, %s6349_s12, %s6265_s19  }
  0x9a   : > { %s186_s16 = sadd.s32 1, %s6044_s26  ;;  %p193_p13 = scmp.ne.s32.totalorder %s6044_s26, %s6040_s25 }
  0x9b   : > { %p7299_p2 = scmp.eq.s32.totalorder %s6220_s20, 0  ;;  %p7300_p9 = scmp.eq.s32.totalorder %s6076_s11, 0 }
  0x9c   : > { %p199_p10 = scmp.ne.s32.totalorder %s6040_s25, %s6036_s24  ;;  %s374_s21 = sand.u32 1, %s6044_s26  }
  0x9d   : > { %s6403_s14 = scalar_select %p7299_p2, %s6044_s26, %s186_s16  }
  0x9e   : > { %p195_p5 = por %p193_p13, %p7300_p9  ;;  %s3874_s0 = sshll.u32 %s6072_s10, 6 }
  0x9f   : > { %p7301_p7 = scmp.ne.s32.totalorder %s7285_s18, 0  ;;  %s6419_s8 = sshll.u32 %s374_s21, 2 }
  0xa0   : > { %s6426_s20 = scalar_lea.hbm %s7253_s5, %s3874_s0  ;;  %s376_s24 = scalar_lea.vmem [#allocation10], %s6419_s8 }
  0xa1   : > { %p6413_p1 = por %p199_p10, %p7301_p7  ;;  %s384_s18 = sshll.u32 %s376_s24, 4  ;;  %s385_s18 = int_to_ptr.vmem [resolvable:$true] %s384_s18 }
  0xa2   : > { %p7303_p11 = scmp.lt.s32.totalorder %s6076_s11, 4  ;;  %s5910_s28 = scalar_lea.hbm %s6426_s20, 64 }
  0xa3   : > { %s7302_s6 = scalar_select %p6413_p1, 1, 0 }
  0xa4   : > { %p6431_p0 = pnand %p7303_p11, %p195_p5  ;;  %p5911_p3 = scmp.ne.s32.totalorder %s6426_s20, %s5910_s28 }
  0xa5   : > { %s5915_s27 = scalar_lea.hbm %s7253_s5, 128  ;;  %p5916_p8 = scmp.lt.u32.totalorder %s6426_s20, %s7253_s5 }
  0xa6   : > { %p5912_p12 = pneg %p6431_p0  ;;  %p5917_p13 = scmp.lt.u32.totalorder %s5915_s27, %s5910_s28 }
  0xa7   : > { %p5919_p9 = scmp.lt.u32.totalorder %s5910_s28, %s6426_s20 }
  0xa8   : > { %p5913_p4 = pnand %p5912_p12, %p5911_p3  ;;  %p5918_p2 = por %p5917_p13, %p5916_p8 }
  0xaa   : > { %p5914_p6 = pneg %p5913_p4  ;;  %p5920_p5 = por %p5919_p9, %p5918_p2 }
  0xac   : > { %p5921_p10 = pnand %p5920_p5, %p5914_p6 }
  0xae   : > { %5924 = shalt.err (!%p5921_p10)
}
  0xaf   : > { %s5925_s4 = scalar_lea.vmem %s385_s18, 64  ;;  %s6087_s7 = smov [#allocation10]  }
  0xb0   : > { %p5926_p7 = scmp.ne.s32.totalorder %s385_s18, %s5925_s4  ;;  %s5930_s22 = sshll.u32 %s6087_s7, 4  ;;  %s5931_s22 = int_to_ptr.vmem [resolvable:$false] %s5930_s22 }
  0xb1   : > { %s5932_s30 = scalar_lea.vmem %s5931_s22, 128  ;;  %p5933_p4 = scmp.lt.s32.totalorder %s385_s18, %s5931_s22 }
  0xb2   : > { %p5928_p11 = pnand %p5926_p7, %p5912_p12  ;;  %p5934_p1 = scmp.lt.s32.totalorder %s5932_s30, %s5925_s4 }
  0xb4   : > { %p5929_p3 = pneg %p5928_p11  ;;  %p5935_p8 = por %p5934_p1, %p5933_p4 }
  0xb6   : > { %p5936_p13 = pnand %p5935_p8, %p5929_p3 }
  0xb8   : > { %5939 = shalt.err (!%p5936_p13)
}
  0xb9   : > { %5272 = dma.hbm_to_vmem [thread:$0]  (!%p6431_p0), %s6426_s20, 64, %s385_s18, %s6320_s15  }
  0xba   : > { %s7305_s19 = sld [smem:[#allocation31_spill]]  ;;  %s395_s24 = scalar_lea.vmem [#allocation11], %s6419_s8 }
  0xbb   : > { %s403_s28 = sshll.u32 %s395_s24, 4  ;;  %s392_s23 = scalar_lea.sflag [#allocation12], %s374_s21  ;;  %s404_s28 = int_to_ptr.vmem [resolvable:$true] %s403_s28 }
  0xc0   : > { %s6462_s13 = scalar_lea.hbm %s7305_s19, %s3874_s0  ;;  %s5945_s0 = scalar_lea.hbm %s7305_s19, 128 }
  0xc1   : > { %s5940_s29 = scalar_lea.hbm %s6462_s13, 64  ;;  %p5946_p9 = scmp.lt.u32.totalorder %s6462_s13, %s7305_s19 }
  0xc2   : > { %p5941_p1 = scmp.ne.s32.totalorder %s6462_s13, %s5940_s29  ;;  %p5947_p5 = scmp.lt.u32.totalorder %s5945_s0, %s5940_s29 }
  0xc3   : > { %p5949_p7 = scmp.lt.u32.totalorder %s5940_s29, %s6462_s13 }
  0xc4   : > { %p5943_p6 = pnand %p5941_p1, %p5912_p12  ;;  %p5948_p10 = por %p5947_p5, %p5946_p9 }
  0xc6   : > { %p5944_p2 = pneg %p5943_p6  ;;  %p5950_p11 = por %p5949_p7, %p5948_p10 }
  0xc8   : > { %p5951_p3 = pnand %p5950_p11, %p5944_p2 }
  0xca   : > { %5954 = shalt.err (!%p5951_p3)
}
  0xcb   : > { %s5955_s21 = scalar_lea.vmem %s404_s28, 64  ;;  %s6088_s8 = smov [#allocation11]  }
  0xcc   : > { %p5956_p4 = scmp.ne.s32.totalorder %s404_s28, %s5955_s21  ;;  %s5960_s9 = sshll.u32 %s6088_s8, 4  ;;  %s5961_s9 = int_to_ptr.vmem [resolvable:$false] %s5960_s9 }
  0xcd   : > { %s5962_s2 = scalar_lea.vmem %s5961_s9, 128  ;;  %p5963_p1 = scmp.lt.s32.totalorder %s404_s28, %s5961_s9 }
  0xce   : > { %p5958_p8 = pnand %p5956_p4, %p5912_p12  ;;  %p5964_p6 = scmp.lt.s32.totalorder %s5962_s2, %s5955_s21 }
  0xd0   : > { %p5959_p13 = pneg %p5958_p8  ;;  %p5965_p5 = por %p5964_p6, %p5963_p1 }
  0xd2   : > { %p5966_p9 = pnand %p5965_p5, %p5959_p13 }
  0xd4   : > { %5969 = shalt.err (!%p5966_p9)
}
  0xd5   : > { %5275 = dma.hbm_to_vmem [thread:$0]  (!%p6431_p0), %s6462_s13, 64, %s404_s28, %s392_s23  }
  0xd6   : > { %s7306_s4 = sld [smem:[#allocation27_spill]] }
  0xdc   : > { %p7307_p2 = scmp.ne.s32.totalorder %s7306_s4, 0 }
  0xdd   : > { %s7308_s7 = sld [smem:[#allocation18_spill]] (!%p7307_p2) }
  0xde   : > { %412 = sbr.rel (%p7307_p2) target bundleno = 1260 (0x4ec), region = 48  ;;  %s7309_s22 = sld [smem:[#allocation25_spill]] (!%p7307_p2) }
  0xe3   : > { %s414_s30 = sand.u32 (!%p7307_p2), 1, %s7308_s7  }
  0xe4   : > { %s5243_s17 = smul.u32 (!%p7307_p2), 1536, %s414_s30  ;;  %s415_s16 = scalar_lea.sflag (!%p7307_p2), [#allocation4], %s414_s30 }
  0xe5   : > { %p7310_p12 = scmp.ne.s32.totalorder %s7309_s22, 0 }
  0xe6   : > { %s6489_s24 = scalar_lea.vmem [#allocation3], %s5243_s17 }
  0xe7   : > { %6015 = dma.done.wait (%p7310_p12), %s415_s16, 24576  }
  0xe8   : > { %6017 = vsyncadd (%p7310_p12), %s415_s16, 4294942720  ;;  %s7311_s29 = sadd.s32 4294967295, %s6076_s11   ;;  %s3861_s13 = sshll.u32 %s414_s30, 3 }
  0xe9   : > { %s423_s12 = sand.u32 1, %s7311_s29   ;;  %s6497_s23 = scalar_lea.vmem [#allocation5], %s3861_s13 }
  0xea   : > { %s424_s28 = scalar_lea.sflag [#allocation6], %s423_s12 }
  0xeb   : > { %6019 = dma.done.wait (%p7310_p12), %s424_s28, 256  }
  0xec   : > { %6021 = vsyncadd (%p7310_p12), %s424_s28, 4294967040  ;;  %s3863_s15 = sshll.u32 %s414_s30, 11  ;;  %s6503_s20 = scalar_lea.vmem [#allocation7], %s3861_s13 }
  0xed   : > { %s442_s0 = scalar_lea.sflag [#allocation9], %s423_s12  ;;  %s6505_s18 = scalar_lea.vmem [#allocation8], %s3863_s15 }
  0xee   : > { %6023 = dma.done.wait (%p7310_p12), %s442_s0, 32768  }
  0xef   : > { %6025 = vsyncadd (%p7310_p12), %s442_s0, 4294934528  ;;  %s452_s27 = sand.u32 1, %s6040_s25   ;;  %p7312_p0 = scmp.ne.s32.totalorder %s7302_s6, 0 }
  0xf0   : > { %s6512_s21 = sshll.u32 %s452_s27, 2 }
  0xf1   : > { %s454_s8 = scalar_lea.vmem [#allocation10], %s6512_s21 }
  0xf2   : > { %6027 = dma.done.wait (%p7312_p0), %s442_s0, 64  }
  0xf3   : > { %6029 = vsyncadd (%p7312_p0), %s442_s0, 4294967232  ;;  %s460_s9 = scalar_lea.sflag [#allocation12], %s452_s27  ;;  %s463_s2 = scalar_lea.vmem [#allocation11], %s6512_s21 }
  0xf4   : > { %6031 = dma.done.wait (%p7312_p0), %s460_s9, 64  }
  0xf5   : > { %6033 = vsyncadd (%p7312_p0), %s460_s9, 4294967232  ;;  %s7313_s4 = sld [smem:[#allocation21_spill]]  ;;  %s7315_s28 = sld [smem:[#allocation28_spill]] }
  0xf6   : > { %s7314_s16 = sld [smem:[#allocation32_spill]]  ;;  %s7316_s0 = sld [smem:[#allocation20_spill]] }
  0xfb   : > { %p524_p10 = scmp.lt.s32.totalorder %s7313_s4, 1 }
  0xfc   : > { %p3869_p7 = scmp.ne.s32.totalorder %s7316_s0, 0 }
  0xfd   : > { %s7336_s4 = smov (!%p524_p10, %s7313_s4), 1  ;;  %v6089_v0 = vmov (!%p3869_p7), 0.0  }
  0xfe   : > { %s5244_s7 = smul.u32 24, %s7336_s4  ;;  %s3876_s22 = sshll.u32 %s7336_s4, 5  ;;  %542 = vst [vmem:[#allocation2] sm:$0xff] (!%p3869_p7), %v6089_v0  ;;  %543 = vst [vmem:[#allocation2 + $0x8] sm:$0xff] (!%p3869_p7), %v6089_v0 }
  0xff   : > { %s6529_s29 = scalar_lea.vmem %s7314_s16, %s3876_s22  ;;  %541 = sbr.rel (%p3869_p7) target bundleno = 262 (0x106), region = 76  ;;  %544 = vst [vmem:[#allocation2 + $0x10] sm:$0xff] (!%p3869_p7), %v6089_v0  ;;  %545 = vst [vmem:[#allocation2 + $0x18] sm:$0xff] (!%p3869_p7), %v6089_v0 }
 0x100   : > { %s6534_s15 = scalar_lea.vmem %s7315_s28, %s5244_s7 }
 0x106 PF: > { %v549_v1 = vld [vmem:[%s6489_s24] sm:$0xff]  ;;  %v550_v3 = vld [vmem:[%s6489_s24 + $0x8] sm:$0xff]  ;;  %s7317_s6 = sld [smem:[#allocation20_spill]] }
 0x107   : > { %v553_v2 = vld [vmem:[%s6489_s24 + $0x20] sm:$0xff]  ;;  %v554_v5 = vld [vmem:[%s6489_s24 + $0x28] sm:$0xff] }
 0x108   : > { %v4793_v4 = vcombine.high %v549_v1, %v553_v2  ;;  %v4794_v6 = vcombine.low %v549_v1, %v553_v2  ;;  %v557_v7 = vld [vmem:[%s6489_s24 + $0x40] sm:$0xff]  ;;  %v4841_v9 = vcombine.high %v550_v3, %v554_v5  ;;  %v4842_v10 = vcombine.low %v550_v3, %v554_v5  ;;  %v558_v12 = vld [vmem:[%s6489_s24 + $0x48] sm:$0xff] }
 0x109   : > { %v561_v8 = vld [vmem:[%s6489_s24 + $0x60] sm:$0xff]  ;;  %v562_v13 = vld [vmem:[%s6489_s24 + $0x68] sm:$0xff] }
 0x10a   : > { %v4795_v11 = vcombine.high %v557_v7, %v561_v8  ;;  %v565_v14 = vld [vmem:[%s6489_s24 + $0x80] sm:$0xff]  ;;  %3878 = vmatprep.subr.bf16.mxu0 %v4793_v4  ;;  %v4843_v15 = vcombine.high %v558_v12, %v562_v13  ;;  %v566_v17 = vld [vmem:[%s6489_s24 + $0x88] sm:$0xff]  ;;  %3974 = vmatprep.subr.bf16.mxu1 %v4841_v9  ;;  %v4796_v19 = vcombine.low %v557_v7, %v561_v8 }
 0x10b   : > { %v569_v16 = vld [vmem:[%s6489_s24 + $0xa0] sm:$0xff]  ;;  %v570_v18 = vld [vmem:[%s6489_s24 + $0xa8] sm:$0xff]  ;;  %3880 = vmatpush1.bf16.msra.mxu0 %v4794_v6  ;;  %3976 = vmatpush1.bf16.msra.mxu1 %v4842_v10  ;;  %v4844_v20 = vcombine.low %v558_v12, %v562_v13 }
 0x10c   : > { %3882 = vmatprep.subr.bf16.mxu0 %v4795_v11  ;;  %v4797_v21 = vcombine.high %v565_v14, %v569_v16  ;;  %3978 = vmatprep.subr.bf16.mxu1 %v4843_v15  ;;  %v4845_v22 = vcombine.high %v566_v17, %v570_v18  ;;  %v573_v23 = vld [vmem:[%s6489_s24 + $0xc0] sm:$0xff]  ;;  %v574_v25 = vld [vmem:[%s6489_s24 + $0xc8] sm:$0xff]  ;;  %v4798_v27 = vcombine.low %v565_v14, %v569_v16  ;;  %p3870_p11 = scmp.ne.s32.totalorder %s7317_s6, 1 }
 0x10d   : > { %v577_v24 = vld [vmem:[%s6489_s24 + $0xe0] sm:$0xff]  ;;  %v578_v26 = vld [vmem:[%s6489_s24 + $0xe8] sm:$0xff]  ;;  %v4846_v28 = vcombine.low %v566_v17, %v570_v18 }
 0x10e   : > { %v4799_v29 = vcombine.high %v573_v23, %v577_v24  ;;  %v4847_v30 = vcombine.high %v574_v25, %v578_v26  ;;  %v581_v31 = vld [vmem:[%s6489_s24 + $0x100] sm:$0xff]  ;;  %v582_v33 = vld [vmem:[%s6489_s24 + $0x108] sm:$0xff]  ;;  %v4800_v35 = vcombine.low %v573_v23, %v577_v24  ;;  %v4848_v36 = vcombine.low %v574_v25, %v578_v26 }
 0x10f   : > { %3884 = vmatpush1.bf16.msra.mxu0 %v4796_v19  ;;  %3980 = vmatpush1.bf16.msra.mxu1 %v4844_v20  ;;  %v585_v32 = vld [vmem:[%s6489_s24 + $0x120] sm:$0xff]  ;;  %v586_v34 = vld [vmem:[%s6489_s24 + $0x128] sm:$0xff] }
 0x110   : > { %3886 = vmatprep.subr.bf16.mxu0 %v4797_v21  ;;  %3982 = vmatprep.subr.bf16.mxu1 %v4845_v22  ;;  %v4801_v37 = vcombine.high %v581_v31, %v585_v32  ;;  %v4849_v38 = vcombine.high %v582_v33, %v586_v34  ;;  %v589_v39 = vld [vmem:[%s6489_s24 + $0x140] sm:$0xff]  ;;  %v590_v41 = vld [vmem:[%s6489_s24 + $0x148] sm:$0xff]  ;;  %v4802_v43 = vcombine.low %v581_v31, %v585_v32 }
 0x111   : > { %v593_v40 = vld [vmem:[%s6489_s24 + $0x160] sm:$0xff]  ;;  %v594_v42 = vld [vmem:[%s6489_s24 + $0x168] sm:$0xff]  ;;  %v4850_v44 = vcombine.low %v582_v33, %v586_v34 }
 0x112   : > { %v4803_v45 = vcombine.high %v589_v39, %v593_v40  ;;  %v4851_v46 = vcombine.high %v590_v41, %v594_v42  ;;  %v597_v47 = vld [vmem:[%s6489_s24 + $0x180] sm:$0xff]  ;;  %v598_v49 = vld [vmem:[%s6489_s24 + $0x188] sm:$0xff]  ;;  %v4804_v51 = vcombine.low %v589_v39, %v593_v40  ;;  %v4852_v52 = vcombine.low %v590_v41, %v594_v42 }
 0x113   : > { %3888 = vmatpush1.bf16.msra.mxu0 %v4798_v27  ;;  %3984 = vmatpush1.bf16.msra.mxu1 %v4846_v28  ;;  %v601_v48 = vld [vmem:[%s6489_s24 + $0x1a0] sm:$0xff]  ;;  %v602_v50 = vld [vmem:[%s6489_s24 + $0x1a8] sm:$0xff] }
 0x114   : > { %3890 = vmatprep.subr.bf16.mxu0 %v4799_v29  ;;  %3986 = vmatprep.subr.bf16.mxu1 %v4847_v30  ;;  %v4805_v53 = vcombine.high %v597_v47, %v601_v48  ;;  %v6566_v54 = vld [vmem:[%s6534_s15 + $0x8] sm:$0xff]  ;;  %v4853_v55 = vcombine.high %v598_v49, %v602_v50  ;;  %v605_v56 = vld [vmem:[%s6489_s24 + $0x1c0] sm:$0xff]  ;;  %v4806_v60 = vcombine.low %v597_v47, %v601_v48 }
 0x115   : > { %v609_v57 = vld [vmem:[%s6489_s24 + $0x1e0] sm:$0xff]  ;;  %1189 = vmatprep.mubr.f32.mxu0 %v6566_v54  ;;  %v606_v58 = vld [vmem:[%s6489_s24 + $0x1c8] sm:$0xff]  ;;  %1331 = vmatprep.mubr.f32.mxu1 %v6566_v54  ;;  %v4854_v61 = vcombine.low %v598_v49, %v602_v50 }
 0x116   : > { %v610_v59 = vld [vmem:[%s6489_s24 + $0x1e8] sm:$0xff]  ;;  %v4807_v62 = vcombine.high %v605_v56, %v609_v57  ;;  %v613_v0 = vld [vmem:[%s6489_s24 + $0x200] sm:$0xff]  ;;  %v4808_v4 = vcombine.low %v605_v56, %v609_v57 }
 0x117   : > { %3892 = vmatpush1.bf16.msra.mxu0 %v4800_v35  ;;  %3988 = vmatpush1.bf16.msra.mxu1 %v4848_v36  ;;  %v4855_v63 = vcombine.high %v606_v58, %v610_v59  ;;  %v617_v1 = vld [vmem:[%s6489_s24 + $0x220] sm:$0xff]  ;;  %v614_v2 = vld [vmem:[%s6489_s24 + $0x208] sm:$0xff]  ;;  %v4856_v5 = vcombine.low %v606_v58, %v610_v59 }
 0x118   : > { %3894 = vmatprep.subr.bf16.mxu0 %v4801_v37  ;;  %3990 = vmatprep.subr.bf16.mxu1 %v4849_v38  ;;  %v618_v3 = vld [vmem:[%s6489_s24 + $0x228] sm:$0xff]  ;;  %v4809_v6 = vcombine.high %v613_v0, %v617_v1  ;;  %v621_v8 = vld [vmem:[%s6489_s24 + $0x240] sm:$0xff]  ;;  %v4810_v12 = vcombine.low %v613_v0, %v617_v1 }
 0x119   : > { %v4857_v7 = vcombine.high %v614_v2, %v618_v3  ;;  %v625_v9 = vld [vmem:[%s6489_s24 + $0x260] sm:$0xff]  ;;  %v622_v10 = vld [vmem:[%s6489_s24 + $0x248] sm:$0xff]  ;;  %v4858_v13 = vcombine.low %v614_v2, %v618_v3 }
 0x11a   : > { %v626_v11 = vld [vmem:[%s6489_s24 + $0x268] sm:$0xff]  ;;  %v4811_v14 = vcombine.high %v621_v8, %v625_v9  ;;  %v629_v16 = vld [vmem:[%s6489_s24 + $0x280] sm:$0xff]  ;;  %v4812_v20 = vcombine.low %v621_v8, %v625_v9 }
 0x11b   : > { %3896 = vmatpush1.bf16.msra.mxu0 %v4802_v43  ;;  %3992 = vmatpush1.bf16.msra.mxu1 %v4850_v44  ;;  %v4859_v15 = vcombine.high %v622_v10, %v626_v11  ;;  %v633_v17 = vld [vmem:[%s6489_s24 + $0x2a0] sm:$0xff]  ;;  %v630_v18 = vld [vmem:[%s6489_s24 + $0x288] sm:$0xff]  ;;  %v4860_v21 = vcombine.low %v622_v10, %v626_v11 }
 0x11c   : > { %3898 = vmatprep.subr.bf16.mxu0 %v4803_v45  ;;  %3994 = vmatprep.subr.bf16.mxu1 %v4851_v46  ;;  %v634_v19 = vld [vmem:[%s6489_s24 + $0x2a8] sm:$0xff]  ;;  %v4813_v22 = vcombine.high %v629_v16, %v633_v17  ;;  %v637_v24 = vld [vmem:[%s6489_s24 + $0x2c0] sm:$0xff]  ;;  %v4814_v28 = vcombine.low %v629_v16, %v633_v17 }
 0x11d   : > { %v4861_v23 = vcombine.high %v630_v18, %v634_v19  ;;  %v641_v25 = vld [vmem:[%s6489_s24 + $0x2e0] sm:$0xff]  ;;  %v638_v26 = vld [vmem:[%s6489_s24 + $0x2c8] sm:$0xff]  ;;  %v4862_v29 = vcombine.low %v630_v18, %v634_v19 }
 0x11e   : > { %v642_v27 = vld [vmem:[%s6489_s24 + $0x2e8] sm:$0xff]  ;;  %v4815_v30 = vcombine.high %v637_v24, %v641_v25  ;;  %v645_v32 = vld [vmem:[%s6489_s24 + $0x300] sm:$0xff]  ;;  %v4816_v36 = vcombine.low %v637_v24, %v641_v25 }
 0x11f   : > { %3900 = vmatpush1.bf16.msra.mxu0 %v4804_v51  ;;  %3996 = vmatpush1.bf16.msra.mxu1 %v4852_v52  ;;  %v4863_v31 = vcombine.high %v638_v26, %v642_v27  ;;  %v649_v33 = vld [vmem:[%s6489_s24 + $0x320] sm:$0xff]  ;;  %v646_v34 = vld [vmem:[%s6489_s24 + $0x308] sm:$0xff]  ;;  %v4864_v37 = vcombine.low %v638_v26, %v642_v27 }
 0x120   : > { %3902 = vmatprep.subr.bf16.mxu0 %v4805_v53  ;;  %3998 = vmatprep.subr.bf16.mxu1 %v4853_v55  ;;  %v650_v35 = vld [vmem:[%s6489_s24 + $0x328] sm:$0xff]  ;;  %v4817_v38 = vcombine.high %v645_v32, %v649_v33  ;;  %v653_v40 = vld [vmem:[%s6489_s24 + $0x340] sm:$0xff]  ;;  %v4818_v44 = vcombine.low %v645_v32, %v649_v33 }
 0x121   : > { %v4865_v39 = vcombine.high %v646_v34, %v650_v35  ;;  %v657_v41 = vld [vmem:[%s6489_s24 + $0x360] sm:$0xff]  ;;  %v654_v42 = vld [vmem:[%s6489_s24 + $0x348] sm:$0xff]  ;;  %v4866_v45 = vcombine.low %v646_v34, %v650_v35 }
 0x122   : > { %v658_v43 = vld [vmem:[%s6489_s24 + $0x368] sm:$0xff]  ;;  %v4819_v46 = vcombine.high %v653_v40, %v657_v41  ;;  %v661_v48 = vld [vmem:[%s6489_s24 + $0x380] sm:$0xff]  ;;  %v4820_v52 = vcombine.low %v653_v40, %v657_v41 }
 0x123   : > { %3904 = vmatpush1.bf16.msra.mxu0 %v4806_v60  ;;  %4000 = vmatpush1.bf16.msra.mxu1 %v4854_v61  ;;  %v4867_v47 = vcombine.high %v654_v42, %v658_v43  ;;  %v665_v49 = vld [vmem:[%s6489_s24 + $0x3a0] sm:$0xff]  ;;  %v662_v50 = vld [vmem:[%s6489_s24 + $0x388] sm:$0xff]  ;;  %v4868_v53 = vcombine.low %v654_v42, %v658_v43 }
 0x124   : > { %3906 = vmatprep.subr.bf16.mxu0 %v4807_v62  ;;  %4002 = vmatprep.subr.bf16.mxu1 %v4855_v63  ;;  %v666_v51 = vld [vmem:[%s6489_s24 + $0x3a8] sm:$0xff]  ;;  %v4821_v55 = vcombine.high %v661_v48, %v665_v49  ;;  %v669_v57 = vld [vmem:[%s6489_s24 + $0x3c0] sm:$0xff]  ;;  %v4822_v61 = vcombine.low %v661_v48, %v665_v49 }
 0x125   : > { %v4869_v56 = vcombine.high %v662_v50, %v666_v51  ;;  %v673_v58 = vld [vmem:[%s6489_s24 + $0x3e0] sm:$0xff]  ;;  %v670_v59 = vld [vmem:[%s6489_s24 + $0x3c8] sm:$0xff]  ;;  %v4870_v62 = vcombine.low %v662_v50, %v666_v51 }
 0x126   : > { %v674_v60 = vld [vmem:[%s6489_s24 + $0x3e8] sm:$0xff]  ;;  %v4823_v63 = vcombine.high %v669_v57, %v673_v58  ;;  %v677_v1 = vld [vmem:[%s6489_s24 + $0x400] sm:$0xff] }
 0x127   : > { %3908 = vmatpush1.bf16.msra.mxu0 %v4808_v4  ;;  %4004 = vmatpush1.bf16.msra.mxu1 %v4856_v5  ;;  %v4871_v0 = vcombine.high %v670_v59, %v674_v60  ;;  %v681_v2 = vld [vmem:[%s6489_s24 + $0x420] sm:$0xff]  ;;  %v678_v3 = vld [vmem:[%s6489_s24 + $0x408] sm:$0xff]  ;;  %v4824_v5 = vcombine.low %v669_v57, %v673_v58 }
 0x128   : > { %3910 = vmatprep.subr.bf16.mxu0 %v4809_v6  ;;  %4006 = vmatprep.subr.bf16.mxu1 %v4857_v7  ;;  %v682_v4 = vld [vmem:[%s6489_s24 + $0x428] sm:$0xff]  ;;  %v4872_v6 = vcombine.low %v670_v59, %v674_v60  ;;  %v4825_v7 = vcombine.high %v677_v1, %v681_v2  ;;  %v685_v9 = vld [vmem:[%s6489_s24 + $0x440] sm:$0xff] }
 0x129   : > { %v4873_v8 = vcombine.high %v678_v3, %v682_v4  ;;  %v689_v10 = vld [vmem:[%s6489_s24 + $0x460] sm:$0xff]  ;;  %v686_v11 = vld [vmem:[%s6489_s24 + $0x448] sm:$0xff]  ;;  %v4874_v17 = vcombine.low %v678_v3, %v682_v4 }
 0x12a   : > { %v697_v16 = vld [vmem:[%s6489_s24 + $0x4a0] sm:$0xff]  ;;  %v4827_v18 = vcombine.high %v685_v9, %v689_v10  ;;  %v694_v19 = vld [vmem:[%s6489_s24 + $0x488] sm:$0xff] }
 0x12b   : > { %3912 = vmatpush1.bf16.msra.mxu0 %v4810_v12  ;;  %4008 = vmatpush1.bf16.msra.mxu1 %v4858_v13  ;;  %v690_v12 = vld [vmem:[%s6489_s24 + $0x468] sm:$0xff]  ;;  %v4826_v13 = vcombine.low %v677_v1, %v681_v2  ;;  %v705_v24 = vld [vmem:[%s6489_s24 + $0x4e0] sm:$0xff]  ;;  %v551_v1 = vld [vmem:[%s6489_s24 + $0x10] sm:$0xff] }
 0x12c   : > { %3914 = vmatprep.subr.bf16.mxu0 %v4811_v14  ;;  %4010 = vmatprep.subr.bf16.mxu1 %v4859_v15  ;;  %v546_v14 = vld [vmem:[%s6534_s15] sm:$0xff]  ;;  %v4876_v25 = vcombine.low %v686_v11, %v690_v12  ;;  %v702_v27 = vld [vmem:[%s6489_s24 + $0x4c8] sm:$0xff]  ;;  %v555_v2 = vld [vmem:[%s6489_s24 + $0x30] sm:$0xff] }
 0x12d   : > { %v693_v15 = vld [vmem:[%s6489_s24 + $0x480] sm:$0xff] }
 0x12e   : > { %v4829_v26 = vcombine.high %v693_v15, %v697_v16  ;;  %v709_v32 = vld [vmem:[%s6489_s24 + $0x500] sm:$0xff] }
 0x12f   : > { %3916 = vmatpush1.bf16.msra.mxu0 %v4812_v20  ;;  %4012 = vmatpush1.bf16.msra.mxu1 %v4860_v21  ;;  %v698_v20 = vld [vmem:[%s6489_s24 + $0x4a8] sm:$0xff]  ;;  %v4875_v21 = vcombine.high %v686_v11, %v690_v12  ;;  %v713_v33 = vld [vmem:[%s6489_s24 + $0x520] sm:$0xff]  ;;  %v4889_v12 = vcombine.high %v551_v1, %v555_v2 }
 0x130   : > { %3918 = vmatprep.subr.bf16.mxu0 %v4813_v22  ;;  %4014 = vmatprep.subr.bf16.mxu1 %v4861_v23  ;;  %v4828_v22 = vcombine.low %v685_v9, %v689_v10  ;;  %v701_v23 = vld [vmem:[%s6489_s24 + $0x4c0] sm:$0xff]  ;;  %v4878_v34 = vcombine.low %v694_v19, %v698_v20  ;;  %v4833_v43 = vcombine.high %v709_v32, %v713_v33  ;;  %v559_v9 = vld [vmem:[%s6489_s24 + $0x50] sm:$0xff] }
 0x131   : > { %v4831_v35 = vcombine.high %v701_v23, %v705_v24  ;;  %v717_v40 = vld [vmem:[%s6489_s24 + $0x540] sm:$0xff]  ;;  %v563_v10 = vld [vmem:[%s6489_s24 + $0x70] sm:$0xff] }
 0x132   : > { %v721_v41 = vld [vmem:[%s6489_s24 + $0x560] sm:$0xff] }
 0x133   : > { %3920 = vmatpush1.bf16.msra.mxu0 %v4814_v28  ;;  %4016 = vmatpush1.bf16.msra.mxu1 %v4862_v29  ;;  %v706_v28 = vld [vmem:[%s6489_s24 + $0x4e8] sm:$0xff]  ;;  %v4877_v29 = vcombine.high %v694_v19, %v698_v20  ;;  %v725_v48 = vld [vmem:[%s6489_s24 + $0x580] sm:$0xff]  ;;  %v4835_v51 = vcombine.high %v717_v40, %v721_v41  ;;  %v571_v19 = vld [vmem:[%s6489_s24 + $0xb0] sm:$0xff] }
 0x134   : > { %3922 = vmatprep.subr.bf16.mxu0 %v4815_v30  ;;  %4018 = vmatprep.subr.bf16.mxu1 %v4863_v31  ;;  %v6090_v30 = vmov 0.0   ;;  %v4830_v31 = vcombine.low %v693_v15, %v697_v16  ;;  %v4880_v42 = vcombine.low %v702_v27, %v706_v28  ;;  %v729_v49 = vld [vmem:[%s6489_s24 + $0x5a0] sm:$0xff]  ;;  %v6650_v15 = vld [vmem:[%s6534_s15 + $0x10] sm:$0xff] }
 0x135   : > { %v733_v57 = vld [vmem:[%s6489_s24 + $0x5c0] sm:$0xff]  ;;  %v4837_v60 = vcombine.high %v725_v48, %v729_v49 }
 0x136   : > { %v737_v58 = vld [vmem:[%s6489_s24 + $0x5e0] sm:$0xff] }
 0x137   : > { %3924 = vmatpush1.bf16.msra.mxu0 %v4816_v36  ;;  %4020 = vmatpush1.bf16.msra.mxu1 %v4864_v37  ;;  %v710_v36 = vld [vmem:[%s6489_s24 + $0x508] sm:$0xff]  ;;  %v4839_v4 = vcombine.high %v733_v57, %v737_v58 }
 0x138   : > { %3926 = vmatprep.subr.bf16.mxu0 %v4817_v38  ;;  %4022 = vmatprep.subr.bf16.mxu1 %v4865_v39  ;;  %v714_v37 = vld [vmem:[%s6489_s24 + $0x528] sm:$0xff]  ;;  %v4879_v38 = vcombine.high %v702_v27, %v706_v28  ;;  %v4832_v39 = vcombine.low %v701_v23, %v705_v24  ;;  %v572_v23 = vld [vmem:[%s6489_s24 + $0xb8] sm:$0xff]  ;;  %v579_v27 = vld [vmem:[%s6489_s24 + $0xf0] sm:$0xff] }
 0x139   : > { %v4882_v50 = vcombine.low %v710_v36, %v714_v37 }
 0x13b   : > { %3928 = vmatpush1.bf16.msra.mxu0 %v4818_v44  ;;  %4024 = vmatpush1.bf16.msra.mxu1 %v4866_v45  ;;  %v718_v44 = vld [vmem:[%s6489_s24 + $0x548] sm:$0xff] }
 0x13c   : > { %3930 = vmatprep.subr.bf16.mxu0 %v4819_v46  ;;  %4026 = vmatprep.subr.bf16.mxu1 %v4867_v47  ;;  %v722_v45 = vld [vmem:[%s6489_s24 + $0x568] sm:$0xff]  ;;  %v4881_v46 = vcombine.high %v710_v36, %v714_v37  ;;  %v4834_v47 = vcombine.low %v709_v32, %v713_v33  ;;  %v580_v32 = vld [vmem:[%s6489_s24 + $0xf8] sm:$0xff]  ;;  %v587_v36 = vld [vmem:[%s6489_s24 + $0x130] sm:$0xff] }
 0x13d   : > { %v4884_v59 = vcombine.low %v718_v44, %v722_v45 }
 0x13f   : > { %3932 = vmatpush1.bf16.msra.mxu0 %v4820_v52  ;;  %4028 = vmatpush1.bf16.msra.mxu1 %v4868_v53  ;;  %v726_v52 = vld [vmem:[%s6489_s24 + $0x588] sm:$0xff] }
 0x140   : > { %3934 = vmatprep.subr.bf16.mxu0 %v4821_v55  ;;  %4030 = vmatprep.subr.bf16.mxu1 %v4869_v56  ;;  %v730_v53 = vld [vmem:[%s6489_s24 + $0x5a8] sm:$0xff]  ;;  %v4883_v55 = vcombine.high %v718_v44, %v722_v45  ;;  %v4836_v56 = vcombine.low %v717_v40, %v721_v41  ;;  %v588_v40 = vld [vmem:[%s6489_s24 + $0x138] sm:$0xff] }
 0x141   : > { %v4886_v3 = vcombine.low %v726_v52, %v730_v53 }
 0x143   : > { %3936 = vmatpush1.bf16.msra.mxu0 %v4822_v61  ;;  %4032 = vmatpush1.bf16.msra.mxu1 %v4870_v62  ;;  %v734_v61 = vld [vmem:[%s6489_s24 + $0x5c8] sm:$0xff] }
 0x144   : > { %3938 = vmatprep.subr.bf16.mxu0 %v4823_v63  ;;  %4034 = vmatprep.subr.bf16.mxu1 %v4871_v0  ;;  %v738_v62 = vld [vmem:[%s6489_s24 + $0x5e8] sm:$0xff]  ;;  %v4885_v63 = vcombine.high %v726_v52, %v730_v53  ;;  %v4838_v0 = vcombine.low %v725_v48, %v729_v49 }
 0x145   : > { %v4888_v11 = vcombine.low %v734_v61, %v738_v62 }
 0x147   : > { %3940 = vmatpush1.bf16.msra.mxu0 %v4824_v5  ;;  %4036 = vmatpush1.bf16.msra.mxu1 %v4872_v6  ;;  %v552_v5 = vld [vmem:[%s6489_s24 + $0x18] sm:$0xff] }
 0x148   : > { %3942 = vmatprep.subr.bf16.mxu0 %v4825_v7  ;;  %4038 = vmatprep.subr.bf16.mxu1 %v4873_v8  ;;  %v556_v6 = vld [vmem:[%s6489_s24 + $0x38] sm:$0xff]  ;;  %v4887_v7 = vcombine.high %v734_v61, %v738_v62  ;;  %v4840_v8 = vcombine.low %v733_v57, %v737_v58 }
 0x149   : > { %v4937_v16 = vcombine.high %v552_v5, %v556_v6  ;;  %v4938_v20 = vcombine.low %v552_v5, %v556_v6 }
 0x14a   : > { %1190 = vmatmul.mubr.f32.vlgmr.msra.gmra.mrb[0].mxu0 %v546_v14  ;;  %1332 = vmatmul.mubr.f32.vlgmr.msra.gmra.mrb[0].mxu1 %v546_v14  ;;  %v564_v14 = vld [vmem:[%s6489_s24 + $0x78] sm:$0xff] }
 0x14b   : > { %3944 = vmatpush1.bf16.msra.mxu0 %v4826_v13  ;;  %4040 = vmatpush1.bf16.msra.mxu1 %v4874_v17  ;;  %v560_v13 = vld [vmem:[%s6489_s24 + $0x58] sm:$0xff]  ;;  %v4890_v17 = vcombine.low %v551_v1, %v555_v2 }
 0x14c   : > { %3946 = vmatprep.subr.bf16.mxu0 %v4827_v18  ;;  %4042 = vmatprep.subr.bf16.mxu1 %v4875_v21  ;;  %v567_v18 = vld [vmem:[%s6489_s24 + $0x90] sm:$0xff]  ;;  %v4891_v21 = vcombine.high %v559_v9, %v563_v10  ;;  %v4939_v24 = vcombine.high %v560_v13, %v564_v14  ;;  %v4940_v28 = vcombine.low %v560_v13, %v564_v14 }
 0x14d   : > { %1260 = vmatprep.mubr.f32.mxu0 %v6090_v30  ;;  %1402 = vmatprep.mubr.f32.mxu1 %v6090_v30 }
 0x14f   : > { %3948 = vmatpush1.bf16.msra.mxu0 %v4828_v22  ;;  %4044 = vmatpush1.bf16.msra.mxu1 %v4876_v25  ;;  %v568_v22 = vld [vmem:[%s6489_s24 + $0x98] sm:$0xff]  ;;  %v4892_v25 = vcombine.low %v559_v9, %v563_v10 }
 0x150   : > { %3950 = vmatprep.subr.bf16.mxu0 %v4829_v26  ;;  %4046 = vmatprep.subr.bf16.mxu1 %v4877_v29  ;;  %v575_v26 = vld [vmem:[%s6489_s24 + $0xd0] sm:$0xff]  ;;  %v4893_v29 = vcombine.high %v567_v18, %v571_v19  ;;  %v4941_v33 = vcombine.high %v568_v22, %v572_v23  ;;  %v4942_v37 = vcombine.low %v568_v22, %v572_v23 }
 0x153   : > { %3952 = vmatpush1.bf16.msra.mxu0 %v4830_v31  ;;  %4048 = vmatpush1.bf16.msra.mxu1 %v4878_v34  ;;  %v576_v31 = vld [vmem:[%s6489_s24 + $0xd8] sm:$0xff]  ;;  %v4894_v34 = vcombine.low %v567_v18, %v571_v19 }
 0x154   : > { %3954 = vmatprep.subr.bf16.mxu0 %v4831_v35  ;;  %4050 = vmatprep.subr.bf16.mxu1 %v4879_v38  ;;  %v583_v35 = vld [vmem:[%s6489_s24 + $0x110] sm:$0xff]  ;;  %v4895_v38 = vcombine.high %v575_v26, %v579_v27  ;;  %v4943_v41 = vcombine.high %v576_v31, %v580_v32  ;;  %v4944_v44 = vcombine.low %v576_v31, %v580_v32 }
 0x155   : > { %v4897_v45 = vcombine.high %v583_v35, %v587_v36  ;;  %v4898_v49 = vcombine.low %v583_v35, %v587_v36 }
 0x157   : > { %3956 = vmatpush1.bf16.msra.mxu0 %v4832_v39  ;;  %4052 = vmatpush1.bf16.msra.mxu1 %v4880_v42  ;;  %v584_v39 = vld [vmem:[%s6489_s24 + $0x118] sm:$0xff]  ;;  %v4896_v42 = vcombine.low %v575_v26, %v579_v27 }
 0x158   : > { %3958 = vmatprep.subr.bf16.mxu0 %v4833_v43  ;;  %4054 = vmatprep.subr.bf16.mxu1 %v4881_v46  ;;  %v595_v43 = vld [vmem:[%s6489_s24 + $0x170] sm:$0xff]  ;;  %v592_v46 = vld [vmem:[%s6489_s24 + $0x158] sm:$0xff]  ;;  %v4945_v48 = vcombine.high %v584_v39, %v588_v40  ;;  %v4946_v52 = vcombine.low %v584_v39, %v588_v40 }
 0x15b   : > { %3960 = vmatpush1.bf16.msra.mxu0 %v4834_v47  ;;  %4056 = vmatpush1.bf16.msra.mxu1 %v4882_v50  ;;  %v596_v47 = vld [vmem:[%s6489_s24 + $0x178] sm:$0xff]  ;;  %v599_v50 = vld [vmem:[%s6489_s24 + $0x190] sm:$0xff] }
 0x15c   : > { %3962 = vmatprep.subr.bf16.mxu0 %v4835_v51  ;;  %4058 = vmatprep.subr.bf16.mxu1 %v4883_v55  ;;  %v603_v51 = vld [vmem:[%s6489_s24 + $0x1b0] sm:$0xff]  ;;  %v600_v55 = vld [vmem:[%s6489_s24 + $0x198] sm:$0xff]  ;;  %v4947_v57 = vcombine.high %v592_v46, %v596_v47  ;;  %v4948_v61 = vcombine.low %v592_v46, %v596_v47 }
 0x15d   : > { %v4901_v62 = vcombine.high %v599_v50, %v603_v51  ;;  %v4902_v2 = vcombine.low %v599_v50, %v603_v51 }
 0x15f   : > { %3964 = vmatpush1.bf16.msra.mxu0 %v4836_v56  ;;  %4060 = vmatpush1.bf16.msra.mxu1 %v4884_v59  ;;  %v604_v56 = vld [vmem:[%s6489_s24 + $0x1b8] sm:$0xff]  ;;  %v607_v59 = vld [vmem:[%s6489_s24 + $0x1d0] sm:$0xff] }
 0x160   : > { %3966 = vmatprep.subr.bf16.mxu0 %v4837_v60  ;;  %4062 = vmatprep.subr.bf16.mxu1 %v4885_v63  ;;  %v611_v60 = vld [vmem:[%s6489_s24 + $0x1f0] sm:$0xff]  ;;  %v608_v63 = vld [vmem:[%s6489_s24 + $0x1d8] sm:$0xff]  ;;  %v4949_v1 = vcombine.high %v600_v55, %v604_v56  ;;  %v4950_v5 = vcombine.low %v600_v55, %v604_v56 }
 0x161   : > { %v4903_v6 = vcombine.high %v607_v59, %v611_v60  ;;  %v4904_v10 = vcombine.low %v607_v59, %v611_v60 }
 0x163   : > { %3968 = vmatpush1.bf16.msra.mxu0 %v4838_v0  ;;  %4064 = vmatpush1.bf16.msra.mxu1 %v4886_v3  ;;  %v612_v0 = vld [vmem:[%s6489_s24 + $0x1f8] sm:$0xff]  ;;  %v615_v3 = vld [vmem:[%s6489_s24 + $0x210] sm:$0xff] }
 0x164   : > { %3970 = vmatprep.subr.bf16.mxu0 %v4839_v4  ;;  %4066 = vmatprep.subr.bf16.mxu1 %v4887_v7  ;;  %v619_v4 = vld [vmem:[%s6489_s24 + $0x230] sm:$0xff]  ;;  %v616_v7 = vld [vmem:[%s6489_s24 + $0x218] sm:$0xff]  ;;  %v4951_v9 = vcombine.high %v608_v63, %v612_v0  ;;  %v4952_v13 = vcombine.low %v608_v63, %v612_v0 }
 0x165   : > { %v4905_v14 = vcombine.high %v615_v3, %v619_v4  ;;  %v4906_v19 = vcombine.low %v615_v3, %v619_v4  ;;  %v671_v0 = vld [vmem:[%s6489_s24 + $0x3d0] sm:$0xff]  ;;  %v676_v3 = vld [vmem:[%s6489_s24 + $0x3f8] sm:$0xff] }
 0x167   : > { %3972 = vmatpush1.bf16.msra.mxu0 %v4840_v8  ;;  %4068 = vmatpush1.bf16.msra.mxu1 %v4888_v11  ;;  %v620_v8 = vld [vmem:[%s6489_s24 + $0x238] sm:$0xff]  ;;  %v623_v11 = vld [vmem:[%s6489_s24 + $0x250] sm:$0xff] }
 0x168   : > { %4070 = vmatprep.subr.bf16.mxu0 %v4889_v12  ;;  %4166 = vmatprep.subr.bf16.mxu1 %v4937_v16  ;;  %v627_v12 = vld [vmem:[%s6489_s24 + $0x270] sm:$0xff]  ;;  %v624_v16 = vld [vmem:[%s6489_s24 + $0x258] sm:$0xff]  ;;  %v4953_v18 = vcombine.high %v616_v7, %v620_v8  ;;  %v4954_v22 = vcombine.low %v616_v7, %v620_v8 }
 0x169   : > { %v4907_v23 = vcombine.high %v623_v11, %v627_v12  ;;  %v4908_v27 = vcombine.low %v623_v11, %v627_v12  ;;  %v679_v8 = vld [vmem:[%s6489_s24 + $0x410] sm:$0xff]  ;;  %v684_v11 = vld [vmem:[%s6489_s24 + $0x438] sm:$0xff] }
 0x16a   : > { %1261 = vmatmul.mubr.f32.vlgmr.msra.gmra.mrb[0].mxu0 %v6650_v15  ;;  %1403 = vmatmul.mubr.f32.vlgmr.msra.gmra.mrb[0].mxu1 %v6650_v15 }
 0x16b   : > { %4072 = vmatpush1.bf16.msra.mxu0 %v4890_v17  ;;  %4168 = vmatpush1.bf16.msra.mxu1 %v4938_v20  ;;  %v628_v17 = vld [vmem:[%s6489_s24 + $0x278] sm:$0xff]  ;;  %v631_v20 = vld [vmem:[%s6489_s24 + $0x290] sm:$0xff] }
 0x16c   : > { %4074 = vmatprep.subr.bf16.mxu0 %v4891_v21  ;;  %4170 = vmatprep.subr.bf16.mxu1 %v4939_v24  ;;  %v635_v21 = vld [vmem:[%s6489_s24 + $0x2b0] sm:$0xff]  ;;  %v632_v24 = vld [vmem:[%s6489_s24 + $0x298] sm:$0xff]  ;;  %v4955_v26 = vcombine.high %v624_v16, %v628_v17  ;;  %v4956_v31 = vcombine.low %v624_v16, %v628_v17 }
 0x16d   : > { %1473 = vmatprep.mubr.f32.mxu0 %v6566_v54  ;;  %1615 = vmatprep.mubr.f32.mxu1 %v6566_v54  ;;  %v591_v54 = vld [vmem:[%s6489_s24 + $0x150] sm:$0xff]  ;;  %v4909_v32 = vcombine.high %v631_v20, %v635_v21  ;;  %v4910_v36 = vcombine.low %v631_v20, %v635_v21  ;;  %v692_v20 = vld [vmem:[%s6489_s24 + $0x478] sm:$0xff] }
 0x16e   : > { %v4899_v53 = vcombine.high %v591_v54, %v595_v43  ;;  %v4900_v58 = vcombine.low %v591_v54, %v595_v43  ;;  %v687_v17 = vld [vmem:[%s6489_s24 + $0x450] sm:$0xff] }
 0x16f   : > { %4076 = vmatpush1.bf16.msra.mxu0 %v4892_v25  ;;  %4172 = vmatpush1.bf16.msra.mxu1 %v4940_v28  ;;  %v636_v25 = vld [vmem:[%s6489_s24 + $0x2b8] sm:$0xff]  ;;  %v639_v28 = vld [vmem:[%s6489_s24 + $0x2d0] sm:$0xff] }
 0x170   : > { %4078 = vmatprep.subr.bf16.mxu0 %v4893_v29  ;;  %4174 = vmatprep.subr.bf16.mxu1 %v4941_v33  ;;  %v643_v29 = vld [vmem:[%s6489_s24 + $0x2f0] sm:$0xff]  ;;  %v640_v33 = vld [vmem:[%s6489_s24 + $0x2d8] sm:$0xff]  ;;  %v4957_v35 = vcombine.high %v632_v24, %v636_v25  ;;  %v4958_v39 = vcombine.low %v632_v24, %v636_v25 }
 0x171   : > { %v4911_v40 = vcombine.high %v639_v28, %v643_v29  ;;  %v4912_v43 = vcombine.low %v639_v28, %v643_v29  ;;  %v695_v25 = vld [vmem:[%s6489_s24 + $0x490] sm:$0xff]  ;;  %v696_v28 = vld [vmem:[%s6489_s24 + $0x498] sm:$0xff] }
 0x172   : > { %v700_v29 = vld [vmem:[%s6489_s24 + $0x4b8] sm:$0xff] }
 0x173   : > { %4080 = vmatpush1.bf16.msra.mxu0 %v4894_v34  ;;  %4176 = vmatpush1.bf16.msra.mxu1 %v4942_v37  ;;  %v644_v34 = vld [vmem:[%s6489_s24 + $0x2f8] sm:$0xff]  ;;  %v647_v37 = vld [vmem:[%s6489_s24 + $0x310] sm:$0xff] }
 0x174   : > { %4082 = vmatprep.subr.bf16.mxu0 %v4895_v38  ;;  %4178 = vmatprep.subr.bf16.mxu1 %v4943_v41  ;;  %v651_v38 = vld [vmem:[%s6489_s24 + $0x330] sm:$0xff]  ;;  %v648_v41 = vld [vmem:[%s6489_s24 + $0x318] sm:$0xff]  ;;  %v4959_v54 = vcombine.high %v640_v33, %v644_v34  ;;  %v4960_v46 = vcombine.low %v640_v33, %v644_v34  ;;  %v4973_v34 = vcombine.high %v696_v28, %v700_v29 }
 0x175   : > { %v4913_v47 = vcombine.high %v647_v37, %v651_v38  ;;  %v4914_v51 = vcombine.low %v647_v37, %v651_v38  ;;  %v704_v37 = vld [vmem:[%s6489_s24 + $0x4d8] sm:$0xff] }
 0x176   : > { %v708_v38 = vld [vmem:[%s6489_s24 + $0x4f8] sm:$0xff] }
 0x177   : > { %4084 = vmatpush1.bf16.msra.mxu0 %v4896_v42  ;;  %4180 = vmatpush1.bf16.msra.mxu1 %v4944_v44  ;;  %v652_v42 = vld [vmem:[%s6489_s24 + $0x338] sm:$0xff]  ;;  %v655_v44 = vld [vmem:[%s6489_s24 + $0x350] sm:$0xff] }
 0x178   : > { %4086 = vmatprep.subr.bf16.mxu0 %v4897_v45  ;;  %4182 = vmatprep.subr.bf16.mxu1 %v4945_v48  ;;  %v659_v45 = vld [vmem:[%s6489_s24 + $0x370] sm:$0xff]  ;;  %v656_v48 = vld [vmem:[%s6489_s24 + $0x358] sm:$0xff]  ;;  %v4961_v50 = vcombine.high %v648_v41, %v652_v42  ;;  %v4962_v55 = vcombine.low %v648_v41, %v652_v42  ;;  %v4975_v42 = vcombine.high %v704_v37, %v708_v38 }
 0x179   : > { %v4915_v56 = vcombine.high %v655_v44, %v659_v45  ;;  %v4916_v60 = vcombine.low %v655_v44, %v659_v45  ;;  %v712_v44 = vld [vmem:[%s6489_s24 + $0x518] sm:$0xff] }
 0x17a   : > { %v716_v45 = vld [vmem:[%s6489_s24 + $0x538] sm:$0xff] }
 0x17b   : > { %4088 = vmatpush1.bf16.msra.mxu0 %v4898_v49  ;;  %4184 = vmatpush1.bf16.msra.mxu1 %v4946_v52  ;;  %v660_v49 = vld [vmem:[%s6489_s24 + $0x378] sm:$0xff]  ;;  %v663_v52 = vld [vmem:[%s6489_s24 + $0x390] sm:$0xff] }
 0x17c   : > { %4090 = vmatprep.subr.bf16.mxu0 %v4899_v53  ;;  %4186 = vmatprep.subr.bf16.mxu1 %v4947_v57  ;;  %v667_v53 = vld [vmem:[%s6489_s24 + $0x3b0] sm:$0xff]  ;;  %v664_v57 = vld [vmem:[%s6489_s24 + $0x398] sm:$0xff]  ;;  %v4963_v59 = vcombine.high %v656_v48, %v660_v49 }
 0x17d   : > { %v4918_v4 = vcombine.low %v663_v52, %v667_v53 }
 0x17f   : > { %4092 = vmatpush1.bf16.msra.mxu0 %v4900_v58  ;;  %4188 = vmatpush1.bf16.msra.mxu1 %v4948_v61  ;;  %v668_v58 = vld [vmem:[%s6489_s24 + $0x3b8] sm:$0xff]  ;;  %v4964_v61 = vcombine.low %v656_v48, %v660_v49  ;;  %v4977_v48 = vcombine.high %v712_v44, %v716_v45  ;;  %v719_v49 = vld [vmem:[%s6489_s24 + $0x550] sm:$0xff] }
 0x180   : > { %4094 = vmatprep.subr.bf16.mxu0 %v4901_v62  ;;  %4190 = vmatprep.subr.bf16.mxu1 %v4949_v1  ;;  %v4917_v62 = vcombine.high %v663_v52, %v667_v53  ;;  %v4965_v63 = vcombine.high %v664_v57, %v668_v58  ;;  %v675_v1 = vld [vmem:[%s6489_s24 + $0x3f0] sm:$0xff]  ;;  %v724_v52 = vld [vmem:[%s6489_s24 + $0x578] sm:$0xff] }
 0x181   : > { %v4920_v12 = vcombine.low %v671_v0, %v675_v1 }
 0x183   : > { %4096 = vmatpush1.bf16.msra.mxu0 %v4902_v2  ;;  %4192 = vmatpush1.bf16.msra.mxu1 %v4950_v5  ;;  %v672_v2 = vld [vmem:[%s6489_s24 + $0x3d8] sm:$0xff]  ;;  %v4966_v5 = vcombine.low %v664_v57, %v668_v58  ;;  %v727_v58 = vld [vmem:[%s6489_s24 + $0x590] sm:$0xff] }
 0x184   : > { %4098 = vmatprep.subr.bf16.mxu0 %v4903_v6  ;;  %4194 = vmatprep.subr.bf16.mxu1 %v4951_v9  ;;  %v4919_v6 = vcombine.high %v671_v0, %v675_v1  ;;  %v4967_v7 = vcombine.high %v672_v2, %v676_v3  ;;  %v683_v9 = vld [vmem:[%s6489_s24 + $0x430] sm:$0xff] }
 0x185   : > { %v4922_v21 = vcombine.low %v679_v8, %v683_v9 }
 0x187   : > { %4100 = vmatpush1.bf16.msra.mxu0 %v4904_v10  ;;  %4196 = vmatpush1.bf16.msra.mxu1 %v4952_v13  ;;  %v680_v10 = vld [vmem:[%s6489_s24 + $0x418] sm:$0xff]  ;;  %v4968_v13 = vcombine.low %v672_v2, %v676_v3  ;;  %v735_v2 = vld [vmem:[%s6489_s24 + $0x5d0] sm:$0xff] }
 0x188   : > { %4102 = vmatprep.subr.bf16.mxu0 %v4905_v14  ;;  %4198 = vmatprep.subr.bf16.mxu1 %v4953_v18  ;;  %v4921_v14 = vcombine.high %v679_v8, %v683_v9  ;;  %v4969_v16 = vcombine.high %v680_v10, %v684_v11  ;;  %v691_v18 = vld [vmem:[%s6489_s24 + $0x470] sm:$0xff] }
 0x189   : > { %v739_v3 = vld [vmem:[%s6489_s24 + $0x5f0] sm:$0xff] }
 0x18a   : > { %v4935_v8 = vcombine.high %v735_v2, %v739_v3 }
 0x18b   : > { %4104 = vmatpush1.bf16.msra.mxu0 %v4906_v19  ;;  %4200 = vmatpush1.bf16.msra.mxu1 %v4954_v22  ;;  %v688_v19 = vld [vmem:[%s6489_s24 + $0x458] sm:$0xff]  ;;  %v4970_v22 = vcombine.low %v680_v10, %v684_v11  ;;  %v4936_v10 = vcombine.low %v735_v2, %v739_v3 }
 0x18c   : > { %4106 = vmatprep.subr.bf16.mxu0 %v4907_v23  ;;  %4202 = vmatprep.subr.bf16.mxu1 %v4955_v26  ;;  %v4923_v23 = vcombine.high %v687_v17, %v691_v18  ;;  %v4971_v24 = vcombine.high %v688_v19, %v692_v20  ;;  %v699_v26 = vld [vmem:[%s6489_s24 + $0x4b0] sm:$0xff] }
 0x18d   : > { %v4925_v33 = vcombine.high %v695_v25, %v699_v26 }
 0x18f   : > { %4108 = vmatpush1.bf16.msra.mxu0 %v4908_v27  ;;  %4204 = vmatpush1.bf16.msra.mxu1 %v4956_v31  ;;  %v5773_v27 = vld [vmem:[%s6534_s15] sm:$0xff]  ;;  %v4924_v31 = vcombine.low %v687_v17, %v691_v18  ;;  %v5382_v18 = vld [vmem:[%s6505_s18 + $0x2c] ss:$16 sps:$4 sm:$0xff]  }
 0x190   : > { %4110 = vmatprep.subr.bf16.mxu0 %v4909_v32  ;;  %4206 = vmatprep.subr.bf16.mxu1 %v4957_v35  ;;  %v4972_v32 = vcombine.low %v688_v19, %v692_v20  ;;  %v703_v35 = vld [vmem:[%s6489_s24 + $0x4d0] sm:$0xff]  ;;  %v5384_v20 = vld [vmem:[%s6505_s18 + $0x28] ss:$16 sps:$4 sm:$0xff]  }
 0x191   : > { %v5379_v17 = vld [vmem:[%s6505_s18 + $0x24] ss:$16 sps:$4 sm:$0xff]   ;;  %v5381_v19 = vld [vmem:[%s6505_s18 + $0x20] ss:$16 sps:$4 sm:$0xff]  }
 0x193   : > { %4112 = vmatpush1.bf16.msra.mxu0 %v4910_v36  ;;  %4208 = vmatpush1.bf16.msra.mxu1 %v4958_v39  ;;  %v707_v36 = vld [vmem:[%s6489_s24 + $0x4f0] sm:$0xff]  ;;  %v4926_v39 = vcombine.low %v695_v25, %v699_v26  ;;  %v5394_v25 = vld [vmem:[%s6505_s18 + $0x6c] ss:$16 sps:$4 sm:$0xff]  }
 0x194   : > { %4114 = vmatprep.subr.bf16.mxu0 %v4911_v40  ;;  %4210 = vmatprep.subr.bf16.mxu1 %v4959_v54  ;;  %v4974_v40 = vcombine.low %v696_v28, %v700_v29  ;;  %v4927_v41 = vcombine.high %v703_v35, %v707_v36  ;;  %v711_v54 = vld [vmem:[%s6489_s24 + $0x510] sm:$0xff] }
 0x195   : > { %v5393_v26 = vld [vmem:[%s6505_s18 + $0x60] ss:$16 sps:$4 sm:$0xff]  }
 0x197   : > { %4116 = vmatpush1.bf16.msra.mxu0 %v4912_v43  ;;  %4212 = vmatpush1.bf16.msra.mxu1 %v4960_v46  ;;  %v715_v43 = vld [vmem:[%s6489_s24 + $0x530] sm:$0xff]  ;;  %v4928_v46 = vcombine.low %v703_v35, %v707_v36 }
 0x198   : > { %4118 = vmatprep.subr.bf16.mxu0 %v4913_v47  ;;  %4214 = vmatprep.subr.bf16.mxu1 %v4961_v50  ;;  %v4929_v47 = vcombine.high %v711_v54, %v715_v43  ;;  %v723_v50 = vld [vmem:[%s6489_s24 + $0x570] sm:$0xff]  ;;  %v4930_v53 = vcombine.low %v711_v54, %v715_v43  ;;  %v5402_v54 = vld [vmem:[%s6505_s18 + $0x88] ss:$16 sps:$4 sm:$0xff]  }
 0x199   : > { %v5397_v36 = vld [vmem:[%s6505_s18 + $0x84] ss:$16 sps:$4 sm:$0xff]  }
 0x19b   : > { %4120 = vmatpush1.bf16.msra.mxu0 %v4914_v51  ;;  %4216 = vmatpush1.bf16.msra.mxu1 %v4962_v55  ;;  %v720_v51 = vld [vmem:[%s6489_s24 + $0x558] sm:$0xff]  ;;  %v4978_v55 = vcombine.low %v712_v44, %v716_v45 }
 0x19c   : > { %4122 = vmatprep.subr.bf16.mxu0 %v4915_v56  ;;  %4218 = vmatprep.subr.bf16.mxu1 %v4963_v59  ;;  %v4931_v56 = vcombine.high %v719_v49, %v723_v50  ;;  %v4979_v57 = vcombine.high %v720_v51, %v724_v52  ;;  %v731_v59 = vld [vmem:[%s6489_s24 + $0x5b0] sm:$0xff] }
 0x19d   : > { %v4933_v0 = vcombine.high %v727_v58, %v731_v59 }
 0x19f   : > { %4124 = vmatpush1.bf16.msra.mxu0 %v4916_v60  ;;  %4220 = vmatpush1.bf16.msra.mxu1 %v4964_v61  ;;  %v728_v60 = vld [vmem:[%s6489_s24 + $0x598] sm:$0xff] }
 0x1a0   : > { %4126 = vmatprep.subr.bf16.mxu0 %v4917_v62  ;;  %4222 = vmatprep.subr.bf16.mxu1 %v4965_v63  ;;  %v732_v61 = vld [vmem:[%s6489_s24 + $0x5b8] sm:$0xff]  ;;  %v4932_v62 = vcombine.low %v719_v49, %v723_v50  ;;  %v4980_v63 = vcombine.low %v720_v51, %v724_v52  ;;  %v5405_v50 = vld [vmem:[%s6505_s18 + $0xa0] ss:$16 sps:$4 sm:$0xff]  }
 0x1a1   : > { %v4981_v1 = vcombine.high %v728_v60, %v732_v61  ;;  %v5408_v51 = vld [vmem:[%s6505_s18 + $0xa8] ss:$16 sps:$4 sm:$0xff]  }
 0x1a3   : > { %4128 = vmatpush1.bf16.msra.mxu0 %v4918_v4  ;;  %4224 = vmatpush1.bf16.msra.mxu1 %v4966_v5  ;;  %v736_v4 = vld [vmem:[%s6489_s24 + $0x5d8] sm:$0xff] }
 0x1a4   : > { %4130 = vmatprep.subr.bf16.mxu0 %v4919_v6  ;;  %4226 = vmatprep.subr.bf16.mxu1 %v4967_v7  ;;  %v740_v5 = vld [vmem:[%s6489_s24 + $0x5f8] sm:$0xff]  ;;  %v4934_v6 = vcombine.low %v727_v58, %v731_v59  ;;  %v4982_v7 = vcombine.low %v728_v60, %v732_v61  ;;  %v5409_v59 = vld [vmem:[%s6505_s18 + $0xc4] ss:$16 sps:$4 sm:$0xff]  }
 0x1a5   : > { %v4983_v9 = vcombine.high %v736_v4, %v740_v5  ;;  %v4984_v11 = vcombine.low %v736_v4, %v740_v5  ;;  %v5412_v60 = vld [vmem:[%s6505_s18 + $0xcc] ss:$16 sps:$4 sm:$0xff]  }
 0x1a7   : > { %4132 = vmatpush1.bf16.msra.mxu0 %v4920_v12  ;;  %4228 = vmatpush1.bf16.msra.mxu1 %v4968_v13  ;;  %v5373_v12 = vld [vmem:[%s6505_s18 + $0x4] ss:$16 sps:$4 sm:$0xff]   ;;  %v5376_v13 = vld [vmem:[%s6505_s18 + $0xc] ss:$16 sps:$4 sm:$0xff]  }
 0x1a8   : > { %4134 = vmatprep.subr.bf16.mxu0 %v4921_v14  ;;  %4230 = vmatprep.subr.bf16.mxu1 %v4969_v16  ;;  %v5375_v14 = vld [vmem:[%s6505_s18] ss:$16 sps:$4 sm:$0xff]   ;;  %v5378_v16 = vld [vmem:[%s6505_s18 + $0x8] ss:$16 sps:$4 sm:$0xff]  }
 0x1aa   : > { %1474 = vmatmul.mubr.f32.vlgmr.msra.gmra.mrb[2].mxu0 %v5773_v27  ;;  %1616 = vmatmul.mubr.f32.vlgmr.msra.gmra.mrb[2].mxu1 %v5773_v27  ;;  %v5396_v27 = vld [vmem:[%s6505_s18 + $0x68] ss:$16 sps:$4 sm:$0xff]  }
 0x1ab   : > { %4136 = vmatpush1.bf16.msra.mxu0 %v4922_v21  ;;  %4232 = vmatpush1.bf16.msra.mxu1 %v4970_v22  ;;  %v5388_v21 = vld [vmem:[%s6505_s18 + $0x4c] ss:$16 sps:$4 sm:$0xff]   ;;  %v5387_v22 = vld [vmem:[%s6505_s18 + $0x40] ss:$16 sps:$4 sm:$0xff]  }
 0x1ac   : > { %4138 = vmatprep.subr.bf16.mxu0 %v4923_v23  ;;  %4234 = vmatprep.subr.bf16.mxu1 %v4971_v24  ;;  %v5390_v23 = vld [vmem:[%s6505_s18 + $0x48] ss:$16 sps:$4 sm:$0xff]   ;;  %v5391_v24 = vld [vmem:[%s6505_s18 + $0x64] ss:$16 sps:$4 sm:$0xff]  }
 0x1ad   : > { %1544 = vmatprep.mubr.f32.mxu0 %v6090_v30  ;;  %1686 = vmatprep.mubr.f32.mxu1 %v6090_v30  ;;  %v4976_v30 = vcombine.low %v704_v37, %v708_v38 }
 0x1af   : > { %4140 = vmatpush1.bf16.msra.mxu0 %v4924_v31  ;;  %4236 = vmatpush1.bf16.msra.mxu1 %v4972_v32 }
 0x1b0   : > { %4142 = vmatprep.subr.bf16.mxu0 %v4925_v33  ;;  %4238 = vmatprep.subr.bf16.mxu1 %v4973_v34 }
 0x1b3   : > { %4144 = vmatpush1.bf16.msra.mxu0 %v4926_v39  ;;  %4240 = vmatpush1.bf16.msra.mxu1 %v4974_v40  ;;  %v5399_v39 = vld [vmem:[%s6505_s18 + $0x80] ss:$16 sps:$4 sm:$0xff]   ;;  %v5400_v40 = vld [vmem:[%s6505_s18 + $0x8c] ss:$16 sps:$4 sm:$0xff]  }
 0x1b4   : > { %4146 = vmatprep.subr.bf16.mxu0 %v4927_v41  ;;  %4242 = vmatprep.subr.bf16.mxu1 %v4975_v42 }
 0x1b7   : > { %4148 = vmatpush1.bf16.msra.mxu0 %v4928_v46  ;;  %4244 = vmatpush1.bf16.msra.mxu1 %v4976_v30  ;;  %v5403_v30 = vld [vmem:[%s6505_s18 + $0xa4] ss:$16 sps:$4 sm:$0xff]  }
 0x1b8   : > { %4150 = vmatprep.subr.bf16.mxu0 %v4929_v47  ;;  %4246 = vmatprep.subr.bf16.mxu1 %v4977_v48  ;;  %v5406_v47 = vld [vmem:[%s6505_s18 + $0xac] ss:$16 sps:$4 sm:$0xff]  }
 0x1bb   : > { %4152 = vmatpush1.bf16.msra.mxu0 %v4930_v53  ;;  %4248 = vmatpush1.bf16.msra.mxu1 %v4978_v55 }
 0x1bc   : > { %4154 = vmatprep.subr.bf16.mxu0 %v4931_v56  ;;  %4250 = vmatprep.subr.bf16.mxu1 %v4979_v57 }
 0x1bf   : > { %4156 = vmatpush1.bf16.msra.mxu0 %v4932_v62  ;;  %4252 = vmatpush1.bf16.msra.mxu1 %v4980_v63  ;;  %v5411_v63 = vld [vmem:[%s6505_s18 + $0xc0] ss:$16 sps:$4 sm:$0xff]  }
 0x1c0   : > { %4158 = vmatprep.subr.bf16.mxu0 %v4933_v0  ;;  %4254 = vmatprep.subr.bf16.mxu1 %v4981_v1  ;;  %v5414_v0 = vld [vmem:[%s6505_s18 + $0xc8] ss:$16 sps:$4 sm:$0xff]  }
 0x1c3   : > { %4160 = vmatpush1.bf16.msra.mxu0 %v4934_v6  ;;  %4256 = vmatpush1.bf16.msra.mxu1 %v4982_v7  ;;  %v5415_v7 = vld [vmem:[%s6505_s18 + $0xe4] ss:$16 sps:$4 sm:$0xff]  }
 0x1c4   : > { %4162 = vmatprep.subr.bf16.mxu0 %v4935_v8  ;;  %4258 = vmatprep.subr.bf16.mxu1 %v4983_v9  ;;  %v5418_v8 = vld [vmem:[%s6505_s18 + $0xec] ss:$16 sps:$4 sm:$0xff]  }
 0x1c7   : > { %4164 = vmatpush1.bf16.msra.mxu0 %v4936_v10  ;;  %4260 = vmatpush1.bf16.msra.mxu1 %v4984_v11  ;;  %v5417_v11 = vld [vmem:[%s6505_s18 + $0xe0] ss:$16 sps:$4 sm:$0xff]  }
 0x1c8   : > { %4262 = vmatprep.subr.bf16.mxu0 %v5373_v12  ;;  %4518 = vmatprep.subr.bf16.mxu1 %v5376_v13  ;;  %v5420_v12 = vld [vmem:[%s6505_s18 + $0xe8] ss:$16 sps:$4 sm:$0xff]  }
 0x1ca   : > { %1545 = vmatmul.mubr.f32.vlgmr.msra.gmra.mrb[2].mxu0 %v6650_v15  ;;  %1687 = vmatmul.mubr.f32.vlgmr.msra.gmra.mrb[2].mxu1 %v6650_v15  ;;  %v5385_v15 = vld [vmem:[%s6505_s18 + $0x44] ss:$16 sps:$4 sm:$0xff]  }
 0x1cb   : > { %4264 = vmatpush1.bf16.msra.mxu0 %v5375_v14  ;;  %4520 = vmatpush1.bf16.msra.mxu1 %v5378_v16 }
 0x1cc   : > { %4266 = vmatprep.subr.bf16.mxu0 %v5379_v17  ;;  %4522 = vmatprep.subr.bf16.mxu1 %v5382_v18 }
 0x1cf   : > { %4268 = vmatpush1.bf16.msra.mxu0 %v5381_v19  ;;  %4524 = vmatpush1.bf16.msra.mxu1 %v5384_v20  ;;  %v5421_v20 = vld [vmem:[%s6505_s18 + $0x104] ss:$16 sps:$4 sm:$0xff]  }
 0x1d0   : > { %4270 = vmatprep.subr.bf16.mxu0 %v5385_v15  ;;  %4526 = vmatprep.subr.bf16.mxu1 %v5388_v21  ;;  %v5424_v15 = vld [vmem:[%s6505_s18 + $0x10c] ss:$16 sps:$4 sm:$0xff]  }
 0x1d3   : > { %4272 = vmatpush1.bf16.msra.mxu0 %v5387_v22  ;;  %4528 = vmatpush1.bf16.msra.mxu1 %v5390_v23  ;;  %v5423_v23 = vld [vmem:[%s6505_s18 + $0x100] ss:$16 sps:$4 sm:$0xff]  }
 0x1d4   : > { %4274 = vmatprep.subr.bf16.mxu0 %v5391_v24  ;;  %4530 = vmatprep.subr.bf16.mxu1 %v5394_v25  ;;  %v5426_v24 = vld [vmem:[%s6505_s18 + $0x108] ss:$16 sps:$4 sm:$0xff]  }
 0x1d7   : > { %4276 = vmatpush1.bf16.msra.mxu0 %v5393_v26  ;;  %4532 = vmatpush1.bf16.msra.mxu1 %v5396_v27 }
 0x1d8   : > { %4278 = vmatprep.subr.bf16.mxu0 %v5397_v36  ;;  %4534 = vmatprep.subr.bf16.mxu1 %v5400_v40  ;;  %v5427_v36 = vld [vmem:[%s6505_s18 + $0x124] ss:$16 sps:$4 sm:$0xff]   ;;  %v5429_v40 = vld [vmem:[%s6505_s18 + $0x120] ss:$16 sps:$4 sm:$0xff]  }
 0x1db   : > { %4280 = vmatpush1.bf16.msra.mxu0 %v5399_v39  ;;  %4536 = vmatpush1.bf16.msra.mxu1 %v5402_v54 }
 0x1dc   : > { %4282 = vmatprep.subr.bf16.mxu0 %v5403_v30  ;;  %4538 = vmatprep.subr.bf16.mxu1 %v5406_v47  ;;  %v5433_v30 = vld [vmem:[%s6505_s18 + $0x144] ss:$16 sps:$4 sm:$0xff]   ;;  %v5436_v47 = vld [vmem:[%s6505_s18 + $0x14c] ss:$16 sps:$4 sm:$0xff]  }
 0x1df   : > { %4284 = vmatpush1.bf16.msra.mxu0 %v5405_v50  ;;  %4540 = vmatpush1.bf16.msra.mxu1 %v5408_v51  ;;  %v5435_v50 = vld [vmem:[%s6505_s18 + $0x140] ss:$16 sps:$4 sm:$0xff]  }
 0x1e0   : > { %4286 = vmatprep.subr.bf16.mxu0 %v5409_v59  ;;  %4542 = vmatprep.subr.bf16.mxu1 %v5412_v60  ;;  %v5439_v59 = vld [vmem:[%s6505_s18 + $0x164] ss:$16 sps:$4 sm:$0xff]   ;;  %v5442_v60 = vld [vmem:[%s6505_s18 + $0x16c] ss:$16 sps:$4 sm:$0xff]  }
 0x1e3   : > { %4288 = vmatpush1.bf16.msra.mxu0 %v5411_v63  ;;  %4544 = vmatpush1.bf16.msra.mxu1 %v5414_v0  ;;  %v5441_v63 = vld [vmem:[%s6505_s18 + $0x160] ss:$16 sps:$4 sm:$0xff]   ;;  %v5444_v0 = vld [vmem:[%s6505_s18 + $0x168] ss:$16 sps:$4 sm:$0xff]  }
 0x1e4   : > { %4290 = vmatprep.subr.bf16.mxu0 %v5415_v7  ;;  %4546 = vmatprep.subr.bf16.mxu1 %v5418_v8 }
 0x1e7   : > { %4292 = vmatpush1.bf16.msra.mxu0 %v5417_v11  ;;  %4548 = vmatpush1.bf16.msra.mxu1 %v5420_v12  ;;  %v5445_v11 = vld [vmem:[%s6505_s18 + $0x184] ss:$16 sps:$4 sm:$0xff]  }
 0x1e8   : > { %4294 = vmatprep.subr.bf16.mxu0 %v5421_v20  ;;  %4550 = vmatprep.subr.bf16.mxu1 %v5424_v15  ;;  %v5451_v20 = vld [vmem:[%s6505_s18 + $0x1a4] ss:$16 sps:$4 sm:$0xff]   ;;  %v5454_v15 = vld [vmem:[%s6505_s18 + $0x1ac] ss:$16 sps:$4 sm:$0xff]  }
 0x1eb   : > { %4296 = vmatpush1.bf16.msra.mxu0 %v5423_v23  ;;  %4552 = vmatpush1.bf16.msra.mxu1 %v5426_v24  ;;  %v5457_v23 = vld [vmem:[%s6505_s18 + $0x1c4] ss:$16 sps:$4 sm:$0xff]   ;;  %v5460_v24 = vld [vmem:[%s6505_s18 + $0x1cc] ss:$16 sps:$4 sm:$0xff]  }
 0x1ec   : > { %4298 = vmatprep.subr.bf16.mxu0 %v5427_v36 }
 0x1ef   : > { %4300 = vmatpush1.bf16.msra.mxu0 %v5429_v40  ;;  %v5468_v40 = vld [vmem:[%s6505_s18 + $0x1e8] ss:$16 sps:$4 sm:$0xff]  }
 0x1f0   : > { %4302 = vmatprep.subr.bf16.mxu0 %v5433_v30  ;;  %v5472_v30 = vld [vmem:[%s6505_s18 + $0x20c] ss:$16 sps:$4 sm:$0xff]  }
 0x1f3   : > { %4304 = vmatpush1.bf16.msra.mxu0 %v5435_v50 }
 0x1f4   : > { %4306 = vmatprep.subr.bf16.mxu0 %v5439_v59 }
 0x1f7   : > { %4308 = vmatpush1.bf16.msra.mxu0 %v5441_v63 }
 0x1f8   : > { %4310 = vmatprep.subr.bf16.mxu0 %v5445_v11 }
 0x23d   : > { %v6765_v28 = vpop.f32.mrb[0].mxu0  ;;  %v6768_v31 = vpop.f32.mrb[0].mxu1 }
 0x23e   : > { %v1693_v29 = vrot.slane %v6765_v28, 4  ;;  %v6770_v32 = vpop.f32.mrb[1].mxu0  ;;  %v1705_v33 = vrot.slane %v6768_v31, 4  ;;  %v6774_v35 = vpop.f32.mrb[1].mxu1 }
 0x23f   : > { %v1699_v34 = vrot.slane %v6770_v32, 4  ;;  %v1711_v38 = vrot.slane %v6774_v35, 4 }
 0x240   : > { %v1694_v37 = vadd.f32 %v1693_v29, %v6765_v28  ;;  %v1706_v41 = vadd.f32 %v1705_v33, %v6768_v31 }
 0x241   : > { %v1700_v42 = vadd.f32 %v1699_v34, %v6770_v32  ;;  %v1712_v44 = vadd.f32 %v1711_v38, %v6774_v35 }
 0x242   : > { %v1695_v43 = vrot.slane %v1694_v37, 2  ;;  %v1707_v45 = vrot.slane %v1706_v41, 2 }
 0x243   : > { %v1701_v46 = vrot.slane %v1700_v42, 2  ;;  %v1713_v49 = vrot.slane %v1712_v44, 2 }
 0x244   : > { %v1696_v48 = vadd.f32 %v1695_v43, %v1694_v37  ;;  %v1708_v52 = vadd.f32 %v1707_v45, %v1706_v41  ;;  %v5430_v37 = vld [vmem:[%s6505_s18 + $0x12c] ss:$16 sps:$4 sm:$0xff]   ;;  %v5432_v41 = vld [vmem:[%s6505_s18 + $0x128] ss:$16 sps:$4 sm:$0xff]  }
 0x245   : > { %v1702_v53 = vadd.f32 %v1701_v46, %v1700_v42  ;;  %v1714_v56 = vadd.f32 %v1713_v49, %v1712_v44  ;;  %4554 = vmatprep.subr.bf16.mxu1 %v5430_v37  ;;  %v5465_v37 = vld [vmem:[%s6505_s18 + $0x1e0] ss:$16 sps:$4 sm:$0xff]  }
 0x246   : > { %v1697_v55 = vrot.slane %v1696_v48, 1  ;;  %v1709_v57 = vrot.slane %v1708_v52, 1  ;;  %4556 = vmatpush1.bf16.msra.mxu1 %v5432_v41 }
 0x247   : > { %v1703_v58 = vrot.slane %v1702_v53, 1  ;;  %v1715_v62 = vrot.slane %v1714_v56, 1  ;;  %4558 = vmatprep.subr.bf16.mxu1 %v5436_v47 }
 0x248   : > { %v1698_v61 = vadd.f32 %v1697_v55, %v1696_v48  ;;  %v1710_v1 = vadd.f32 %v1709_v57, %v1708_v52 }
 0x249   : > { %v1704_v2 = vadd.f32 %v1703_v58, %v1702_v53  ;;  %v1716_v4 = vadd.f32 %v1715_v62, %v1714_v56  ;;  %v5438_v53 = vld [vmem:[%s6505_s18 + $0x148] ss:$16 sps:$4 sm:$0xff]  }
 0x24a   : > { %v6793_v3 = vmul.f32 0.125, %v1698_v61  ;;  %v6795_v5 = vmul.f32 0.125, %v1710_v1  ;;  %4560 = vmatpush1.bf16.msra.mxu1 %v5438_v53 }
 0x24b   : > { %v6797_v6 = vmul.f32 0.125, %v1704_v2  ;;  %v6803_v10 = vmul.f32 0.125, %v1716_v4  ;;  %4562 = vmatprep.subr.bf16.mxu1 %v5442_v60 }
 0x24c   : > { %v1750_v9 = vsub.f32 %v6765_v28, %v6793_v3  ;;  %v1752_v13 = vsub.f32 %v6768_v31, %v6795_v5 }
 0x24d   : > { %v1751_v14 = vsub.f32 %v6770_v32, %v6797_v6  ;;  %v1753_v17 = vsub.f32 %v6774_v35, %v6803_v10 }
 0x24e   : > { %v1758_v16 = vmul.f32 %v1750_v9, %v1750_v9  ;;  %v1760_v18 = vmul.f32 %v1752_v13, %v1752_v13  ;;  %4564 = vmatpush1.bf16.msra.mxu1 %v5444_v0  ;;  %v5447_v13 = vld [vmem:[%s6505_s18 + $0x180] ss:$16 sps:$4 sm:$0xff]  }
 0x24f   : > { %v1759_v19 = vmul.f32 %v1751_v14, %v1751_v14  ;;  %v1761_v22 = vmul.f32 %v1753_v17, %v1753_v17  ;;  %v5448_v14 = vld [vmem:[%s6505_s18 + $0x18c] ss:$16 sps:$4 sm:$0xff]   ;;  %4312 = vmatpush1.bf16.msra.mxu0 %v5447_v13  ;;  %v6091_v17 = vmov 1966171168  }
 0x250   : > { %v1766_v21 = vrot.slane %v1758_v16, 4  ;;  %v1778_v25 = vrot.slane %v1760_v18, 4  ;;  %4566 = vmatprep.subr.bf16.mxu1 %v5448_v14  ;;  %4314 = vmatprep.subr.bf16.mxu0 %v5451_v20 }
 0x251   : > { %v1772_v26 = vrot.slane %v1759_v19, 4  ;;  %v1784_v29 = vrot.slane %v1761_v22, 4 }
 0x252   : > { %v1767_v27 = vadd.f32 %v1766_v21, %v1758_v16  ;;  %v1779_v33 = vadd.f32 %v1778_v25, %v1760_v18  ;;  %v5450_v16 = vld [vmem:[%s6505_s18 + $0x188] ss:$16 sps:$4 sm:$0xff]   ;;  %v1852_v18 = vunpack.c.l.s4 %v6091_v17  ;;  %v5453_v21 = vld [vmem:[%s6505_s18 + $0x1a0] ss:$16 sps:$4 sm:$0xff]  }
 0x253   : > { %v1773_v34 = vadd.f32 %v1772_v26, %v1759_v19  ;;  %v1785_v39 = vadd.f32 %v1784_v29, %v1761_v22  ;;  %v1854_v19 = vlaneseq  ;;  %4568 = vmatpush1.bf16.msra.mxu1 %v5450_v16  ;;  %v5456_v22 = vld [vmem:[%s6505_s18 + $0x1a8] ss:$16 sps:$4 sm:$0xff]   ;;  %4316 = vmatpush1.bf16.msra.mxu0 %v5453_v21  ;;  %v5459_v25 = vld [vmem:[%s6505_s18 + $0x1c0] ss:$16 sps:$4 sm:$0xff]  }
 0x254   : > { %v1768_v38 = vrot.slane %v1767_v27, 2  ;;  %v1780_v42 = vrot.slane %v1779_v33, 2  ;;  %4570 = vmatprep.subr.bf16.mxu1 %v5454_v15  ;;  %v1853_v26 = vunpack.c.0.s8 %v1852_v18  ;;  %4318 = vmatprep.subr.bf16.mxu0 %v5457_v23  ;;  %v5462_v29 = vld [vmem:[%s6505_s18 + $0x1c8] ss:$16 sps:$4 sm:$0xff]  }
 0x255   : > { %v1774_v54 = vrot.slane %v1773_v34, 2  ;;  %v1786_v44 = vrot.slane %v1785_v39, 2 }
 0x256   : > { %v1769_v43 = vadd.f32 %v1768_v38, %v1767_v27  ;;  %v1781_v45 = vadd.f32 %v1780_v42, %v1779_v33  ;;  %v6840_v27 = vshrl.u32 %v1854_v19, 7  ;;  %v5463_v33 = vld [vmem:[%s6505_s18 + $0x1e4] ss:$16 sps:$4 sm:$0xff]  }
 0x257   : > { %v1775_v46 = vadd.f32 %v1774_v54, %v1773_v34  ;;  %v1787_v49 = vadd.f32 %v1786_v44, %v1785_v39  ;;  %4572 = vmatpush1.bf16.msra.mxu1 %v5456_v22  ;;  %v5466_v34 = vld [vmem:[%s6505_s18 + $0x1ec] ss:$16 sps:$4 sm:$0xff]   ;;  %4320 = vmatpush1.bf16.msra.mxu0 %v5459_v25 }
 0x258   : > { %v1770_v48 = vrot.slane %v1769_v43, 1  ;;  %v1782_v51 = vrot.slane %v1781_v45, 1  ;;  %4574 = vmatprep.subr.bf16.mxu1 %v5460_v24  ;;  %v6847_v39 = vsub.s32 %v1853_v26, %v6840_v27  ;;  %4322 = vmatprep.subr.bf16.mxu0 %v5463_v33 }
 0x259   : > { %v1776_v52 = vrot.slane %v1775_v46, 1  ;;  %v1788_v56 = vrot.slane %v1787_v49, 1 }
 0x25a   : > { %v1771_v55 = vadd.f32 %v1770_v48, %v1769_v43  ;;  %v1783_v57 = vadd.f32 %v1782_v51, %v1781_v45 }
 0x25b   : > { %v1777_v58 = vadd.f32 %v1776_v52, %v1775_v46  ;;  %v1789_v62 = vadd.f32 %v1788_v56, %v1787_v49  ;;  %4576 = vmatpush1.bf16.msra.mxu1 %v5462_v29  ;;  %4324 = vmatpush1.bf16.msra.mxu0 %v5465_v37  ;;  %v5469_v46 = vld [vmem:[%s6505_s18 + $0x204] ss:$16 sps:$4 sm:$0xff]  }
 0x25c   : > { %v1814_v61 = vmul.f32 0.125, %v1771_v55  ;;  %v1816_v1 = vmul.f32 0.125, %v1783_v57  ;;  %4578 = vmatprep.subr.bf16.mxu1 %v5466_v34  ;;  %4326 = vmatprep.subr.bf16.mxu0 %v5469_v46 }
 0x25d   : > { %v1815_v2 = vmul.f32 0.125, %v1777_v58  ;;  %v1817_v7 = vmul.f32 0.125, %v1789_v62 }
 0x25e   : > { %v1823_v4 = vadd.f32 1e-05, %v1814_v61  ;;  %v1825_v8 = vadd.f32 1e-05, %v1816_v1 }
 0x25f   : > { %v1824_v9 = vadd.f32 1e-05, %v1815_v2  ;;  %v1826_v12 = vadd.f32 1e-05, %v1817_v7  ;;  %4580 = vmatpush1.bf16.msra.mxu1 %v5468_v40 }
 0x260   : > { %5757 = vrsqrt.f32 %v1823_v4  ;;  %4582 = vmatprep.subr.bf16.mxu1 %v5472_v30 }
 0x261   : > { %5759 = vrsqrt.f32 %v1825_v8 }
 0x262   : > { %5761 = vrsqrt.f32 %v1824_v9 }
 0x263   : > { %5763 = vrsqrt.f32 %v1826_v12 }
 0x26a   : > { %v5758_v36 = vpop.eup %5757 }
 0x26b   : > { %v5760_v38 = vpop.eup %5759 }
 0x26c   : > { %v5762_v41 = vpop.eup %5761 }
 0x26d   : > { %v5764_v42 = vpop.eup %5763  ;;  %v1847_v54 = vcombine.low %v5758_v36, %v5762_v41 }
 0x26e   : > { %v1848_v43 = vcombine.low %v5760_v38, %v5764_v42 }
 0x26f   : > { %v6851_v44 = vrot.slane %v1847_v54, %v6847_v39 }
 0x270   : > { %v6854_v45 = vrot.slane %v1848_v43, %v6847_v39 }
 0x272   : > { %v1879_v47 = vcombine.low %v6851_v44, %v6854_v45  ;;  %v6911_v44 = vsub.s32 2, %v6840_v27  ;;  %v6914_v45 = vsub.s32 3, %v6840_v27 }
 0x29d   : > { %v6860_v48 = vpop.f32.mrb[2].mxu0  ;;  %v6863_v50 = vpop.f32.mrb[2].mxu1 }
 0x29e   : > { %v1717_v49 = vrot.slane %v6860_v48, 4  ;;  %v6865_v51 = vpop.f32.mrb[3].mxu0  ;;  %v1729_v52 = vrot.slane %v6863_v50, 4  ;;  %v6869_v55 = vpop.f32.mrb[3].mxu1 }
 0x29f   : > { %v1723_v53 = vrot.slane %v6865_v51, 4  ;;  %v1735_v57 = vrot.slane %v6869_v55, 4 }
 0x2a0   : > { %v1718_v56 = vadd.f32 %v1717_v49, %v6860_v48  ;;  %v1730_v58 = vadd.f32 %v1729_v52, %v6863_v50 }
 0x2a1   : > { %v1724_v59 = vadd.f32 %v1723_v53, %v6865_v51  ;;  %v1736_v61 = vadd.f32 %v1735_v57, %v6869_v55 }
 0x2a2   : > { %v1719_v60 = vrot.slane %v1718_v56, 2  ;;  %v1731_v62 = vrot.slane %v1730_v58, 2 }
 0x2a3   : > { %v1725_v63 = vrot.slane %v1724_v59, 2  ;;  %v1737_v1 = vrot.slane %v1736_v61, 2 }
 0x2a4   : > { %v1720_v0 = vadd.f32 %v1719_v60, %v1718_v56  ;;  %v1732_v2 = vadd.f32 %v1731_v62, %v1730_v58 }
 0x2a5   : > { %v1726_v4 = vadd.f32 %v1725_v63, %v1724_v59  ;;  %v1738_v8 = vadd.f32 %v1737_v1, %v1736_v61 }
 0x2a6   : > { %v1721_v7 = vrot.slane %v1720_v0, 1  ;;  %v1733_v9 = vrot.slane %v1732_v2, 1 }
 0x2a7   : > { %v1727_v11 = vrot.slane %v1726_v4, 1  ;;  %v1739_v13 = vrot.slane %v1738_v8, 1 }
 0x2a8   : > { %v1722_v12 = vadd.f32 %v1721_v7, %v1720_v0  ;;  %v1734_v14 = vadd.f32 %v1733_v9, %v1732_v2 }
 0x2a9   : > { %v1728_v16 = vadd.f32 %v1727_v11, %v1726_v4  ;;  %v1740_v18 = vadd.f32 %v1739_v13, %v1738_v8 }
 0x2aa   : > { %v6876_v17 = vmul.f32 0.125, %v1722_v12  ;;  %v6878_v19 = vmul.f32 0.125, %v1734_v14 }
 0x2ab   : > { %v6880_v20 = vmul.f32 0.125, %v1728_v16  ;;  %v6884_v21 = vmul.f32 0.125, %v1740_v18 }
 0x2ac   : > { %v1754_v15 = vsub.f32 %v6860_v48, %v6876_v17  ;;  %v1756_v22 = vsub.f32 %v6863_v50, %v6878_v19 }
 0x2ad   : > { %v1755_v23 = vsub.f32 %v6865_v51, %v6880_v20  ;;  %v1757_v25 = vsub.f32 %v6869_v55, %v6884_v21 }
 0x2ae   : > { %v1762_v24 = vmul.f32 %v1754_v15, %v1754_v15  ;;  %v1764_v26 = vmul.f32 %v1756_v22, %v1756_v22 }
 0x2af   : > { %v1763_v29 = vmul.f32 %v1755_v23, %v1755_v23  ;;  %v1765_v34 = vmul.f32 %v1757_v25, %v1757_v25 }
 0x2b0   : > { %v1790_v33 = vrot.slane %v1762_v24, 4  ;;  %v1802_v36 = vrot.slane %v1764_v26, 4 }
 0x2b1   : > { %v1796_v37 = vrot.slane %v1763_v29, 4  ;;  %v1808_v40 = vrot.slane %v1765_v34, 4 }
 0x2b2   : > { %v1791_v38 = vadd.f32 %v1790_v33, %v1762_v24  ;;  %v1803_v41 = vadd.f32 %v1802_v36, %v1764_v26  ;;  %v1918_v36 = vsub.s32 4, %v6840_v27 }
 0x2b3   : > { %v1797_v42 = vadd.f32 %v1796_v37, %v1763_v29  ;;  %v1809_v43 = vadd.f32 %v1808_v40, %v1765_v34  ;;  %v1887_v29 = vrot.slane %v1879_v47, %v6847_v39  ;;  %v1822_v34 = vld [vmem:[%s6497_s23] sm:$0xff]  ;;  %v1926_v40 = vsub.s32 6, %v6840_v27 }
 0x2b4   : > { %v1792_v54 = vrot.slane %v1791_v38, 2  ;;  %v1804_v46 = vrot.slane %v1803_v41, 2 }
 0x2b5   : > { %v1798_v30 = vrot.slane %v1797_v42, 2  ;;  %v1810_v52 = vrot.slane %v1809_v43, 2 }
 0x2b6   : > { %v1793_v49 = vadd.f32 %v1792_v54, %v1791_v38  ;;  %v1805_v53 = vadd.f32 %v1804_v46, %v1803_v41  ;;  %v1922_v38 = vsub.s32 5, %v6840_v27  ;;  %v1930_v41 = vsub.s32 7, %v6840_v27 }
 0x2b7   : > { %v1799_v56 = vadd.f32 %v1798_v30, %v1797_v42  ;;  %v1811_v58 = vadd.f32 %v1810_v52, %v1809_v43  ;;  %v6905_v42 = vsub.s32 0, %v6840_v27  ;;  %v6908_v54 = vsub.s32 1, %v6840_v27 }
 0x2b8   : > { %v1794_v57 = vrot.slane %v1793_v49, 1  ;;  %v1806_v59 = vrot.slane %v1805_v53, 1 }
 0x2b9   : > { %v1800_v60 = vrot.slane %v1799_v56, 1  ;;  %v1812_v62 = vrot.slane %v1811_v58, 1 }
 0x2ba   : > { %v1795_v61 = vadd.f32 %v1794_v57, %v1793_v49  ;;  %v1807_v63 = vadd.f32 %v1806_v59, %v1805_v53 }
 0x2bb   : > { %v1801_v0 = vadd.f32 %v1800_v60, %v1799_v56  ;;  %v1813_v2 = vadd.f32 %v1812_v62, %v1811_v58 }
 0x2bc   : > { %v1818_v1 = vmul.f32 0.125, %v1795_v61  ;;  %v1820_v4 = vmul.f32 0.125, %v1807_v63 }
 0x2bd   : > { %v1819_v7 = vmul.f32 0.125, %v1801_v0  ;;  %v1821_v9 = vmul.f32 0.125, %v1813_v2 }
 0x2be   : > { %v1827_v8 = vadd.f32 1e-05, %v1818_v1  ;;  %v1829_v11 = vadd.f32 1e-05, %v1820_v4 }
 0x2bf   : > { %v1828_v12 = vadd.f32 1e-05, %v1819_v7  ;;  %v1830_v13 = vadd.f32 1e-05, %v1821_v9 }
 0x2c0   : > { %5765 = vrsqrt.f32 %v1827_v8 }
 0x2c1   : > { %5767 = vrsqrt.f32 %v1829_v11 }
 0x2c2   : > { %5769 = vrsqrt.f32 %v1828_v12  ;;  %v1898_v12 = vld [vmem:[%s6503_s20] sm:$0xff] }
 0x2c3   : > { %5771 = vrsqrt.f32 %v1830_v13 }
 0x2ca   : > { %v5766_v14 = vpop.eup %5765 }
 0x2cb   : > { %v5768_v16 = vpop.eup %5767 }
 0x2cc   : > { %v5770_v18 = vpop.eup %5769 }
 0x2cd   : > { %v5772_v15 = vpop.eup %5771  ;;  %v1849_v22 = vcombine.low %v5766_v14, %v5770_v18 }
 0x2ce   : > { %v1850_v23 = vcombine.low %v5768_v16, %v5772_v15 }
 0x2cf   : > { %v1871_v24 = vrot.slane %v1849_v22, %v6847_v39 }
 0x2d0   : > { %v1878_v25 = vrot.slane %v1850_v23, %v6847_v39 }
 0x2d2   : > { %v1880_v26 = vcombine.low %v1871_v24, %v1878_v25 }
 0x2d4   : > { %v1894_v33 = vrot.slane %v1880_v26, %v6847_v39 }
 0x2d6   : > { %v1895_v37 = vcombine.low %v1887_v29, %v1894_v33 }
 0x2d8   : > { %v1897_v47 = vmul.f32 %v1895_v37, %v1822_v34 }
 0x2da   : > { %v1919_v43 = vrot.slane %v1897_v47, %v1918_v36  ;;  %v1923_v46 = vrot.slane %v1897_v47, %v1922_v38  ;;  %v1927_v30 = vrot.slane %v1897_v47, %v1926_v40  ;;  %v1931_v49 = vrot.slane %v1897_v47, %v1930_v41 }
 0x2db   : > { %v1903_v52 = vrot.slane %v1897_v47, %v6905_v42  ;;  %v1907_v53 = vrot.slane %v1897_v47, %v6908_v54  ;;  %v1911_v56 = vrot.slane %v1897_v47, %v6911_v44  ;;  %v1915_v57 = vrot.slane %v1897_v47, %v6914_v45 }
 0x2dc   : > { %v1944_v58 = vmul.f32 %v1919_v43, %v6876_v17  ;;  %v1945_v59 = vmul.f32 %v1923_v46, %v6880_v20  ;;  %v1946_v27 = vmul.f32 %v1927_v30, %v6878_v19  ;;  %v1947_v60 = vmul.f32 %v1931_v49, %v6884_v21 }
 0x2dd   : > { %v2014_v61 = vmul.f32 %v1931_v49, %v6869_v55  ;;  %v1940_v62 = vmul.f32 %v1903_v52, %v6793_v3  ;;  %v1941_v63 = vmul.f32 %v1907_v53, %v6797_v6  ;;  %v1942_v0 = vmul.f32 %v1911_v56, %v6795_v5  ;;  %v5477_v49 = vld [vmem:[%s6505_s18 + $0x220] ss:$16 sps:$4 sm:$0xff]  }
 0x2de   : > { %v1958_v1 = vcombine.low %v1944_v58, %v1945_v59  ;;  %v1959_v2 = vcombine.low %v1946_v27, %v1947_v60  ;;  %v1943_v4 = vmul.f32 %v1915_v57, %v6803_v10  ;;  %v2008_v17 = vmul.f32 %v1907_v53, %v6770_v32  ;;  %v5481_v53 = vld [vmem:[%s6505_s18 + $0x244] ss:$16 sps:$4 sm:$0xff]   ;;  %v5486_v58 = vld [vmem:[%s6505_s18 + $0x248] ss:$16 sps:$4 sm:$0xff]   ;;  %v5490_v27 = vld [vmem:[%s6505_s18 + $0x26c] ss:$16 sps:$4 sm:$0xff]  }
 0x2df   : > { %v1956_v7 = vcombine.low %v1940_v62, %v1941_v63  ;;  %v2007_v19 = vmul.f32 %v1903_v52, %v6765_v28  ;;  %v2010_v20 = vmul.f32 %v1915_v57, %v6774_v35  ;;  %v2009_v55 = vmul.f32 %v1911_v56, %v6768_v31  ;;  %v5480_v52 = vld [vmem:[%s6505_s18 + $0x228] ss:$16 sps:$4 sm:$0xff]   ;;  %v5484_v56 = vld [vmem:[%s6505_s18 + $0x24c] ss:$16 sps:$4 sm:$0xff]   ;;  %v5483_v57 = vld [vmem:[%s6505_s18 + $0x240] ss:$16 sps:$4 sm:$0xff]  }
 0x2e0   : > { %v1980_v3 = vrot.slane %v1958_v1, %v6847_v39  ;;  %v1987_v6 = vrot.slane %v1959_v2, %v6847_v39  ;;  %v1957_v21 = vcombine.low %v1942_v0, %v1943_v4  ;;  %v2012_v5 = vmul.f32 %v1923_v46, %v6865_v51  ;;  %v5478_v46 = vld [vmem:[%s6505_s18 + $0x22c] ss:$16 sps:$4 sm:$0xff]   ;;  %v5487_v59 = vld [vmem:[%s6505_s18 + $0x264] ss:$16 sps:$4 sm:$0xff]   ;;  %v5489_v60 = vld [vmem:[%s6505_s18 + $0x260] ss:$16 sps:$4 sm:$0xff]  }
 0x2e1   : > { %v1966_v8 = vrot.slane %v1956_v7, %v6847_v39  ;;  %v2011_v10 = vmul.f32 %v1919_v43, %v6860_v48  ;;  %v2013_v32 = vmul.f32 %v1927_v30, %v6863_v50  ;;  %v5475_v43 = vld [vmem:[%s6505_s18 + $0x224] ss:$16 sps:$4 sm:$0xff]   ;;  %v5496_v63 = vld [vmem:[%s6505_s18 + $0x28c] ss:$16 sps:$4 sm:$0xff]   ;;  %v5495_v0 = vld [vmem:[%s6505_s18 + $0x280] ss:$16 sps:$4 sm:$0xff]  }
 0x2e2   : > { %v1989_v9 = vcombine.low %v1980_v3, %v1987_v6  ;;  %v1973_v28 = vrot.slane %v1957_v21, %v6847_v39  ;;  %v5493_v62 = vld [vmem:[%s6505_s18 + $0x284] ss:$16 sps:$4 sm:$0xff]   ;;  %v5498_v1 = vld [vmem:[%s6505_s18 + $0x288] ss:$16 sps:$4 sm:$0xff]   ;;  %v5502_v4 = vld [vmem:[%s6505_s18 + $0x2ac] ss:$16 sps:$4 sm:$0xff]  }
 0x2e3   : > { %v5499_v2 = vld [vmem:[%s6505_s18 + $0x2a4] ss:$16 sps:$4 sm:$0xff]   ;;  %v5504_v7 = vld [vmem:[%s6505_s18 + $0x2a8] ss:$16 sps:$4 sm:$0xff]   ;;  %v5514_v21 = vld [vmem:[%s6505_s18 + $0x2ec] ss:$16 sps:$4 sm:$0xff]  }
 0x2e4   : > { %v2003_v35 = vrot.slane %v1989_v9, %v6847_v39  ;;  %v1988_v11 = vcombine.low %v1966_v8, %v1973_v28  ;;  %v5510_v3 = vld [vmem:[%s6505_s18 + $0x2c8] ss:$16 sps:$4 sm:$0xff]   ;;  %v5511_v6 = vld [vmem:[%s6505_s18 + $0x2e4] ss:$16 sps:$4 sm:$0xff]   ;;  %v5519_v9 = vld [vmem:[%s6505_s18 + $0x300] ss:$16 sps:$4 sm:$0xff]  }
 0x2e5   : > { %v5516_v8 = vld [vmem:[%s6505_s18 + $0x2e8] ss:$16 sps:$4 sm:$0xff]  }
 0x2e6   : > { %v1996_v31 = vrot.slane %v1988_v11, %v6847_v39  ;;  %v5522_v28 = vld [vmem:[%s6505_s18 + $0x308] ss:$16 sps:$4 sm:$0xff]   ;;  %v5526_v11 = vld [vmem:[%s6505_s18 + $0x32c] ss:$16 sps:$4 sm:$0xff]  }
 0x2e8   : > { %v2004_v13 = vcombine.low %v1996_v31, %v2003_v35  ;;  %v5523_v35 = vld [vmem:[%s6505_s18 + $0x324] ss:$16 sps:$4 sm:$0xff]   ;;  %v5525_v31 = vld [vmem:[%s6505_s18 + $0x320] ss:$16 sps:$4 sm:$0xff]  }
 0x2ea   : > { %v2006_v14 = vsub.f32 %v1898_v12, %v2004_v13  ;;  %v5528_v12 = vld [vmem:[%s6505_s18 + $0x328] ss:$16 sps:$4 sm:$0xff]   ;;  %v5529_v13 = vld [vmem:[%s6505_s18 + $0x344] ss:$16 sps:$4 sm:$0xff]  }
 0x2ec   : > { %v2023_v16 = vrot.slane %v2006_v14, %v6908_v54  ;;  %v2019_v51 = vrot.slane %v2006_v14, %v6905_v42  ;;  %v2031_v48 = vrot.slane %v2006_v14, %v6914_v45  ;;  %v2027_v50 = vrot.slane %v2006_v14, %v6911_v44 }
 0x2ed   : > { %v2039_v18 = vrot.slane %v2006_v14, %v1922_v38  ;;  %v2035_v15 = vrot.slane %v2006_v14, %v1918_v36  ;;  %v2047_v22 = vrot.slane %v2006_v14, %v1930_v41  ;;  %v2043_v23 = vrot.slane %v2006_v14, %v1926_v40  ;;  %v5471_v38 = vld [vmem:[%s6505_s18 + $0x200] ss:$16 sps:$4 sm:$0xff]   ;;  %v5474_v40 = vld [vmem:[%s6505_s18 + $0x208] ss:$16 sps:$4 sm:$0xff]   ;;  %v5532_v14 = vld [vmem:[%s6505_s18 + $0x34c] ss:$16 sps:$4 sm:$0xff]  }
 0x2ee   : > { %v2057_v24 = vadd.f32 %v2023_v16, %v2008_v17  ;;  %v2056_v25 = vadd.f32 %v2019_v51, %v2007_v19  ;;  %v2059_v26 = vadd.f32 %v2031_v48, %v2010_v20  ;;  %v6947_v29 = vadd.f32 %v2027_v50, %v2009_v55  ;;  %v5501_v17 = vld [vmem:[%s6505_s18 + $0x2a0] ss:$16 sps:$4 sm:$0xff]   ;;  %v5505_v19 = vld [vmem:[%s6505_s18 + $0x2c4] ss:$16 sps:$4 sm:$0xff]   ;;  %v5508_v20 = vld [vmem:[%s6505_s18 + $0x2cc] ss:$16 sps:$4 sm:$0xff]  }
 0x2ef   : > { %v6949_v33 = vadd.f32 %v2039_v18, %v2012_v5  ;;  %v6951_v34 = vadd.f32 %v2035_v15, %v2011_v10  ;;  %v6953_v37 = vadd.f32 %v2047_v22, %v2014_v61  ;;  %v6955_v47 = vadd.f32 %v2043_v23, %v2013_v32  ;;  %v5492_v61 = vld [vmem:[%s6505_s18 + $0x268] ss:$16 sps:$4 sm:$0xff]   ;;  %v5507_v55 = vld [vmem:[%s6505_s18 + $0x2c0] ss:$16 sps:$4 sm:$0xff]   ;;  %v5517_v10 = vld [vmem:[%s6505_s18 + $0x304] ss:$16 sps:$4 sm:$0xff]  }
 0x2f0   : > { %v2065_v36 = vmax.f32 %v2057_v24, 0.0  ;;  %v2064_v41 = vmax.f32 %v2056_v25, 0.0  ;;  %v2067_v30 = vmax.f32 %v2059_v26, 0.0  ;;  %v5513_v5 = vld [vmem:[%s6505_s18 + $0x2e0] ss:$16 sps:$4 sm:$0xff]  }
 0x2f1   : > { %v5520_v32 = vld [vmem:[%s6505_s18 + $0x30c] ss:$16 sps:$4 sm:$0xff]   ;;  %v5531_v16 = vld [vmem:[%s6505_s18 + $0x340] ss:$16 sps:$4 sm:$0xff]   ;;  %v5534_v51 = vld [vmem:[%s6505_s18 + $0x348] ss:$16 sps:$4 sm:$0xff]  }
 0x2f2   : > { %2908 = vmatprep.mubr.f32.mxu0 %v2065_v36  ;;  %3192 = vmatprep.mubr.f32.mxu1 %v2065_v36  ;;  %v5535_v48 = vld [vmem:[%s6505_s18 + $0x364] ss:$16 sps:$4 sm:$0xff]   ;;  %v5538_v50 = vld [vmem:[%s6505_s18 + $0x36c] ss:$16 sps:$4 sm:$0xff]   ;;  %v5537_v18 = vld [vmem:[%s6505_s18 + $0x360] ss:$16 sps:$4 sm:$0xff]  }
 0x2f3   : > { %2909 = vmatmul.mubr.f32.vlgmr.msra.gmra.mrb[4].mxu0 %v2064_v41  ;;  %3193 = vmatmul.mubr.f32.vlgmr.msra.gmra.mrb[4].mxu1 %v2064_v41  ;;  %v5540_v15 = vld [vmem:[%s6505_s18 + $0x368] ss:$16 sps:$4 sm:$0xff]   ;;  %v5541_v22 = vld [vmem:[%s6505_s18 + $0x384] ss:$16 sps:$4 sm:$0xff]   ;;  %v5544_v23 = vld [vmem:[%s6505_s18 + $0x38c] ss:$16 sps:$4 sm:$0xff]  }
 0x2f4   : > { %4328 = vmatpush1.bf16.msra.mxu0 %v5471_v38  ;;  %4584 = vmatpush1.bf16.msra.mxu1 %v5474_v40  ;;  %v5543_v24 = vld [vmem:[%s6505_s18 + $0x380] ss:$16 sps:$4 sm:$0xff]   ;;  %v5546_v25 = vld [vmem:[%s6505_s18 + $0x388] ss:$16 sps:$4 sm:$0xff]   ;;  %v5547_v26 = vld [vmem:[%s6505_s18 + $0x3a4] ss:$16 sps:$4 sm:$0xff]  }
 0x2f5   : > { %2979 = vmatprep.mubr.f32.mxu0 %v2067_v30  ;;  %3263 = vmatprep.mubr.f32.mxu1 %v2067_v30  ;;  %v5550_v36 = vld [vmem:[%s6505_s18 + $0x3ac] ss:$16 sps:$4 sm:$0xff]   ;;  %v5549_v38 = vld [vmem:[%s6505_s18 + $0x3a0] ss:$16 sps:$4 sm:$0xff]   ;;  %v5552_v40 = vld [vmem:[%s6505_s18 + $0x3a8] ss:$16 sps:$4 sm:$0xff]  }
 0x2f6   : > { %4330 = vmatprep.subr.bf16.mxu0 %v5475_v43  ;;  %4586 = vmatprep.subr.bf16.mxu1 %v5478_v46  ;;  %v5553_v41 = vld [vmem:[%s6505_s18 + $0x3c4] ss:$16 sps:$4 sm:$0xff]   ;;  %v5556_v43 = vld [vmem:[%s6505_s18 + $0x3cc] ss:$16 sps:$4 sm:$0xff]   ;;  %v5555_v46 = vld [vmem:[%s6505_s18 + $0x3c0] ss:$16 sps:$4 sm:$0xff]  }
 0x2f7   : > { %v5558_v30 = vld [vmem:[%s6505_s18 + $0x3c8] ss:$16 sps:$4 sm:$0xff]  }
 0x2f8   : > { %4332 = vmatpush1.bf16.msra.mxu0 %v5477_v49  ;;  %4588 = vmatpush1.bf16.msra.mxu1 %v5480_v52  ;;  %v5559_v49 = vld [vmem:[%s6505_s18 + $0x3e4] ss:$16 sps:$4 sm:$0xff]   ;;  %v5562_v52 = vld [vmem:[%s6505_s18 + $0x3ec] ss:$16 sps:$4 sm:$0xff]  }
 0x2f9   : > { %4334 = vmatprep.subr.bf16.mxu0 %v5481_v53  ;;  %4590 = vmatprep.subr.bf16.mxu1 %v5484_v56  ;;  %v5561_v53 = vld [vmem:[%s6505_s18 + $0x3e0] ss:$16 sps:$4 sm:$0xff]   ;;  %v5564_v56 = vld [vmem:[%s6505_s18 + $0x3e8] ss:$16 sps:$4 sm:$0xff]  }
 0x2fc   : > { %4336 = vmatpush1.bf16.msra.mxu0 %v5483_v57  ;;  %4592 = vmatpush1.bf16.msra.mxu1 %v5486_v58  ;;  %v5565_v57 = vld [vmem:[%s6505_s18 + $0x404] ss:$16 sps:$4 sm:$0xff]   ;;  %v5568_v58 = vld [vmem:[%s6505_s18 + $0x40c] ss:$16 sps:$4 sm:$0xff]  }
 0x2fd   : > { %4338 = vmatprep.subr.bf16.mxu0 %v5487_v59  ;;  %4594 = vmatprep.subr.bf16.mxu1 %v5490_v27  ;;  %v5567_v59 = vld [vmem:[%s6505_s18 + $0x400] ss:$16 sps:$4 sm:$0xff]   ;;  %v2066_v27 = vmax.f32 %v6947_v29, 0.0  ;;  %v5576_v29 = vld [vmem:[%s6505_s18 + $0x428] ss:$16 sps:$4 sm:$0xff]  }
 0x300   : > { %4340 = vmatpush1.bf16.msra.mxu0 %v5489_v60  ;;  %4596 = vmatpush1.bf16.msra.mxu1 %v5492_v61  ;;  %v5570_v60 = vld [vmem:[%s6505_s18 + $0x408] ss:$16 sps:$4 sm:$0xff]   ;;  %v2069_v61 = vmax.f32 %v6949_v33, 0.0  ;;  %v5580_v33 = vld [vmem:[%s6505_s18 + $0x44c] ss:$16 sps:$4 sm:$0xff]  }
 0x301   : > { %4342 = vmatprep.subr.bf16.mxu0 %v5493_v62  ;;  %4598 = vmatprep.subr.bf16.mxu1 %v5496_v63  ;;  %v5571_v62 = vld [vmem:[%s6505_s18 + $0x424] ss:$16 sps:$4 sm:$0xff]   ;;  %v5574_v63 = vld [vmem:[%s6505_s18 + $0x42c] ss:$16 sps:$4 sm:$0xff]  }
 0x304   : > { %4344 = vmatpush1.bf16.msra.mxu0 %v5495_v0  ;;  %4600 = vmatpush1.bf16.msra.mxu1 %v5498_v1  ;;  %v5573_v0 = vld [vmem:[%s6505_s18 + $0x420] ss:$16 sps:$4 sm:$0xff]   ;;  %v5577_v1 = vld [vmem:[%s6505_s18 + $0x444] ss:$16 sps:$4 sm:$0xff]  }
 0x305   : > { %4346 = vmatprep.subr.bf16.mxu0 %v5499_v2  ;;  %4602 = vmatprep.subr.bf16.mxu1 %v5502_v4  ;;  %v5579_v2 = vld [vmem:[%s6505_s18 + $0x440] ss:$16 sps:$4 sm:$0xff]   ;;  %v5582_v4 = vld [vmem:[%s6505_s18 + $0x448] ss:$16 sps:$4 sm:$0xff]  }
 0x308   : > { %4348 = vmatpush1.bf16.msra.mxu0 %v5501_v17  ;;  %4604 = vmatpush1.bf16.msra.mxu1 %v5504_v7  ;;  %v5583_v17 = vld [vmem:[%s6505_s18 + $0x464] ss:$16 sps:$4 sm:$0xff]   ;;  %v5586_v7 = vld [vmem:[%s6505_s18 + $0x46c] ss:$16 sps:$4 sm:$0xff]  }
 0x309   : > { %4350 = vmatprep.subr.bf16.mxu0 %v5505_v19  ;;  %4606 = vmatprep.subr.bf16.mxu1 %v5508_v20  ;;  %v5585_v19 = vld [vmem:[%s6505_s18 + $0x460] ss:$16 sps:$4 sm:$0xff]   ;;  %v5588_v20 = vld [vmem:[%s6505_s18 + $0x468] ss:$16 sps:$4 sm:$0xff]  }
 0x30c   : > { %4352 = vmatpush1.bf16.msra.mxu0 %v5507_v55  ;;  %4608 = vmatpush1.bf16.msra.mxu1 %v5510_v3  ;;  %v5589_v55 = vld [vmem:[%s6505_s18 + $0x484] ss:$16 sps:$4 sm:$0xff]   ;;  %v5592_v3 = vld [vmem:[%s6505_s18 + $0x48c] ss:$16 sps:$4 sm:$0xff]  }
 0x30d   : > { %4354 = vmatprep.subr.bf16.mxu0 %v5511_v6  ;;  %4610 = vmatprep.subr.bf16.mxu1 %v5514_v21  ;;  %v5591_v6 = vld [vmem:[%s6505_s18 + $0x480] ss:$16 sps:$4 sm:$0xff]   ;;  %v5594_v21 = vld [vmem:[%s6505_s18 + $0x488] ss:$16 sps:$4 sm:$0xff]  }
 0x310   : > { %4356 = vmatpush1.bf16.msra.mxu0 %v5513_v5  ;;  %4612 = vmatpush1.bf16.msra.mxu1 %v5516_v8  ;;  %v5595_v5 = vld [vmem:[%s6505_s18 + $0x4a4] ss:$16 sps:$4 sm:$0xff]   ;;  %v5598_v8 = vld [vmem:[%s6505_s18 + $0x4ac] ss:$16 sps:$4 sm:$0xff]  }
 0x311   : > { %4358 = vmatprep.subr.bf16.mxu0 %v5517_v10  ;;  %4614 = vmatprep.subr.bf16.mxu1 %v5520_v32  ;;  %v5597_v10 = vld [vmem:[%s6505_s18 + $0x4a0] ss:$16 sps:$4 sm:$0xff]   ;;  %v5600_v32 = vld [vmem:[%s6505_s18 + $0x4a8] ss:$16 sps:$4 sm:$0xff]  }
 0x314   : > { %4360 = vmatpush1.bf16.msra.mxu0 %v5519_v9  ;;  %4616 = vmatpush1.bf16.msra.mxu1 %v5522_v28  ;;  %v5601_v9 = vld [vmem:[%s6505_s18 + $0x4c4] ss:$16 sps:$4 sm:$0xff]   ;;  %v5604_v28 = vld [vmem:[%s6505_s18 + $0x4cc] ss:$16 sps:$4 sm:$0xff]  }
 0x315   : > { %4362 = vmatprep.subr.bf16.mxu0 %v5523_v35  ;;  %4618 = vmatprep.subr.bf16.mxu1 %v5526_v11  ;;  %v5603_v35 = vld [vmem:[%s6505_s18 + $0x4c0] ss:$16 sps:$4 sm:$0xff]   ;;  %v5606_v11 = vld [vmem:[%s6505_s18 + $0x4c8] ss:$16 sps:$4 sm:$0xff]  }
 0x318   : > { %4364 = vmatpush1.bf16.msra.mxu0 %v5525_v31  ;;  %4620 = vmatpush1.bf16.msra.mxu1 %v5528_v12  ;;  %v5607_v31 = vld [vmem:[%s6505_s18 + $0x4e4] ss:$16 sps:$4 sm:$0xff]   ;;  %v5610_v12 = vld [vmem:[%s6505_s18 + $0x4ec] ss:$16 sps:$4 sm:$0xff]  }
 0x319   : > { %4366 = vmatprep.subr.bf16.mxu0 %v5529_v13  ;;  %4622 = vmatprep.subr.bf16.mxu1 %v5532_v14  ;;  %v5609_v13 = vld [vmem:[%s6505_s18 + $0x4e0] ss:$16 sps:$4 sm:$0xff]   ;;  %v5612_v14 = vld [vmem:[%s6505_s18 + $0x4e8] ss:$16 sps:$4 sm:$0xff]  }
 0x31c   : > { %4368 = vmatpush1.bf16.msra.mxu0 %v5531_v16  ;;  %4624 = vmatpush1.bf16.msra.mxu1 %v5534_v51  ;;  %v5613_v16 = vld [vmem:[%s6505_s18 + $0x504] ss:$16 sps:$4 sm:$0xff]   ;;  %v5616_v51 = vld [vmem:[%s6505_s18 + $0x50c] ss:$16 sps:$4 sm:$0xff]  }
 0x31d   : > { %4370 = vmatprep.subr.bf16.mxu0 %v5535_v48  ;;  %4626 = vmatprep.subr.bf16.mxu1 %v5538_v50  ;;  %v5615_v48 = vld [vmem:[%s6505_s18 + $0x500] ss:$16 sps:$4 sm:$0xff]   ;;  %v5618_v50 = vld [vmem:[%s6505_s18 + $0x508] ss:$16 sps:$4 sm:$0xff]  }
 0x320   : > { %4372 = vmatpush1.bf16.msra.mxu0 %v5537_v18  ;;  %4628 = vmatpush1.bf16.msra.mxu1 %v5540_v15  ;;  %v5619_v18 = vld [vmem:[%s6505_s18 + $0x524] ss:$16 sps:$4 sm:$0xff]   ;;  %v5622_v15 = vld [vmem:[%s6505_s18 + $0x52c] ss:$16 sps:$4 sm:$0xff]  }
 0x321   : > { %4374 = vmatprep.subr.bf16.mxu0 %v5541_v22  ;;  %4630 = vmatprep.subr.bf16.mxu1 %v5544_v23  ;;  %v5621_v22 = vld [vmem:[%s6505_s18 + $0x520] ss:$16 sps:$4 sm:$0xff]   ;;  %v5624_v23 = vld [vmem:[%s6505_s18 + $0x528] ss:$16 sps:$4 sm:$0xff]  }
 0x324   : > { %4376 = vmatpush1.bf16.msra.mxu0 %v5543_v24  ;;  %4632 = vmatpush1.bf16.msra.mxu1 %v5546_v25  ;;  %v5625_v24 = vld [vmem:[%s6505_s18 + $0x544] ss:$16 sps:$4 sm:$0xff]   ;;  %v5628_v25 = vld [vmem:[%s6505_s18 + $0x54c] ss:$16 sps:$4 sm:$0xff]  }
 0x325   : > { %4378 = vmatprep.subr.bf16.mxu0 %v5547_v26  ;;  %4634 = vmatprep.subr.bf16.mxu1 %v5550_v36  ;;  %v5627_v26 = vld [vmem:[%s6505_s18 + $0x540] ss:$16 sps:$4 sm:$0xff]   ;;  %v5630_v36 = vld [vmem:[%s6505_s18 + $0x548] ss:$16 sps:$4 sm:$0xff]  }
 0x328   : > { %4380 = vmatpush1.bf16.msra.mxu0 %v5549_v38  ;;  %4636 = vmatpush1.bf16.msra.mxu1 %v5552_v40  ;;  %v5631_v38 = vld [vmem:[%s6505_s18 + $0x564] ss:$16 sps:$4 sm:$0xff]   ;;  %v5634_v40 = vld [vmem:[%s6505_s18 + $0x56c] ss:$16 sps:$4 sm:$0xff]  }
 0x329   : > { %4382 = vmatprep.subr.bf16.mxu0 %v5553_v41  ;;  %4638 = vmatprep.subr.bf16.mxu1 %v5556_v43  ;;  %v5633_v41 = vld [vmem:[%s6505_s18 + $0x560] ss:$16 sps:$4 sm:$0xff]   ;;  %v5636_v43 = vld [vmem:[%s6505_s18 + $0x568] ss:$16 sps:$4 sm:$0xff]  }
 0x32c   : > { %4384 = vmatpush1.bf16.msra.mxu0 %v5555_v46  ;;  %4640 = vmatpush1.bf16.msra.mxu1 %v5558_v30  ;;  %v5637_v46 = vld [vmem:[%s6505_s18 + $0x584] ss:$16 sps:$4 sm:$0xff]   ;;  %v5640_v30 = vld [vmem:[%s6505_s18 + $0x58c] ss:$16 sps:$4 sm:$0xff]  }
 0x32d   : > { %4386 = vmatprep.subr.bf16.mxu0 %v5559_v49  ;;  %4642 = vmatprep.subr.bf16.mxu1 %v5562_v52  ;;  %v5639_v49 = vld [vmem:[%s6505_s18 + $0x580] ss:$16 sps:$4 sm:$0xff]   ;;  %v5642_v52 = vld [vmem:[%s6505_s18 + $0x588] ss:$16 sps:$4 sm:$0xff]  }
 0x330   : > { %4388 = vmatpush1.bf16.msra.mxu0 %v5561_v53  ;;  %4644 = vmatpush1.bf16.msra.mxu1 %v5564_v56  ;;  %v5643_v53 = vld [vmem:[%s6505_s18 + $0x5a4] ss:$16 sps:$4 sm:$0xff]   ;;  %v5646_v56 = vld [vmem:[%s6505_s18 + $0x5ac] ss:$16 sps:$4 sm:$0xff]  }
 0x331   : > { %4390 = vmatprep.subr.bf16.mxu0 %v5565_v57  ;;  %4646 = vmatprep.subr.bf16.mxu1 %v5568_v58  ;;  %v5645_v57 = vld [vmem:[%s6505_s18 + $0x5a0] ss:$16 sps:$4 sm:$0xff]   ;;  %v5648_v58 = vld [vmem:[%s6505_s18 + $0x5a8] ss:$16 sps:$4 sm:$0xff]  }
 0x333   : > { %2980 = vmatmul.mubr.f32.vlgmr.msra.gmra.mrb[4].mxu0 %v2066_v27  ;;  %3264 = vmatmul.mubr.f32.vlgmr.msra.gmra.mrb[4].mxu1 %v2066_v27  ;;  %v5652_v27 = vld [vmem:[%s6505_s18 + $0x5cc] ss:$16 sps:$4 sm:$0xff]  }
 0x334   : > { %4392 = vmatpush1.bf16.msra.mxu0 %v5567_v59  ;;  %3050 = vmatprep.mubr.f32.mxu0 %v2069_v61  ;;  %v5649_v59 = vld [vmem:[%s6505_s18 + $0x5c4] ss:$16 sps:$4 sm:$0xff]  }
 0x335   : > { %4648 = vmatpush1.bf16.msra.mxu1 %v5570_v60  ;;  %3334 = vmatprep.mubr.f32.mxu1 %v2069_v61  ;;  %v5651_v60 = vld [vmem:[%s6505_s18 + $0x5c0] ss:$16 sps:$4 sm:$0xff]   ;;  %v5654_v61 = vld [vmem:[%s6505_s18 + $0x5c8] ss:$16 sps:$4 sm:$0xff]  }
 0x336   : > { %4394 = vmatprep.subr.bf16.mxu0 %v5571_v62  ;;  %4650 = vmatprep.subr.bf16.mxu1 %v5574_v63  ;;  %v5655_v62 = vld [vmem:[%s6505_s18 + $0x5e4] ss:$16 sps:$4 sm:$0xff]   ;;  %v5658_v63 = vld [vmem:[%s6505_s18 + $0x5ec] ss:$16 sps:$4 sm:$0xff]  }
 0x338   : > { %4396 = vmatpush1.bf16.msra.mxu0 %v5573_v0  ;;  %v5657_v0 = vld [vmem:[%s6505_s18 + $0x5e0] ss:$16 sps:$4 sm:$0xff]  }
 0x339   : > { %4652 = vmatpush1.bf16.msra.mxu1 %v5576_v29  ;;  %4398 = vmatprep.subr.bf16.mxu0 %v5577_v1  ;;  %v5660_v29 = vld [vmem:[%s6505_s18 + $0x5e8] ss:$16 sps:$4 sm:$0xff]   ;;  %v5661_v1 = vld [vmem:[%s6505_s18 + $0x604] ss:$16 sps:$4 sm:$0xff]  }
 0x33a   : > { %4654 = vmatprep.subr.bf16.mxu1 %v5580_v33  ;;  %v5664_v33 = vld [vmem:[%s6505_s18 + $0x60c] ss:$16 sps:$4 sm:$0xff]  }
 0x33c   : > { %4400 = vmatpush1.bf16.msra.mxu0 %v5579_v2  ;;  %v5663_v2 = vld [vmem:[%s6505_s18 + $0x600] ss:$16 sps:$4 sm:$0xff]  }
 0x33d   : > { %4656 = vmatpush1.bf16.msra.mxu1 %v5582_v4  ;;  %4402 = vmatprep.subr.bf16.mxu0 %v5583_v17  ;;  %v2068_v4 = vmax.f32 %v6951_v34, 0.0  ;;  %v5666_v17 = vld [vmem:[%s6505_s18 + $0x608] ss:$16 sps:$4 sm:$0xff]  }
 0x33e   : > { %4658 = vmatprep.subr.bf16.mxu1 %v5586_v7  ;;  %v5667_v7 = vld [vmem:[%s6505_s18 + $0x624] ss:$16 sps:$4 sm:$0xff]   ;;  %v5672_v34 = vld [vmem:[%s6505_s18 + $0x628] ss:$16 sps:$4 sm:$0xff]  }
 0x340   : > { %4404 = vmatpush1.bf16.msra.mxu0 %v5585_v19  ;;  %v2071_v19 = vmax.f32 %v6953_v37, 0.0  ;;  %v5675_v37 = vld [vmem:[%s6505_s18 + $0x640] ss:$16 sps:$4 sm:$0xff]  }
 0x341   : > { %4660 = vmatpush1.bf16.msra.mxu1 %v5588_v20  ;;  %4406 = vmatprep.subr.bf16.mxu0 %v5589_v55  ;;  %v5670_v20 = vld [vmem:[%s6505_s18 + $0x62c] ss:$16 sps:$4 sm:$0xff]   ;;  %v5669_v55 = vld [vmem:[%s6505_s18 + $0x620] ss:$16 sps:$4 sm:$0xff]  }
 0x342   : > { %4662 = vmatprep.subr.bf16.mxu1 %v5592_v3  ;;  %v5673_v3 = vld [vmem:[%s6505_s18 + $0x644] ss:$16 sps:$4 sm:$0xff]  }
 0x344   : > { %4408 = vmatpush1.bf16.msra.mxu0 %v5591_v6  ;;  %v5676_v6 = vld [vmem:[%s6505_s18 + $0x64c] ss:$16 sps:$4 sm:$0xff]  }
 0x345   : > { %4664 = vmatpush1.bf16.msra.mxu1 %v5594_v21  ;;  %4410 = vmatprep.subr.bf16.mxu0 %v5595_v5  ;;  %v5678_v21 = vld [vmem:[%s6505_s18 + $0x648] ss:$16 sps:$4 sm:$0xff]   ;;  %v5679_v5 = vld [vmem:[%s6505_s18 + $0x664] ss:$16 sps:$4 sm:$0xff]  }
 0x346   : > { %4666 = vmatprep.subr.bf16.mxu1 %v5598_v8  ;;  %v5682_v8 = vld [vmem:[%s6505_s18 + $0x66c] ss:$16 sps:$4 sm:$0xff]  }
 0x348   : > { %4412 = vmatpush1.bf16.msra.mxu0 %v5597_v10  ;;  %v5681_v10 = vld [vmem:[%s6505_s18 + $0x660] ss:$16 sps:$4 sm:$0xff]  }
 0x349   : > { %4668 = vmatpush1.bf16.msra.mxu1 %v5600_v32  ;;  %4414 = vmatprep.subr.bf16.mxu0 %v5601_v9  ;;  %v5684_v32 = vld [vmem:[%s6505_s18 + $0x668] ss:$16 sps:$4 sm:$0xff]   ;;  %v5685_v9 = vld [vmem:[%s6505_s18 + $0x684] ss:$16 sps:$4 sm:$0xff]  }
 0x34a   : > { %4670 = vmatprep.subr.bf16.mxu1 %v5604_v28  ;;  %v5688_v28 = vld [vmem:[%s6505_s18 + $0x68c] ss:$16 sps:$4 sm:$0xff]  }
 0x34c   : > { %4416 = vmatpush1.bf16.msra.mxu0 %v5603_v35  ;;  %v5687_v35 = vld [vmem:[%s6505_s18 + $0x680] ss:$16 sps:$4 sm:$0xff]  }
 0x34d   : > { %4672 = vmatpush1.bf16.msra.mxu1 %v5606_v11  ;;  %4418 = vmatprep.subr.bf16.mxu0 %v5607_v31  ;;  %v5690_v11 = vld [vmem:[%s6505_s18 + $0x688] ss:$16 sps:$4 sm:$0xff]   ;;  %v5691_v31 = vld [vmem:[%s6505_s18 + $0x6a4] ss:$16 sps:$4 sm:$0xff]  }
 0x34e   : > { %4674 = vmatprep.subr.bf16.mxu1 %v5610_v12  ;;  %v5694_v12 = vld [vmem:[%s6505_s18 + $0x6ac] ss:$16 sps:$4 sm:$0xff]  }
 0x350   : > { %4420 = vmatpush1.bf16.msra.mxu0 %v5609_v13  ;;  %v5693_v13 = vld [vmem:[%s6505_s18 + $0x6a0] ss:$16 sps:$4 sm:$0xff]  }
 0x351   : > { %4676 = vmatpush1.bf16.msra.mxu1 %v5612_v14  ;;  %4422 = vmatprep.subr.bf16.mxu0 %v5613_v16  ;;  %v5696_v14 = vld [vmem:[%s6505_s18 + $0x6a8] ss:$16 sps:$4 sm:$0xff]   ;;  %v5697_v16 = vld [vmem:[%s6505_s18 + $0x6c4] ss:$16 sps:$4 sm:$0xff]  }
 0x352   : > { %4678 = vmatprep.subr.bf16.mxu1 %v5616_v51  ;;  %v5700_v51 = vld [vmem:[%s6505_s18 + $0x6cc] ss:$16 sps:$4 sm:$0xff]  }
 0x354   : > { %4424 = vmatpush1.bf16.msra.mxu0 %v5615_v48  ;;  %v5699_v48 = vld [vmem:[%s6505_s18 + $0x6c0] ss:$16 sps:$4 sm:$0xff]  }
 0x355   : > { %4680 = vmatpush1.bf16.msra.mxu1 %v5618_v50  ;;  %4426 = vmatprep.subr.bf16.mxu0 %v5619_v18  ;;  %v5702_v50 = vld [vmem:[%s6505_s18 + $0x6c8] ss:$16 sps:$4 sm:$0xff]   ;;  %v5703_v18 = vld [vmem:[%s6505_s18 + $0x6e4] ss:$16 sps:$4 sm:$0xff]  }
 0x356   : > { %4682 = vmatprep.subr.bf16.mxu1 %v5622_v15  ;;  %v5706_v15 = vld [vmem:[%s6505_s18 + $0x6ec] ss:$16 sps:$4 sm:$0xff]  }
 0x358   : > { %4428 = vmatpush1.bf16.msra.mxu0 %v5621_v22  ;;  %v5705_v22 = vld [vmem:[%s6505_s18 + $0x6e0] ss:$16 sps:$4 sm:$0xff]  }
 0x359   : > { %4684 = vmatpush1.bf16.msra.mxu1 %v5624_v23  ;;  %4430 = vmatprep.subr.bf16.mxu0 %v5625_v24  ;;  %v5708_v23 = vld [vmem:[%s6505_s18 + $0x6e8] ss:$16 sps:$4 sm:$0xff]   ;;  %v5709_v24 = vld [vmem:[%s6505_s18 + $0x704] ss:$16 sps:$4 sm:$0xff]  }
 0x35a   : > { %4686 = vmatprep.subr.bf16.mxu1 %v5628_v25  ;;  %v5712_v25 = vld [vmem:[%s6505_s18 + $0x70c] ss:$16 sps:$4 sm:$0xff]  }
 0x35c   : > { %4432 = vmatpush1.bf16.msra.mxu0 %v5627_v26  ;;  %v5711_v26 = vld [vmem:[%s6505_s18 + $0x700] ss:$16 sps:$4 sm:$0xff]  }
 0x35d   : > { %4688 = vmatpush1.bf16.msra.mxu1 %v5630_v36  ;;  %4434 = vmatprep.subr.bf16.mxu0 %v5631_v38  ;;  %v5714_v36 = vld [vmem:[%s6505_s18 + $0x708] ss:$16 sps:$4 sm:$0xff]   ;;  %v5715_v38 = vld [vmem:[%s6505_s18 + $0x724] ss:$16 sps:$4 sm:$0xff]  }
 0x35e   : > { %4690 = vmatprep.subr.bf16.mxu1 %v5634_v40  ;;  %v5718_v40 = vld [vmem:[%s6505_s18 + $0x72c] ss:$16 sps:$4 sm:$0xff]  }
 0x360   : > { %4436 = vmatpush1.bf16.msra.mxu0 %v5633_v41  ;;  %v5717_v41 = vld [vmem:[%s6505_s18 + $0x720] ss:$16 sps:$4 sm:$0xff]  }
 0x361   : > { %4692 = vmatpush1.bf16.msra.mxu1 %v5636_v43  ;;  %4438 = vmatprep.subr.bf16.mxu0 %v5637_v46  ;;  %v5720_v43 = vld [vmem:[%s6505_s18 + $0x728] ss:$16 sps:$4 sm:$0xff]   ;;  %v5721_v46 = vld [vmem:[%s6505_s18 + $0x744] ss:$16 sps:$4 sm:$0xff]  }
 0x362   : > { %4694 = vmatprep.subr.bf16.mxu1 %v5640_v30  ;;  %v5724_v30 = vld [vmem:[%s6505_s18 + $0x74c] ss:$16 sps:$4 sm:$0xff]  }
 0x364   : > { %4440 = vmatpush1.bf16.msra.mxu0 %v5639_v49  ;;  %v5723_v49 = vld [vmem:[%s6505_s18 + $0x740] ss:$16 sps:$4 sm:$0xff]  }
 0x365   : > { %4696 = vmatpush1.bf16.msra.mxu1 %v5642_v52  ;;  %4442 = vmatprep.subr.bf16.mxu0 %v5643_v53  ;;  %v5726_v52 = vld [vmem:[%s6505_s18 + $0x748] ss:$16 sps:$4 sm:$0xff]   ;;  %v5727_v53 = vld [vmem:[%s6505_s18 + $0x764] ss:$16 sps:$4 sm:$0xff]  }
 0x366   : > { %4698 = vmatprep.subr.bf16.mxu1 %v5646_v56  ;;  %v5730_v56 = vld [vmem:[%s6505_s18 + $0x76c] ss:$16 sps:$4 sm:$0xff]  }
 0x368   : > { %4444 = vmatpush1.bf16.msra.mxu0 %v5645_v57  ;;  %v5729_v57 = vld [vmem:[%s6505_s18 + $0x760] ss:$16 sps:$4 sm:$0xff]  }
 0x369   : > { %4700 = vmatpush1.bf16.msra.mxu1 %v5648_v58  ;;  %4446 = vmatprep.subr.bf16.mxu0 %v5649_v59  ;;  %v5732_v58 = vld [vmem:[%s6505_s18 + $0x768] ss:$16 sps:$4 sm:$0xff]   ;;  %v5733_v59 = vld [vmem:[%s6505_s18 + $0x784] ss:$16 sps:$4 sm:$0xff]  }
 0x36a   : > { %4702 = vmatprep.subr.bf16.mxu1 %v5652_v27  ;;  %v5736_v27 = vld [vmem:[%s6505_s18 + $0x78c] ss:$16 sps:$4 sm:$0xff]  }
 0x36c   : > { %4448 = vmatpush1.bf16.msra.mxu0 %v5651_v60  ;;  %v5735_v60 = vld [vmem:[%s6505_s18 + $0x780] ss:$16 sps:$4 sm:$0xff]  }
 0x36d   : > { %4704 = vmatpush1.bf16.msra.mxu1 %v5654_v61  ;;  %4450 = vmatprep.subr.bf16.mxu0 %v5655_v62  ;;  %v5738_v61 = vld [vmem:[%s6505_s18 + $0x788] ss:$16 sps:$4 sm:$0xff]   ;;  %v5739_v62 = vld [vmem:[%s6505_s18 + $0x7a4] ss:$16 sps:$4 sm:$0xff]  }
 0x36e   : > { %4706 = vmatprep.subr.bf16.mxu1 %v5658_v63  ;;  %v5742_v63 = vld [vmem:[%s6505_s18 + $0x7ac] ss:$16 sps:$4 sm:$0xff]  }
 0x370   : > { %4452 = vmatpush1.bf16.msra.mxu0 %v5657_v0  ;;  %v5741_v0 = vld [vmem:[%s6505_s18 + $0x7a0] ss:$16 sps:$4 sm:$0xff]  }
 0x371   : > { %4708 = vmatpush1.bf16.msra.mxu1 %v5660_v29  ;;  %4454 = vmatprep.subr.bf16.mxu0 %v5661_v1  ;;  %v5744_v29 = vld [vmem:[%s6505_s18 + $0x7a8] ss:$16 sps:$4 sm:$0xff]   ;;  %v5745_v1 = vld [vmem:[%s6505_s18 + $0x7c4] ss:$16 sps:$4 sm:$0xff]  }
 0x372   : > { %4710 = vmatprep.subr.bf16.mxu1 %v5664_v33  ;;  %v5748_v33 = vld [vmem:[%s6505_s18 + $0x7cc] ss:$16 sps:$4 sm:$0xff]  }
 0x373   : > { %3051 = vmatmul.mubr.f32.vlgmr.msra.gmra.mrb[4].mxu0 %v2068_v4 }
 0x374   : > { %3335 = vmatmul.mubr.f32.vlgmr.msra.gmra.mrb[4].mxu1 %v2068_v4  ;;  %4456 = vmatpush1.bf16.msra.mxu0 %v5663_v2  ;;  %v5747_v2 = vld [vmem:[%s6505_s18 + $0x7c0] ss:$16 sps:$4 sm:$0xff]   ;;  %v5750_v4 = vld [vmem:[%s6505_s18 + $0x7c8] ss:$16 sps:$4 sm:$0xff]  }
 0x375   : > { %3121 = vmatprep.mubr.f32.mxu0 %v2071_v19  ;;  %4712 = vmatpush1.bf16.msra.mxu1 %v5666_v17  ;;  %v5751_v17 = vld [vmem:[%s6505_s18 + $0x7e4] ss:$16 sps:$4 sm:$0xff]  }
 0x376   : > { %3405 = vmatprep.mubr.f32.mxu1 %v2071_v19  ;;  %4458 = vmatprep.subr.bf16.mxu0 %v5667_v7  ;;  %v5754_v7 = vld [vmem:[%s6505_s18 + $0x7ec] ss:$16 sps:$4 sm:$0xff]   ;;  %v5753_v19 = vld [vmem:[%s6505_s18 + $0x7e0] ss:$16 sps:$4 sm:$0xff]  }
 0x377   : > { %4714 = vmatprep.subr.bf16.mxu1 %v5670_v20  ;;  %v5756_v20 = vld [vmem:[%s6505_s18 + $0x7e8] ss:$16 sps:$4 sm:$0xff]  }
 0x378   : > { %4460 = vmatpush1.bf16.msra.mxu0 %v5669_v55  ;;  %v2070_v55 = vmax.f32 %v6955_v47, 0.0 }
 0x379   : > { %4716 = vmatpush1.bf16.msra.mxu1 %v5672_v34  ;;  %4462 = vmatprep.subr.bf16.mxu0 %v5673_v3  ;;  %v2840_v34 = vld [vmem:[#allocation2] sm:$0xff]  ;;  %v2842_v3 = vld [vmem:[#allocation2 + $0x10] sm:$0xff] }
 0x37a   : > { %4718 = vmatprep.subr.bf16.mxu1 %v5676_v6  ;;  %v2841_v6 = vld [vmem:[#allocation2 + $0x8] sm:$0xff] }
 0x37c   : > { %4464 = vmatpush1.bf16.msra.mxu0 %v5675_v37 }
 0x37d   : > { %4720 = vmatpush1.bf16.msra.mxu1 %v5678_v21  ;;  %4466 = vmatprep.subr.bf16.mxu0 %v5679_v5  ;;  %v2843_v21 = vld [vmem:[#allocation2 + $0x18] sm:$0xff] }
 0x37e   : > { %4722 = vmatprep.subr.bf16.mxu1 %v5682_v8 }
 0x380   : > { %4468 = vmatpush1.bf16.msra.mxu0 %v5681_v10 }
 0x381   : > { %4724 = vmatpush1.bf16.msra.mxu1 %v5684_v32  ;;  %4470 = vmatprep.subr.bf16.mxu0 %v5685_v9 }
 0x382   : > { %4726 = vmatprep.subr.bf16.mxu1 %v5688_v28 }
 0x384   : > { %4472 = vmatpush1.bf16.msra.mxu0 %v5687_v35 }
 0x385   : > { %4728 = vmatpush1.bf16.msra.mxu1 %v5690_v11  ;;  %4474 = vmatprep.subr.bf16.mxu0 %v5691_v31 }
 0x386   : > { %4730 = vmatprep.subr.bf16.mxu1 %v5694_v12 }
 0x388   : > { %4476 = vmatpush1.bf16.msra.mxu0 %v5693_v13 }
 0x389   : > { %4732 = vmatpush1.bf16.msra.mxu1 %v5696_v14  ;;  %4478 = vmatprep.subr.bf16.mxu0 %v5697_v16 }
 0x38a   : > { %4734 = vmatprep.subr.bf16.mxu1 %v5700_v51 }
 0x38c   : > { %4480 = vmatpush1.bf16.msra.mxu0 %v5699_v48 }
 0x38d   : > { %4736 = vmatpush1.bf16.msra.mxu1 %v5702_v50  ;;  %4482 = vmatprep.subr.bf16.mxu0 %v5703_v18 }
 0x38e   : > { %4738 = vmatprep.subr.bf16.mxu1 %v5706_v15 }
 0x390   : > { %4484 = vmatpush1.bf16.msra.mxu0 %v5705_v22 }
 0x391   : > { %4740 = vmatpush1.bf16.msra.mxu1 %v5708_v23  ;;  %4486 = vmatprep.subr.bf16.mxu0 %v5709_v24 }
 0x392   : > { %4742 = vmatprep.subr.bf16.mxu1 %v5712_v25 }
 0x394   : > { %4488 = vmatpush1.bf16.msra.mxu0 %v5711_v26 }
 0x395   : > { %4744 = vmatpush1.bf16.msra.mxu1 %v5714_v36  ;;  %4490 = vmatprep.subr.bf16.mxu0 %v5715_v38 }
 0x396   : > { %4746 = vmatprep.subr.bf16.mxu1 %v5718_v40 }
 0x398   : > { %4492 = vmatpush1.bf16.msra.mxu0 %v5717_v41 }
 0x399   : > { %4748 = vmatpush1.bf16.msra.mxu1 %v5720_v43  ;;  %4494 = vmatprep.subr.bf16.mxu0 %v5721_v46 }
 0x39a   : > { %4750 = vmatprep.subr.bf16.mxu1 %v5724_v30 }
 0x39c   : > { %4496 = vmatpush1.bf16.msra.mxu0 %v5723_v49 }
 0x39d   : > { %4752 = vmatpush1.bf16.msra.mxu1 %v5726_v52  ;;  %4498 = vmatprep.subr.bf16.mxu0 %v5727_v53 }
 0x39e   : > { %4754 = vmatprep.subr.bf16.mxu1 %v5730_v56 }
 0x3a0   : > { %4500 = vmatpush1.bf16.msra.mxu0 %v5729_v57 }
 0x3a1   : > { %4756 = vmatpush1.bf16.msra.mxu1 %v5732_v58  ;;  %4502 = vmatprep.subr.bf16.mxu0 %v5733_v59 }
 0x3a2   : > { %4758 = vmatprep.subr.bf16.mxu1 %v5736_v27 }
 0x3a4   : > { %4504 = vmatpush1.bf16.msra.mxu0 %v5735_v60 }
 0x3a5   : > { %4760 = vmatpush1.bf16.msra.mxu1 %v5738_v61  ;;  %4506 = vmatprep.subr.bf16.mxu0 %v5739_v62 }
 0x3a6   : > { %4762 = vmatprep.subr.bf16.mxu1 %v5742_v63 }
 0x3a8   : > { %4508 = vmatpush1.bf16.msra.mxu0 %v5741_v0 }
 0x3a9   : > { %4764 = vmatpush1.bf16.msra.mxu1 %v5744_v29  ;;  %4510 = vmatprep.subr.bf16.mxu0 %v5745_v1 }
 0x3aa   : > { %4766 = vmatprep.subr.bf16.mxu1 %v5748_v33 }
 0x3ac   : > { %4512 = vmatpush1.bf16.msra.mxu0 %v5747_v2 }
 0x3ad   : > { %4768 = vmatpush1.bf16.msra.mxu1 %v5750_v4  ;;  %4514 = vmatprep.subr.bf16.mxu0 %v5751_v17 }
 0x3ae   : > { %4770 = vmatprep.subr.bf16.mxu1 %v5754_v7 }
 0x3b0   : > { %4516 = vmatpush1.bf16.msra.mxu0 %v5753_v19 }
 0x3b1   : > { %4772 = vmatpush1.bf16.msra.mxu1 %v5756_v20 }
 0x3b3   : > { %3122 = vmatmul.mubr.f32.vlgmr.msra.gmra.mrb[4].mxu0 %v2070_v55 }
 0x3b4   : > { %3406 = vmatmul.mubr.f32.vlgmr.msra.gmra.mrb[4].mxu1 %v2070_v55 }
 0x485   : > { %3423 = sbr.rel (%p3870_p11) target bundleno = 1260 (0x4ec), region = 80 }
 0x486   : > { %v3123_v37 = vpop.f32.mrb[4].mxu0 }
 0x487   : > { %v3412_v5 = vadd.f32 %v3123_v37, %v2840_v34  ;;  %v3407_v8 = vpop.f32.mrb[4].mxu1  ;;  %v3125_v10 = vpop.f32.mrb[5].mxu0 }
 0x488   : > { %v3414_v32 = vadd.f32 %v3407_v8, %v2842_v3  ;;  %v3413_v9 = vadd.f32 %v3125_v10, %v2841_v6  ;;  %v3409_v28 = vpop.f32.mrb[5].mxu1 }
 0x489   : > { %3416 = vst [vmem:[#allocation2] sm:$0xff] %v3412_v5  ;;  %v3415_v35 = vadd.f32 %v3409_v28, %v2843_v21 }
 0x48a   : > { %3418 = vst [vmem:[#allocation2 + $0x10] sm:$0xff] %v3414_v32  ;;  %3417 = vst [vmem:[#allocation2 + $0x8] sm:$0xff] %v3413_v9 }
 0x48b   : > { %3419 = vst [vmem:[#allocation2 + $0x18] sm:$0xff] %v3415_v35 }
 0x490   : > { %v7153_v47 = vld [vmem:[#allocation2] sm:$0xff] }
 0x491   : > { %v7155_v11 = vld [vmem:[#allocation2 + $0x8] sm:$0xff]  ;;  %v7157_v31 = vld [vmem:[#allocation2 + $0x10] sm:$0xff]  ;;  %v3428_v13 = vrot.slane %v7153_v47, 4 }
 0x492   : > { %v7159_v12 = vld [vmem:[#allocation2 + $0x18] sm:$0xff]  ;;  %v3434_v14 = vrot.slane %v7155_v11, 4  ;;  %v3440_v16 = vrot.slane %v7157_v31, 4 }
 0x493   : > { %v3446_v51 = vrot.slane %v7159_v12, 4  ;;  %v3429_v48 = vadd.f32 %v3428_v13, %v7153_v47 }
 0x494   : > { %v3435_v50 = vadd.f32 %v3434_v14, %v7155_v11  ;;  %v3441_v18 = vadd.f32 %v3440_v16, %v7157_v31 }
 0x495   : > { %v3447_v15 = vadd.f32 %v3446_v51, %v7159_v12  ;;  %v3430_v22 = vrot.slane %v3429_v48, 2 }
 0x496   : > { %v3436_v23 = vrot.slane %v3435_v50, 2  ;;  %v3442_v24 = vrot.slane %v3441_v18, 2 }
 0x497   : > { %v3448_v25 = vrot.slane %v3447_v15, 2  ;;  %v3431_v26 = vadd.f32 %v3430_v22, %v3429_v48 }
 0x498   : > { %v3437_v36 = vadd.f32 %v3436_v23, %v3435_v50  ;;  %v3443_v38 = vadd.f32 %v3442_v24, %v3441_v18 }
 0x499   : > { %v3449_v40 = vadd.f32 %v3448_v25, %v3447_v15  ;;  %v3432_v41 = vrot.slane %v3431_v26, 1 }
 0x49a   : > { %v3438_v43 = vrot.slane %v3437_v36, 1  ;;  %v3444_v46 = vrot.slane %v3443_v38, 1 }
 0x49b   : > { %v3450_v30 = vrot.slane %v3449_v40, 1  ;;  %v3433_v49 = vadd.f32 %v3432_v41, %v3431_v26 }
 0x49c   : > { %v3439_v52 = vadd.f32 %v3438_v43, %v3437_v36  ;;  %v3445_v53 = vadd.f32 %v3444_v46, %v3443_v38 }
 0x49d   : > { %v3451_v56 = vadd.f32 %v3450_v30, %v3449_v40  ;;  %v7169_v57 = vmul.f32 0.125, %v3433_v49 }
 0x49e   : > { %v7171_v58 = vmul.f32 0.125, %v3439_v52  ;;  %v7173_v59 = vmul.f32 0.125, %v3445_v53  ;;  %v3492_v53 = vld [vmem:[%s454_s8] sm:$0xf] }
 0x49f   : > { %v7175_v27 = vmul.f32 0.125, %v3451_v56  ;;  %v3456_v60 = vsub.f32 %v7153_v47, %v7169_v57 }
 0x4a0   : > { %v3457_v61 = vsub.f32 %v7155_v11, %v7171_v58  ;;  %v3458_v62 = vsub.f32 %v7157_v31, %v7173_v59 }
 0x4a1   : > { %v3459_v63 = vsub.f32 %v7159_v12, %v7175_v27  ;;  %v3460_v0 = vmul.f32 %v3456_v60, %v3456_v60 }
 0x4a2   : > { %v3461_v29 = vmul.f32 %v3457_v61, %v3457_v61  ;;  %v3462_v1 = vmul.f32 %v3458_v62, %v3458_v62 }
 0x4a3   : > { %v3463_v33 = vmul.f32 %v3459_v63, %v3459_v63  ;;  %v3464_v2 = vrot.slane %v3460_v0, 4 }
 0x4a4   : > { %v3470_v4 = vrot.slane %v3461_v29, 4  ;;  %v3476_v17 = vrot.slane %v3462_v1, 4 }
 0x4a5   : > { %v3482_v7 = vrot.slane %v3463_v33, 4  ;;  %v3465_v19 = vadd.f32 %v3464_v2, %v3460_v0 }
 0x4a6   : > { %v3471_v20 = vadd.f32 %v3470_v4, %v3461_v29  ;;  %v3477_v55 = vadd.f32 %v3476_v17, %v3462_v1 }
 0x4a7   : > { %v3483_v34 = vadd.f32 %v3482_v7, %v3463_v33  ;;  %v3466_v3 = vrot.slane %v3465_v19, 2 }
 0x4a8   : > { %v3472_v6 = vrot.slane %v3471_v20, 2  ;;  %v3478_v37 = vrot.slane %v3477_v55, 2 }
 0x4a9   : > { %v3484_v21 = vrot.slane %v3483_v34, 2  ;;  %v3467_v5 = vadd.f32 %v3466_v3, %v3465_v19 }
 0x4aa   : > { %v3473_v8 = vadd.f32 %v3472_v6, %v3471_v20  ;;  %v3479_v10 = vadd.f32 %v3478_v37, %v3477_v55  ;;  %v3531_v55 = vld [vmem:[%s463_s2] sm:$0xf] }
 0x4ab   : > { %v3485_v32 = vadd.f32 %v3484_v21, %v3483_v34  ;;  %v3468_v9 = vrot.slane %v3467_v5, 1 }
 0x4ac   : > { %v3474_v28 = vrot.slane %v3473_v8, 1  ;;  %v3480_v35 = vrot.slane %v3479_v10, 1 }
 0x4ad   : > { %v3486_v13 = vrot.slane %v3485_v32, 1  ;;  %v3469_v14 = vadd.f32 %v3468_v9, %v3467_v5 }
 0x4ae   : > { %v3475_v16 = vadd.f32 %v3474_v28, %v3473_v8  ;;  %v3481_v51 = vadd.f32 %v3480_v35, %v3479_v10 }
 0x4af   : > { %v3487_v48 = vadd.f32 %v3486_v13, %v3485_v32  ;;  %v3488_v50 = vmul.f32 0.125, %v3469_v14 }
 0x4b0   : > { %v3489_v18 = vmul.f32 0.125, %v3475_v16  ;;  %v3490_v15 = vmul.f32 0.125, %v3481_v51 }
 0x4b1   : > { %v3491_v22 = vmul.f32 0.125, %v3487_v48  ;;  %v3493_v23 = vadd.f32 1e-05, %v3488_v50 }
 0x4b2   : > { %v3494_v24 = vadd.f32 1e-05, %v3489_v18  ;;  %v3495_v25 = vadd.f32 1e-05, %v3490_v15 }
 0x4b3   : > { %v3496_v26 = vadd.f32 1e-05, %v3491_v22  ;;  %5774 = vrsqrt.f32 %v3493_v23 }
 0x4b4   : > { %5776 = vrsqrt.f32 %v3494_v24 }
 0x4b5   : > { %5778 = vrsqrt.f32 %v3495_v25 }
 0x4b6   : > { %5780 = vrsqrt.f32 %v3496_v26 }
 0x4bd   : > { %v5775_v36 = vpop.eup %5774 }
 0x4be   : > { %v5777_v38 = vpop.eup %5776 }
 0x4bf   : > { %v5779_v40 = vpop.eup %5778  ;;  %v3505_v41 = vcombine.low %v5775_v36, %v5777_v38 }
 0x4c0   : > { %v5781_v43 = vpop.eup %5780 }
 0x4c1   : > { %v3506_v46 = vcombine.low %v5779_v40, %v5781_v43  ;;  %v3513_v30 = vrot.slane %v3505_v41, %v6847_v39 }
 0x4c3   : > { %v3520_v49 = vrot.slane %v3506_v46, %v6847_v39 }
 0x4c5   : > { %v3521_v52 = vcombine.low %v3513_v30, %v3520_v49 }
 0x4c7   : > { %v3528_v56 = vrot.slane %v3521_v52, %v6847_v39 }
 0x4c9   : > { %v3530_v60 = vmul.f32 %v3528_v56, %v3492_v53 }
 0x4cb   : > { %v3536_v61 = vrot.slane %v3530_v60, %v6905_v42  ;;  %v3540_v62 = vrot.slane %v3530_v60, %v6908_v54  ;;  %v3544_v63 = vrot.slane %v3530_v60, %v6911_v44  ;;  %v3548_v0 = vrot.slane %v3530_v60, %v6914_v45 }
 0x4cd   : > { %v3553_v29 = vmul.f32 %v3536_v61, %v7169_v57  ;;  %v3554_v1 = vmul.f32 %v3540_v62, %v7171_v58  ;;  %v3555_v33 = vmul.f32 %v3544_v63, %v7173_v59  ;;  %v3556_v2 = vmul.f32 %v3548_v0, %v7175_v27 }
 0x4ce   : > { %v3587_v57 = vmul.f32 %v3536_v61, %v7153_v47  ;;  %v3588_v58 = vmul.f32 %v3540_v62, %v7155_v11  ;;  %v3589_v59 = vmul.f32 %v3544_v63, %v7157_v31  ;;  %v3590_v27 = vmul.f32 %v3548_v0, %v7159_v12 }
 0x4cf   : > { %v3561_v4 = vcombine.low %v3553_v29, %v3554_v1  ;;  %v3562_v17 = vcombine.low %v3555_v33, %v3556_v2 }
 0x4d1   : > { %v3569_v7 = vrot.slane %v3561_v4, %v6847_v39  ;;  %v3576_v19 = vrot.slane %v3562_v17, %v6847_v39 }
 0x4d3   : > { %v3577_v20 = vcombine.low %v3569_v7, %v3576_v19 }
 0x4d5   : > { %v3584_v34 = vrot.slane %v3577_v20, %v6847_v39 }
 0x4d7   : > { %v3586_v3 = vsub.f32 %v3531_v55, %v3584_v34 }
 0x4d9   : > { %v3595_v6 = vrot.slane %v3586_v3, %v6905_v42  ;;  %v3599_v37 = vrot.slane %v3586_v3, %v6908_v54  ;;  %v3603_v21 = vrot.slane %v3586_v3, %v6911_v44  ;;  %v3607_v39 = vrot.slane %v3586_v3, %v6914_v45 }
 0x4db   : > { %v3612_v5 = vadd.f32 %v3595_v6, %v3587_v57  ;;  %v3613_v47 = vadd.f32 %v3599_v37, %v3588_v58  ;;  %v3614_v8 = vadd.f32 %v3603_v21, %v3589_v59  ;;  %v3615_v11 = vadd.f32 %v3607_v39, %v3590_v27 }
 0x4dd   : > { %5782 = vtanh.f32 %v3612_v5 }
 0x4de   : > { %5784 = vtanh.f32 %v3613_v47 }
 0x4df   : > { %5786 = vtanh.f32 %v3614_v8 }
 0x4e0   : > { %5788 = vtanh.f32 %v3615_v11 }
 0x4e7   : > { %v5783_v31 = vpop.eup %5782 }
 0x4e8   : > { %v5785_v12 = vpop.eup %5784  ;;  %3620 = vst [vmem:[%s6529_s29] sm:$0xff] %v5783_v31 }
 0x4e9   : > { %v5787_v42 = vpop.eup %5786  ;;  %3621 = vst [vmem:[%s6529_s29 + $0x8] sm:$0xff] %v5785_v12 }
 0x4ea   : > { %v5789_v54 = vpop.eup %5788  ;;  %3622 = vst [vmem:[%s6529_s29 + $0x10] sm:$0xff] %v5787_v42 }
 0x4eb   : > { %3623 = vst [vmem:[%s6529_s29 + $0x18] sm:$0xff] %v5789_v54 }
 0x4ec PF: > { %s29_s11 = sadd.s32 1, %s6076_s11   ;;  %s7318_s27 = sld [smem:[#allocation18_spill]] }
 0x4ed   : > { %p26_p3 = scmp.ge.s32.totalorder %s29_s11, 6   ;;  %s7319_s28 = sld [smem:[#allocation19_spill]] }
 0x4ee   : > { %s7320_s29 = sld [smem:[#allocation26_spill]]  ;;  %s7321_s30 = sld [smem:[#allocation22_spill]] }
 0x4ef   : > { %s7322_s9 = sld [smem:[#allocation23_spill]]  ;;  %s7323_s23 = sld [smem:[#allocation24_spill]] }
 0x4f0   : > { %s7324_s24 = smov %s6040_s25  ;;  %s7325_s25 = smov %s6044_s26 }
 0x4f1   : > { %s7326_s26 = smov %s6403_s14  ;;  %s7327_s8 = smov %s6072_s10 }
 0x4f2   :  { %28 = sbr.rel (!%p26_p3) target bundleno = 19 (0x13), region = 160 }
 0x4f5   : > { %s7328_s10 = smov %s7323_s23 }
 0x4f9   :  { %3645 = vsyncpa [#allocation4], 1 }
 0x4fa   :  { %3647 = vsyncpa [#allocation4 + $0x1], 1 }
 0x4fb   :  { %3648 = vsyncpa [#allocation6], 1 }
 0x4fc   :  { %3650 = vsyncpa [#allocation6 + $0x1], 1 }
 0x4fd   :  { %3651 = vsyncpa [#allocation9], 1 }
 0x4fe   :  { %3653 = vsyncpa [#allocation9 + $0x1], 1 }
 0x4ff   :  { %3654 = vsyncpa [#allocation12], 1 }
 0x500   :  { %3656 = vsyncpa [#allocation12 + $0x1], 1 }

</bundles_post_ra>
